<compile_context>
chip_gen: v5e
topology: v5e:2x2
jax: 0.10.0
libtpu: 0.0.40
codegen_flags: <defaults>
</compile_context>

<pallas_src>
import math

import jax
import jax.numpy as jnp
from jax import lax
from jax.experimental import pallas as pl
from jax.experimental.pallas import tpu as pltpu


def _bottleneck_kernel(x_ref, w1_ref, s1_ref, b1_ref,
                       w2_ref, s2_ref, b2_ref,
                       w3_ref, s3_ref, b3_ref, ks3_ref,
                       out_ref, pad_ref):
    """One batch sample of the Bottleneck block (NHWC, channels on lanes).

    x_ref   : (1, H, W, Cin)   bf16  input sample
    w1_ref  : (Cin, P1)        bf16  conv1 weight (transposed)
    s*_ref  : (1, 1, C)        f32   folded per-sample scale (BN * kernel_sel)
    b*_ref  : (1, C)           f32   folded BN bias
    w2_ref  : (9, P1, Wd)      bf16  conv2 weight, (dy*3+dx, cin, cout)
    w3_ref  : (Wd, Co)         bf16  conv3 weight (transposed)
    ks3_ref : (1, 1, Co)       f32   kernel_selection gate for the shortcut
    out_ref : (1, H, W, Co)    bf16  output sample
    pad_ref : (H+2, Wp, P1)    bf16  halo-padded conv1 activation scratch
    """
    _, H, W, Cin = x_ref.shape
    P1 = w1_ref.shape[1]
    Wd = w3_ref.shape[0]
    Co = w3_ref.shape[1]
    Hp2, Wp, _ = pad_ref.shape
    f32 = jnp.float32
    act_dt = pad_ref.dtype

    # ---- conv1 (1x1) -> folded (kernel_sel * BN) -> ReLU -------------------
    h = jnp.dot(x_ref[0].reshape(H * W, Cin), w1_ref[...],
                preferred_element_type=f32)
    h = h * s1_ref[0] + b1_ref[...]
    h = jnp.maximum(h, 0.0).astype(act_dt)

    # ---- conv2 (3x3, stride 1, pad 1) --------------------------------------
    # Zero only the 1-px halo border (every step: megacore-safe), then write
    # the interior; cols >= W+2 of the sublane-padded buffer are never read.
    zrow = jnp.zeros((1, Wp, P1), act_dt)
    zcol = jnp.zeros((Hp2, 1, P1), act_dt)
    pad_ref[0:1, :, :] = zrow
    pad_ref[H + 1:H + 2, :, :] = zrow
    pad_ref[:, 0:1, :] = zcol
    pad_ref[:, W + 1:W + 2, :] = zcol
    pad_ref[1:H + 1, 1:W + 1, :] = h.reshape(H, W, P1)

    acc = jnp.zeros((H * W, Wd), f32)
    for dy in range(3):                    # static, fully unrolled (9 taps)
        for dx in range(3):
            patch = pad_ref[dy:dy + H, dx:dx + W, :].reshape(H * W, P1)
            acc += jnp.dot(patch, w2_ref[dy * 3 + dx],
                           preferred_element_type=f32)
    h = acc * s2_ref[0] + b2_ref[...]
    h = jnp.maximum(h, 0.0).astype(act_dt)

    # ---- conv3 (1x1) -> folded (kernel_sel * BN) -> +shortcut -> ReLU ------
    h = jnp.dot(h, w3_ref[...], preferred_element_type=f32)
    h = h * s3_ref[0] + b3_ref[...]
    # Re-read x here (instead of keeping it live since conv1) for the shortcut.
    shortcut = x_ref[0].reshape(H * W, Cin).astype(f32) * ks3_ref[0]
    h = jnp.maximum(h + shortcut, 0.0)
    out_ref[0] = h.reshape(H, W, Co).astype(out_ref.dtype)


def bottleneck_forward(x_nchw, params, kernel_selection=None, *, eps=1e-5):
    """JAX wrapper reproducing Bottleneck.forward (inference)."""
    B, Cin, H, W = x_nchw.shape
    w1 = params["conv1_w"]        # (P1, Cin, 1, 1)
    w2 = params["conv2_w"]        # (Wd, P1, 3, 3)
    w3 = params["conv3_w"]        # (Co, Wd, 1, 1)
    P1, Wd, Co = w1.shape[0], w2.shape[0], w3.shape[0]
    assert Cin == Co, "identity shortcut requires inplanes == planes * expansion"
    # TODO(synk): stride > 1, groups (cardinality) > 1, a non-identity
    # `downsample`, drop_block and drop_path are not implemented — the default
    # module config makes them all no-ops.

    act_dt = jnp.bfloat16

    def fold_bn(prefix):
        gamma = params[f"{prefix}_gamma"].astype(jnp.float32)
        beta = params[f"{prefix}_beta"].astype(jnp.float32)
        mean = params[f"{prefix}_mean"].astype(jnp.float32)
        var = params[f"{prefix}_var"].astype(jnp.float32)
        scale = gamma * lax.rsqrt(var + eps)
        bias = beta - mean * scale
        return scale, bias

    sc1, bi1 = fold_bn("bn1")
    sc2, bi2 = fold_bn("bn2")
    sc3, bi3 = fold_bn("bn3")

    if kernel_selection is None:
        ks1 = jnp.ones((B, P1), jnp.float32)
        ks2 = jnp.ones((B, Wd), jnp.float32)
        ks3 = jnp.ones((B, Co), jnp.float32)
    else:
        ks = kernel_selection.astype(jnp.float32)
        ks1, ks2, ks3 = ks[:, 0, :P1], ks[:, 1, :Wd], ks[:, 2, :Co]

    # Fold kernel_selection into the per-sample BN scale (bias is unaffected:
    # (conv*ks)*scale + bias == conv*(ks*scale) + bias).  ks3 is also passed
    # separately because it scales the shortcut in the AdaResNet branch.
    s1 = (ks1 * sc1[None, :]).reshape(B, 1, P1)
    s2 = (ks2 * sc2[None, :]).reshape(B, 1, Wd)
    s3 = (ks3 * sc3[None, :]).reshape(B, 1, Co)
    b1 = bi1.reshape(1, P1)
    b2 = bi2.reshape(1, Wd)
    b3 = bi3.reshape(1, Co)
    ks3_arr = ks3.reshape(B, 1, Co)

    # Pre-transpose weights so the kernel always computes x @ W; cast to bf16.
    w1_t = jnp.transpose(w1.reshape(P1, Cin), (1, 0)).astype(act_dt)          # (Cin, P1)
    w2_t = jnp.transpose(w2, (2, 3, 1, 0)).reshape(9, P1, Wd).astype(act_dt)  # (9, P1, Wd)
    w3_t = jnp.transpose(w3.reshape(Co, Wd), (1, 0)).astype(act_dt)           # (Wd, Co)

    x_nhwc = jnp.transpose(x_nchw, (0, 2, 3, 1)).astype(act_dt)

    Wp = ((W + 2 + 7) // 8) * 8    # sublane-padded halo width

    # Explicit VMEM budget: double-buffered x/out blocks + weights + scratch.
    x_blk = H * W * Cin * 2
    o_blk = H * W * Co * 2
    w_bytes = (Cin * P1 + 9 * P1 * Wd + Wd * Co) * 2
    s_bytes = 4 * (2 * P1 + 2 * Wd + 3 * Co)
    pad_bytes = (H + 2) * Wp * P1 * 2
    needed = 2 * (x_blk + o_blk) + 2 * (w_bytes + s_bytes) + pad_bytes
    vmem_limit = int(min(64 * 2**20, max(8 * 2**20, 4 * needed)))

    out_nhwc = pl.pallas_call(
        _bottleneck_kernel,
        out_shape=jax.ShapeDtypeStruct((B, H, W, Co), act_dt),
        grid=(B,),
        in_specs=[
            pl.BlockSpec((1, H, W, Cin), lambda b: (b, 0, 0, 0)),   # x
            pl.BlockSpec((Cin, P1), lambda b: (0, 0)),              # w1
            pl.BlockSpec((1, 1, P1), lambda b: (b, 0, 0)),          # s1 (BN*ks)
            pl.BlockSpec((1, P1), lambda b: (0, 0)),                # b1
            pl.BlockSpec((9, P1, Wd), lambda b: (0, 0, 0)),         # w2
            pl.BlockSpec((1, 1, Wd), lambda b: (b, 0, 0)),          # s2
            pl.BlockSpec((1, Wd), lambda b: (0, 0)),                # b2
            pl.BlockSpec((Wd, Co), lambda b: (0, 0)),               # w3
            pl.BlockSpec((1, 1, Co), lambda b: (b, 0, 0)),          # s3
            pl.BlockSpec((1, Co), lambda b: (0, 0)),                # b3
            pl.BlockSpec((1, 1, Co), lambda b: (b, 0, 0)),          # ks3 (shortcut)
        ],
        out_specs=pl.BlockSpec((1, H, W, Co), lambda b: (b, 0, 0, 0)),
        scratch_shapes=[pltpu.VMEM((H + 2, Wp, P1), act_dt)],
        compiler_params=pltpu.CompilerParams(
            dimension_semantics=("parallel",),
            vmem_limit_bytes=vmem_limit),
    )(x_nhwc, w1_t, s1, b1, w2_t, s2, b2, w3_t, s3, b3, ks3_arr)

    # Back to the PyTorch NCHW / f32 interface.
    return jnp.transpose(out_nhwc.astype(jnp.float32), (0, 3, 1, 2))


def _reference_forward(x, params, kernel_selection=None, *, eps=1e-5):
    """Pure-JAX reference.  Inputs / weights / activations are rounded to bf16
    at the same points as the Pallas kernel (f32 accumulation in both), so the
    comparison isolates algorithmic errors rather than bf16 quantization."""
    q = lambda a: a.astype(jnp.bfloat16).astype(jnp.float32)

    def conv(h, w, padding):
        return lax.conv_general_dilated(
            h, q(w.astype(jnp.float32)), window_strides=(1, 1), padding=padding,
            dimension_numbers=("NCHW", "OIHW", "NCHW"),
            precision=lax.Precision.HIGHEST)

    def bn(h, prefix):
        gamma = params[f"{prefix}_gamma"]
        beta = params[f"{prefix}_beta"]
        mean = params[f"{prefix}_mean"]
        var = params[f"{prefix}_var"]
        scale = gamma / jnp.sqrt(var + eps)
        bias = beta - mean * scale
        return h * scale[None, :, None, None] + bias[None, :, None, None]

    P1 = params["conv1_w"].shape[0]
    Wd = params["conv2_w"].shape[0]
    Co = params["conv3_w"].shape[0]

    x = q(x.astype(jnp.float32))
    shortcut = x

    h = conv(x, params["conv1_w"], padding=((0, 0), (0, 0)))
    if kernel_selection is not None:
        h = h * kernel_selection[:, 0, :P1][:, :, None, None]
    h = q(jax.nn.relu(bn(h, "bn1")))

    h = conv(h, params["conv2_w"], padding=((1, 1), (1, 1)))
    if kernel_selection is not None:
        h = h * kernel_selection[:, 1, :Wd][:, :, None, None]
    h = q(jax.nn.relu(bn(h, "bn2")))

    h = conv(h, params["conv3_w"], padding=((0, 0), (0, 0)))
    if kernel_selection is not None:
        h = h * kernel_selection[:, 2, :Co][:, :, None, None]
    h = bn(h, "bn3")
    if kernel_selection is not None:
        h = h + shortcut * kernel_selection[:, 2, :Co][:, :, None, None]
    else:
        h = h + shortcut
    return q(jax.nn.relu(h))


def _init_params(key, inplanes, planes, *, base_width=64, cardinality=1,
                 expansion=4):
    width = int(math.floor(planes * (base_width / 64)) * cardinality)
    first_planes = width        # reduce_first = 1
    outplanes = planes * expansion
    keys = iter(jax.random.split(key, 16))

    def conv_init(k, shape):
        fan_in = shape[1] * shape[2] * shape[3]
        return jax.random.normal(k, shape, jnp.float32) / math.sqrt(fan_in)

    params = {
        "conv1_w": conv_init(next(keys), (first_planes, inplanes, 1, 1)),
        "conv2_w": conv_init(next(keys), (width, first_planes, 3, 3)),
        "conv3_w": conv_init(next(keys), (outplanes, width, 1, 1)),
    }
    for name, c in (("bn1", first_planes), ("bn2", width), ("bn3", outplanes)):
        params[f"{name}_gamma"] = jax.random.uniform(next(keys), (c,), jnp.float32, 0.5, 1.5)
        params[f"{name}_beta"] = jax.random.normal(next(keys), (c,), jnp.float32) * 0.1
        params[f"{name}_mean"] = jax.random.normal(next(keys), (c,), jnp.float32) * 0.1
        params[f"{name}_var"] = jax.random.uniform(next(keys), (c,), jnp.float32, 0.5, 1.5)
    return params


if __name__ == "__main__":
    B = 2
    planes = 16
    inplanes = planes * 4      # == outplanes, so the identity shortcut applies
    H = W = 16

    root = jax.random.PRNGKey(0)
    k_x, k_p, k_sel = jax.random.split(root, 3)

    x = jax.random.normal(k_x, (B, inplanes, H, W), dtype=jnp.float32)
    params = _init_params(k_p, inplanes, planes)

    # Binary per-(sample, stage, channel) gates, like AdaResNet's
    # FilterSelectModule output (Improved_SemHash yields 0/1 floats).
    kernel_selection = jax.random.bernoulli(
        k_sel, 0.7, (B, 3, inplanes)).astype(jnp.float32)

    # Path 1: kernel_selection is None (plain Bottleneck).
    out0 = jax.block_until_ready(bottleneck_forward(x, params, None))
    ref0 = _reference_forward(x, params, None)
    assert out0.shape == (B, inplanes, H, W), out0.shape
    err0 = float(jnp.max(jnp.abs(out0 - ref0)))
    assert jnp.allclose(out0, ref0, atol=2e-2, rtol=2e-2), err0

    # Path 2: with kernel_selection (AdaResNet branch).
    out1 = jax.block_until_ready(bottleneck_forward(x, params, kernel_selection))
    ref1 = _reference_forward(x, params, kernel_selection)
    err1 = float(jnp.max(jnp.abs(out1 - ref1)))
    assert jnp.allclose(out1, ref1, atol=2e-2, rtol=2e-2), err1

    print("KERNEL_OK")
</pallas_src>

<mosaic_0001>
module attributes {stable_mosaic.version = 11 : i64} {
  func.func @_bottleneck_kernel(%arg0: i32, %arg1: memref<1x16x16x64xbf16, #tpu.memory_space<vmem>>, %arg2: memref<64x16xbf16, #tpu.memory_space<vmem>>, %arg3: memref<1x1x16xf32, #tpu.memory_space<vmem>>, %arg4: memref<1x16xf32, #tpu.memory_space<vmem>>, %arg5: memref<9x16x16xbf16, #tpu.memory_space<vmem>>, %arg6: memref<1x1x16xf32, #tpu.memory_space<vmem>>, %arg7: memref<1x16xf32, #tpu.memory_space<vmem>>, %arg8: memref<16x64xbf16, #tpu.memory_space<vmem>>, %arg9: memref<1x1x64xf32, #tpu.memory_space<vmem>>, %arg10: memref<1x64xf32, #tpu.memory_space<vmem>>, %arg11: memref<1x1x64xf32, #tpu.memory_space<vmem>>, %arg12: memref<1x16x16x64xbf16, #tpu.memory_space<vmem>>, %arg13: memref<18x24x16xbf16, #tpu.memory_space<vmem>>) attributes {dimension_semantics = [#tpu.dimension_semantics<parallel>], iteration_bounds = array<i64: 2>, scalar_prefetch = 0 : i64, scratch_operands = 1 : i64, tpu.core_type = #tpu.core_type<tc>, window_params = [{transform_indices = @transform_0, window_bounds = array<i64: 1, 16, 16, 64>}, {pipeline_mode = #tpu.pipeline_mode<synchronous>, transform_indices = @transform_1, window_bounds = array<i64: 64, 16>}, {transform_indices = @transform_2, window_bounds = array<i64: 1, 1, 16>}, {pipeline_mode = #tpu.pipeline_mode<synchronous>, transform_indices = @transform_3, window_bounds = array<i64: 1, 16>}, {pipeline_mode = #tpu.pipeline_mode<synchronous>, transform_indices = @transform_4, window_bounds = array<i64: 9, 16, 16>}, {transform_indices = @transform_5, window_bounds = array<i64: 1, 1, 16>}, {pipeline_mode = #tpu.pipeline_mode<synchronous>, transform_indices = @transform_6, window_bounds = array<i64: 1, 16>}, {pipeline_mode = #tpu.pipeline_mode<synchronous>, transform_indices = @transform_7, window_bounds = array<i64: 16, 64>}, {transform_indices = @transform_8, window_bounds = array<i64: 1, 1, 64>}, {pipeline_mode = #tpu.pipeline_mode<synchronous>, transform_indices = @transform_9, window_bounds = array<i64: 1, 64>}, {transform_indices = @transform_10, window_bounds = array<i64: 1, 1, 64>}, {transform_indices = @transform_11, window_bounds = array<i64: 1, 16, 16, 64>}]} {
    %c0 = arith.constant 0 : index
    %c0_0 = arith.constant 0 : index
    %c0_1 = arith.constant 0 : index
    %c0_2 = arith.constant 0 : index
    %0 = vector.load %arg1[%c0, %c0_0, %c0_1, %c0_2] : memref<1x16x16x64xbf16, #tpu.memory_space<vmem>>, vector<1x16x16x64xbf16>
    %1 = vector.shape_cast %0 : vector<1x16x16x64xbf16> to vector<16x16x64xbf16>
    %2 = vector.shape_cast %1 : vector<16x16x64xbf16> to vector<256x64xbf16>
    %c0_3 = arith.constant 0 : index
    %c0_4 = arith.constant 0 : index
    %3 = vector.load %arg2[%c0_3, %c0_4] : memref<64x16xbf16, #tpu.memory_space<vmem>>, vector<64x16xbf16>
    %cst = arith.constant dense<0.000000e+00> : vector<256x16xf32>
    %4 = tpu.matmul %2, %3, %cst {dimension_numbers = #tpu.dot_dimension_numbers<[1], [0], [0], [1], [0, 0, 1, 1], [], []>} : vector<256x64xbf16>, vector<64x16xbf16>, vector<256x16xf32> -> vector<256x16xf32>
    %c0_5 = arith.constant 0 : index
    %c0_6 = arith.constant 0 : index
    %c0_7 = arith.constant 0 : index
    %5 = vector.load %arg3[%c0_5, %c0_6, %c0_7] : memref<1x1x16xf32, #tpu.memory_space<vmem>>, vector<1x1x16xf32>
    %6 = vector.shape_cast %5 : vector<1x1x16xf32> to vector<1x16xf32>
    %7 = vector.broadcast %6 : vector<1x16xf32> to vector<256x16xf32>
    %8 = arith.mulf %4, %7 : vector<256x16xf32>
    %c0_8 = arith.constant 0 : index
    %c0_9 = arith.constant 0 : index
    %9 = vector.load %arg4[%c0_8, %c0_9] : memref<1x16xf32, #tpu.memory_space<vmem>>, vector<1x16xf32>
    %10 = vector.broadcast %9 : vector<1x16xf32> to vector<256x16xf32>
    %11 = arith.addf %8, %10 : vector<256x16xf32>
    %cst_10 = arith.constant 0.000000e+00 : f32
    %12 = vector.broadcast %cst_10 : f32 to vector<256x16xf32>
    %13 = arith.maximumf %11, %12 : vector<256x16xf32>
    %14 = arith.truncf %13 : vector<256x16xf32> to vector<256x16xbf16>
    %cst_11 = arith.constant 0.000000e+00 : bf16
    %15 = vector.broadcast %cst_11 : bf16 to vector<1x24x16xbf16>
    %cst_12 = arith.constant 0.000000e+00 : bf16
    %16 = vector.broadcast %cst_12 : bf16 to vector<18x1x16xbf16>
    %c0_13 = arith.constant 0 : index
    %c0_14 = arith.constant 0 : index
    %c0_15 = arith.constant 0 : index
    %17 = vector.load %arg13[%c0_13, %c0_14, %c0_15] : memref<18x24x16xbf16, #tpu.memory_space<vmem>>, vector<1x24x16xbf16>
    tpu.vector_store %arg13[%c0_13, %c0_14, %c0_15], %15 {strides = array<i32>} : memref<18x24x16xbf16, #tpu.memory_space<vmem>>, vector<1x24x16xbf16>,
    %c17 = arith.constant 17 : index
    %c0_16 = arith.constant 0 : index
    %c0_17 = arith.constant 0 : index
    %18 = vector.load %arg13[%c17, %c0_16, %c0_17] : memref<18x24x16xbf16, #tpu.memory_space<vmem>>, vector<1x24x16xbf16>
    tpu.vector_store %arg13[%c17, %c0_16, %c0_17], %15 {strides = array<i32>} : memref<18x24x16xbf16, #tpu.memory_space<vmem>>, vector<1x24x16xbf16>,
    %c0_18 = arith.constant 0 : index
    %c0_19 = arith.constant 0 : index
    %c0_20 = arith.constant 0 : index
    %19 = vector.load %arg13[%c0_18, %c0_19, %c0_20] : memref<18x24x16xbf16, #tpu.memory_space<vmem>>, vector<18x1x16xbf16>
    tpu.vector_store %arg13[%c0_18, %c0_19, %c0_20], %16 {strides = array<i32>} : memref<18x24x16xbf16, #tpu.memory_space<vmem>>, vector<18x1x16xbf16>,
    %c0_21 = arith.constant 0 : index
    %c17_22 = arith.constant 17 : index
    %c0_23 = arith.constant 0 : index
    %20 = vector.load %arg13[%c0_21, %c17_22, %c0_23] : memref<18x24x16xbf16, #tpu.memory_space<vmem>>, vector<18x1x16xbf16>
    tpu.vector_store %arg13[%c0_21, %c17_22, %c0_23], %16 {strides = array<i32>} : memref<18x24x16xbf16, #tpu.memory_space<vmem>>, vector<18x1x16xbf16>,
    %21 = vector.shape_cast %14 : vector<256x16xbf16> to vector<16x16x16xbf16>
    %c1 = arith.constant 1 : index
    %c1_24 = arith.constant 1 : index
    %c0_25 = arith.constant 0 : index
    %22 = vector.load %arg13[%c1, %c1_24, %c0_25] : memref<18x24x16xbf16, #tpu.memory_space<vmem>>, vector<16x16x16xbf16>
    tpu.vector_store %arg13[%c1, %c1_24, %c0_25], %21 {strides = array<i32>} : memref<18x24x16xbf16, #tpu.memory_space<vmem>>, vector<16x16x16xbf16>,
    %cst_26 = arith.constant 0.000000e+00 : f32
    %23 = vector.broadcast %cst_26 : f32 to vector<256x16xf32>
    %c0_27 = arith.constant 0 : index
    %c0_28 = arith.constant 0 : index
    %c0_29 = arith.constant 0 : index
    %24 = vector.load %arg13[%c0_27, %c0_28, %c0_29] : memref<18x24x16xbf16, #tpu.memory_space<vmem>>, vector<16x16x16xbf16>
    %25 = vector.shape_cast %24 : vector<16x16x16xbf16> to vector<256x16xbf16>
    %c0_30 = arith.constant 0 : index
    %c0_31 = arith.constant 0 : index
    %c0_32 = arith.constant 0 : index
    %26 = vector.load %arg5[%c0_30, %c0_31, %c0_32] : memref<9x16x16xbf16, #tpu.memory_space<vmem>>, vector<1x16x16xbf16>
    %27 = vector.shape_cast %26 : vector<1x16x16xbf16> to vector<16x16xbf16>
    %cst_33 = arith.constant dense<0.000000e+00> : vector<256x16xf32>
    %28 = tpu.matmul %25, %27, %cst_33 {dimension_numbers = #tpu.dot_dimension_numbers<[1], [0], [0], [1], [0, 0, 1, 1], [], []>} : vector<256x16xbf16>, vector<16x16xbf16>, vector<256x16xf32> -> vector<256x16xf32>
    %29 = arith.addf %23, %28 : vector<256x16xf32>
    %c0_34 = arith.constant 0 : index
    %c1_35 = arith.constant 1 : index
    %c0_36 = arith.constant 0 : index
    %30 = vector.load %arg13[%c0_34, %c1_35, %c0_36] : memref<18x24x16xbf16, #tpu.memory_space<vmem>>, vector<16x16x16xbf16>
    %31 = vector.shape_cast %30 : vector<16x16x16xbf16> to vector<256x16xbf16>
    %c1_37 = arith.constant 1 : index
    %c0_38 = arith.constant 0 : index
    %c0_39 = arith.constant 0 : index
    %32 = vector.load %arg5[%c1_37, %c0_38, %c0_39] : memref<9x16x16xbf16, #tpu.memory_space<vmem>>, vector<1x16x16xbf16>
    %33 = vector.shape_cast %32 : vector<1x16x16xbf16> to vector<16x16xbf16>
    %cst_40 = arith.constant dense<0.000000e+00> : vector<256x16xf32>
    %34 = tpu.matmul %31, %33, %cst_40 {dimension_numbers = #tpu.dot_dimension_numbers<[1], [0], [0], [1], [0, 0, 1, 1], [], []>} : vector<256x16xbf16>, vector<16x16xbf16>, vector<256x16xf32> -> vector<256x16xf32>
    %35 = arith.addf %29, %34 : vector<256x16xf32>
    %c0_41 = arith.constant 0 : index
    %c2 = arith.constant 2 : index
    %c0_42 = arith.constant 0 : index
    %36 = vector.load %arg13[%c0_41, %c2, %c0_42] : memref<18x24x16xbf16, #tpu.memory_space<vmem>>, vector<16x16x16xbf16>
    %37 = vector.shape_cast %36 : vector<16x16x16xbf16> to vector<256x16xbf16>
    %c2_43 = arith.constant 2 : index
    %c0_44 = arith.constant 0 : index
    %c0_45 = arith.constant 0 : index
    %38 = vector.load %arg5[%c2_43, %c0_44, %c0_45] : memref<9x16x16xbf16, #tpu.memory_space<vmem>>, vector<1x16x16xbf16>
    %39 = vector.shape_cast %38 : vector<1x16x16xbf16> to vector<16x16xbf16>
    %cst_46 = arith.constant dense<0.000000e+00> : vector<256x16xf32>
    %40 = tpu.matmul %37, %39, %cst_46 {dimension_numbers = #tpu.dot_dimension_numbers<[1], [0], [0], [1], [0, 0, 1, 1], [], []>} : vector<256x16xbf16>, vector<16x16xbf16>, vector<256x16xf32> -> vector<256x16xf32>
    %41 = arith.addf %35, %40 : vector<256x16xf32>
    %c1_47 = arith.constant 1 : index
    %c0_48 = arith.constant 0 : index
    %c0_49 = arith.constant 0 : index
    %42 = vector.load %arg13[%c1_47, %c0_48, %c0_49] : memref<18x24x16xbf16, #tpu.memory_space<vmem>>, vector<16x16x16xbf16>
    %43 = vector.shape_cast %42 : vector<16x16x16xbf16> to vector<256x16xbf16>
    %c3 = arith.constant 3 : index
    %c0_50 = arith.constant 0 : index
    %c0_51 = arith.constant 0 : index
    %44 = vector.load %arg5[%c3, %c0_50, %c0_51] : memref<9x16x16xbf16, #tpu.memory_space<vmem>>, vector<1x16x16xbf16>
    %45 = vector.shape_cast %44 : vector<1x16x16xbf16> to vector<16x16xbf16>
    %cst_52 = arith.constant dense<0.000000e+00> : vector<256x16xf32>
    %46 = tpu.matmul %43, %45, %cst_52 {dimension_numbers = #tpu.dot_dimension_numbers<[1], [0], [0], [1], [0, 0, 1, 1], [], []>} : vector<256x16xbf16>, vector<16x16xbf16>, vector<256x16xf32> -> vector<256x16xf32>
    %47 = arith.addf %41, %46 : vector<256x16xf32>
    %c1_53 = arith.constant 1 : index
    %c1_54 = arith.constant 1 : index
    %c0_55 = arith.constant 0 : index
    %48 = vector.load %arg13[%c1_53, %c1_54, %c0_55] : memref<18x24x16xbf16, #tpu.memory_space<vmem>>, vector<16x16x16xbf16>
    %49 = vector.shape_cast %48 : vector<16x16x16xbf16> to vector<256x16xbf16>
    %c4 = arith.constant 4 : index
    %c0_56 = arith.constant 0 : index
    %c0_57 = arith.constant 0 : index
    %50 = vector.load %arg5[%c4, %c0_56, %c0_57] : memref<9x16x16xbf16, #tpu.memory_space<vmem>>, vector<1x16x16xbf16>
    %51 = vector.shape_cast %50 : vector<1x16x16xbf16> to vector<16x16xbf16>
    %cst_58 = arith.constant dense<0.000000e+00> : vector<256x16xf32>
    %52 = tpu.matmul %49, %51, %cst_58 {dimension_numbers = #tpu.dot_dimension_numbers<[1], [0], [0], [1], [0, 0, 1, 1], [], []>} : vector<256x16xbf16>, vector<16x16xbf16>, vector<256x16xf32> -> vector<256x16xf32>
    %53 = arith.addf %47, %52 : vector<256x16xf32>
    %c1_59 = arith.constant 1 : index
    %c2_60 = arith.constant 2 : index
    %c0_61 = arith.constant 0 : index
    %54 = vector.load %arg13[%c1_59, %c2_60, %c0_61] : memref<18x24x16xbf16, #tpu.memory_space<vmem>>, vector<16x16x16xbf16>
    %55 = vector.shape_cast %54 : vector<16x16x16xbf16> to vector<256x16xbf16>
    %c5 = arith.constant 5 : index
    %c0_62 = arith.constant 0 : index
    %c0_63 = arith.constant 0 : index
    %56 = vector.load %arg5[%c5, %c0_62, %c0_63] : memref<9x16x16xbf16, #tpu.memory_space<vmem>>, vector<1x16x16xbf16>
    %57 = vector.shape_cast %56 : vector<1x16x16xbf16> to vector<16x16xbf16>
    %cst_64 = arith.constant dense<0.000000e+00> : vector<256x16xf32>
    %58 = tpu.matmul %55, %57, %cst_64 {dimension_numbers = #tpu.dot_dimension_numbers<[1], [0], [0], [1], [0, 0, 1, 1], [], []>} : vector<256x16xbf16>, vector<16x16xbf16>, vector<256x16xf32> -> vector<256x16xf32>
    %59 = arith.addf %53, %58 : vector<256x16xf32>
    %c2_65 = arith.constant 2 : index
    %c0_66 = arith.constant 0 : index
    %c0_67 = arith.constant 0 : index
    %60 = vector.load %arg13[%c2_65, %c0_66, %c0_67] : memref<18x24x16xbf16, #tpu.memory_space<vmem>>, vector<16x16x16xbf16>
    %61 = vector.shape_cast %60 : vector<16x16x16xbf16> to vector<256x16xbf16>
    %c6 = arith.constant 6 : index
    %c0_68 = arith.constant 0 : index
    %c0_69 = arith.constant 0 : index
    %62 = vector.load %arg5[%c6, %c0_68, %c0_69] : memref<9x16x16xbf16, #tpu.memory_space<vmem>>, vector<1x16x16xbf16>
    %63 = vector.shape_cast %62 : vector<1x16x16xbf16> to vector<16x16xbf16>
    %cst_70 = arith.constant dense<0.000000e+00> : vector<256x16xf32>
    %64 = tpu.matmul %61, %63, %cst_70 {dimension_numbers = #tpu.dot_dimension_numbers<[1], [0], [0], [1], [0, 0, 1, 1], [], []>} : vector<256x16xbf16>, vector<16x16xbf16>, vector<256x16xf32> -> vector<256x16xf32>
    %65 = arith.addf %59, %64 : vector<256x16xf32>
    %c2_71 = arith.constant 2 : index
    %c1_72 = arith.constant 1 : index
    %c0_73 = arith.constant 0 : index
    %66 = vector.load %arg13[%c2_71, %c1_72, %c0_73] : memref<18x24x16xbf16, #tpu.memory_space<vmem>>, vector<16x16x16xbf16>
    %67 = vector.shape_cast %66 : vector<16x16x16xbf16> to vector<256x16xbf16>
    %c7 = arith.constant 7 : index
    %c0_74 = arith.constant 0 : index
    %c0_75 = arith.constant 0 : index
    %68 = vector.load %arg5[%c7, %c0_74, %c0_75] : memref<9x16x16xbf16, #tpu.memory_space<vmem>>, vector<1x16x16xbf16>
    %69 = vector.shape_cast %68 : vector<1x16x16xbf16> to vector<16x16xbf16>
    %cst_76 = arith.constant dense<0.000000e+00> : vector<256x16xf32>
    %70 = tpu.matmul %67, %69, %cst_76 {dimension_numbers = #tpu.dot_dimension_numbers<[1], [0], [0], [1], [0, 0, 1, 1], [], []>} : vector<256x16xbf16>, vector<16x16xbf16>, vector<256x16xf32> -> vector<256x16xf32>
    %71 = arith.addf %65, %70 : vector<256x16xf32>
    %c2_77 = arith.constant 2 : index
    %c2_78 = arith.constant 2 : index
    %c0_79 = arith.constant 0 : index
    %72 = vector.load %arg13[%c2_77, %c2_78, %c0_79] : memref<18x24x16xbf16, #tpu.memory_space<vmem>>, vector<16x16x16xbf16>
    %73 = vector.shape_cast %72 : vector<16x16x16xbf16> to vector<256x16xbf16>
    %c8 = arith.constant 8 : index
    %c0_80 = arith.constant 0 : index
    %c0_81 = arith.constant 0 : index
    %74 = vector.load %arg5[%c8, %c0_80, %c0_81] : memref<9x16x16xbf16, #tpu.memory_space<vmem>>, vector<1x16x16xbf16>
    %75 = vector.shape_cast %74 : vector<1x16x16xbf16> to vector<16x16xbf16>
    %cst_82 = arith.constant dense<0.000000e+00> : vector<256x16xf32>
    %76 = tpu.matmul %73, %75, %cst_82 {dimension_numbers = #tpu.dot_dimension_numbers<[1], [0], [0], [1], [0, 0, 1, 1], [], []>} : vector<256x16xbf16>, vector<16x16xbf16>, vector<256x16xf32> -> vector<256x16xf32>
    %77 = arith.addf %71, %76 : vector<256x16xf32>
    %c0_83 = arith.constant 0 : index
    %c0_84 = arith.constant 0 : index
    %c0_85 = arith.constant 0 : index
    %78 = vector.load %arg6[%c0_83, %c0_84, %c0_85] : memref<1x1x16xf32, #tpu.memory_space<vmem>>, vector<1x1x16xf32>
    %79 = vector.shape_cast %78 : vector<1x1x16xf32> to vector<1x16xf32>
    %80 = vector.broadcast %79 : vector<1x16xf32> to vector<256x16xf32>
    %81 = arith.mulf %77, %80 : vector<256x16xf32>
    %c0_86 = arith.constant 0 : index
    %c0_87 = arith.constant 0 : index
    %82 = vector.load %arg7[%c0_86, %c0_87] : memref<1x16xf32, #tpu.memory_space<vmem>>, vector<1x16xf32>
    %83 = vector.broadcast %82 : vector<1x16xf32> to vector<256x16xf32>
    %84 = arith.addf %81, %83 : vector<256x16xf32>
    %cst_88 = arith.constant 0.000000e+00 : f32
    %85 = vector.broadcast %cst_88 : f32 to vector<256x16xf32>
    %86 = arith.maximumf %84, %85 : vector<256x16xf32>
    %87 = arith.truncf %86 : vector<256x16xf32> to vector<256x16xbf16>
    %c0_89 = arith.constant 0 : index
    %c0_90 = arith.constant 0 : index
    %88 = vector.load %arg8[%c0_89, %c0_90] : memref<16x64xbf16, #tpu.memory_space<vmem>>, vector<16x64xbf16>
    %cst_91 = arith.constant dense<0.000000e+00> : vector<256x64xf32>
    %89 = tpu.matmul %87, %88, %cst_91 {dimension_numbers = #tpu.dot_dimension_numbers<[1], [0], [0], [1], [0, 0, 1, 1], [], []>} : vector<256x16xbf16>, vector<16x64xbf16>, vector<256x64xf32> -> vector<256x64xf32>
    %c0_92 = arith.constant 0 : index
    %c0_93 = arith.constant 0 : index
    %c0_94 = arith.constant 0 : index
    %90 = vector.load %arg9[%c0_92, %c0_93, %c0_94] : memref<1x1x64xf32, #tpu.memory_space<vmem>>, vector<1x1x64xf32>
    %91 = vector.shape_cast %90 : vector<1x1x64xf32> to vector<1x64xf32>
    %92 = vector.broadcast %91 : vector<1x64xf32> to vector<256x64xf32>
    %93 = arith.mulf %89, %92 : vector<256x64xf32>
    %c0_95 = arith.constant 0 : index
    %c0_96 = arith.constant 0 : index
    %94 = vector.load %arg10[%c0_95, %c0_96] : memref<1x64xf32, #tpu.memory_space<vmem>>, vector<1x64xf32>
    %95 = vector.broadcast %94 : vector<1x64xf32> to vector<256x64xf32>
    %96 = arith.addf %93, %95 : vector<256x64xf32>
    %c0_97 = arith.constant 0 : index
    %c0_98 = arith.constant 0 : index
    %c0_99 = arith.constant 0 : index
    %c0_100 = arith.constant 0 : index
    %97 = vector.load %arg1[%c0_97, %c0_98, %c0_99, %c0_100] : memref<1x16x16x64xbf16, #tpu.memory_space<vmem>>, vector<1x16x16x64xbf16>
    %98 = vector.shape_cast %97 : vector<1x16x16x64xbf16> to vector<16x16x64xbf16>
    %99 = vector.shape_cast %98 : vector<16x16x64xbf16> to vector<256x64xbf16>
    %100 = arith.extf %99 : vector<256x64xbf16> to vector<256x64xf32>
    %c0_101 = arith.constant 0 : index
    %c0_102 = arith.constant 0 : index
    %c0_103 = arith.constant 0 : index
    %101 = vector.load %arg11[%c0_101, %c0_102, %c0_103] : memref<1x1x64xf32, #tpu.memory_space<vmem>>, vector<1x1x64xf32>
    %102 = vector.shape_cast %101 : vector<1x1x64xf32> to vector<1x64xf32>
    %103 = vector.broadcast %102 : vector<1x64xf32> to vector<256x64xf32>
    %104 = arith.mulf %100, %103 : vector<256x64xf32>
    %105 = arith.addf %96, %104 : vector<256x64xf32>
    %cst_104 = arith.constant 0.000000e+00 : f32
    %106 = vector.broadcast %cst_104 : f32 to vector<256x64xf32>
    %107 = arith.maximumf %105, %106 : vector<256x64xf32>
    %108 = vector.shape_cast %107 : vector<256x64xf32> to vector<16x16x64xf32>
    %109 = arith.truncf %108 : vector<16x16x64xf32> to vector<16x16x64xbf16>
    %c0_105 = arith.constant 0 : index
    %c0_106 = arith.constant 0 : index
    %c0_107 = arith.constant 0 : index
    %c0_108 = arith.constant 0 : index
    %110 = vector.load %arg12[%c0_105, %c0_106, %c0_107, %c0_108] : memref<1x16x16x64xbf16, #tpu.memory_space<vmem>>, vector<1x16x16x64xbf16>
    %111 = vector.shape_cast %110 : vector<1x16x16x64xbf16> to vector<16x16x64xbf16>
    %112 = vector.shape_cast %109 : vector<16x16x64xbf16> to vector<1x16x16x64xbf16>
    tpu.vector_store %arg12[%c0_105, %c0_106, %c0_107, %c0_108], %112 {strides = array<i32>} : memref<1x16x16x64xbf16, #tpu.memory_space<vmem>>, vector<1x16x16x64xbf16>,
    return
  }
  func.func @transform_0(%arg0: i32) -> (i32, i32, i32, i32) {
    %c0_i32 = arith.constant 0 : i32
    %c0_i32_0 = arith.constant 0 : i32
    %c0_i32_1 = arith.constant 0 : i32
    %c0_i32_2 = arith.constant 0 : i32
    return %arg0, %c0_i32, %c0_i32_0, %c0_i32_1 : i32, i32, i32, i32
  }
  func.func @transform_1(%arg0: i32) -> (i32, i32) {
    %c0_i32 = arith.constant 0 : i32
    %c0_i32_0 = arith.constant 0 : i32
    %c0_i32_1 = arith.constant 0 : i32
    return %c0_i32, %c0_i32_0 : i32, i32
  }
  func.func @transform_2(%arg0: i32) -> (i32, i32, i32) {
    %c0_i32 = arith.constant 0 : i32
    %c0_i32_0 = arith.constant 0 : i32
    %c0_i32_1 = arith.constant 0 : i32
    return %arg0, %c0_i32, %c0_i32_0 : i32, i32, i32
  }
  func.func @transform_3(%arg0: i32) -> (i32, i32) {
    %c0_i32 = arith.constant 0 : i32
    %c0_i32_0 = arith.constant 0 : i32
    %c0_i32_1 = arith.constant 0 : i32
    return %c0_i32, %c0_i32_0 : i32, i32
  }
  func.func @transform_4(%arg0: i32) -> (i32, i32, i32) {
    %c0_i32 = arith.constant 0 : i32
    %c0_i32_0 = arith.constant 0 : i32
    %c0_i32_1 = arith.constant 0 : i32
    %c0_i32_2 = arith.constant 0 : i32
    return %c0_i32, %c0_i32_0, %c0_i32_1 : i32, i32, i32
  }
  func.func @transform_5(%arg0: i32) -> (i32, i32, i32) {
    %c0_i32 = arith.constant 0 : i32
    %c0_i32_0 = arith.constant 0 : i32
    %c0_i32_1 = arith.constant 0 : i32
    return %arg0, %c0_i32, %c0_i32_0 : i32, i32, i32
  }
  func.func @transform_6(%arg0: i32) -> (i32, i32) {
    %c0_i32 = arith.constant 0 : i32
    %c0_i32_0 = arith.constant 0 : i32
    %c0_i32_1 = arith.constant 0 : i32
    return %c0_i32, %c0_i32_0 : i32, i32
  }
  func.func @transform_7(%arg0: i32) -> (i32, i32) {
    %c0_i32 = arith.constant 0 : i32
    %c0_i32_0 = arith.constant 0 : i32
    %c0_i32_1 = arith.constant 0 : i32
    return %c0_i32, %c0_i32_0 : i32, i32
  }
  func.func @transform_8(%arg0: i32) -> (i32, i32, i32) {
    %c0_i32 = arith.constant 0 : i32
    %c0_i32_0 = arith.constant 0 : i32
    %c0_i32_1 = arith.constant 0 : i32
    return %arg0, %c0_i32, %c0_i32_0 : i32, i32, i32
  }
  func.func @transform_9(%arg0: i32) -> (i32, i32) {
    %c0_i32 = arith.constant 0 : i32
    %c0_i32_0 = arith.constant 0 : i32
    %c0_i32_1 = arith.constant 0 : i32
    return %c0_i32, %c0_i32_0 : i32, i32
  }
  func.func @transform_10(%arg0: i32) -> (i32, i32, i32) {
    %c0_i32 = arith.constant 0 : i32
    %c0_i32_0 = arith.constant 0 : i32
    %c0_i32_1 = arith.constant 0 : i32
    return %arg0, %c0_i32, %c0_i32_0 : i32, i32, i32
  }
  func.func @transform_11(%arg0: i32) -> (i32, i32, i32, i32) {
    %c0_i32 = arith.constant 0 : i32
    %c0_i32_0 = arith.constant 0 : i32
    %c0_i32_1 = arith.constant 0 : i32
    %c0_i32_2 = arith.constant 0 : i32
    return %arg0, %c0_i32, %c0_i32_0, %c0_i32_1 : i32, i32, i32, i32
  }
}

</mosaic_0001>

<bundles_post_ra>
// kernel: tpu_custom_call.1
= control target key start
LH: loop header
LB: loop body
LE: loop exit
PB: predicated region body
PF: predicated region fallthrough
CT: control target
= control target key end

     0   :  { %s9010_s0 = inlined_call_operand.hbm [shape: bf16[2,16,16,64], index: 0, kind: input, shape index: {}]   ;;  %s9011_s1 = inlined_call_operand.vmem [shape: bf16[64,16], index: 1, kind: input, shape index: {}]   ;;  %s9012_s2 = inlined_call_operand.vmem [shape: f32[2,1,16], index: 2, kind: input, shape index: {}]   ;;  %s9013_s3 = inlined_call_operand.vmem [shape: f32[1,16], index: 3, kind: input, shape index: {}]   ;;  %s9014_s4 = inlined_call_operand.hbm [shape: bf16[9,16,16], index: 4, kind: input, shape index: {}]   ;;  %s9015_s5 = inlined_call_operand.vmem [shape: f32[2,1,16], index: 5, kind: input, shape index: {}]   ;;  %s9016_s6 = inlined_call_operand.vmem [shape: f32[1,16], index: 6, kind: input, shape index: {}]   ;;  %s9017_s7 = inlined_call_operand.vmem [shape: bf16[16,64], index: 7, kind: input, shape index: {}]   ;;  %s9018_s8 = inlined_call_operand.vmem [shape: f32[2,1,64], index: 8, kind: input, shape index: {}]   ;;  %s9019_s9 = inlined_call_operand.vmem [shape: f32[1,64], index: 9, kind: input, shape index: {}]   ;;  %s9020_s10 = inlined_call_operand.vmem [shape: f32[2,1,64], index: 10, kind: input, shape index: {}]   ;;  %s9021_s11 = inlined_call_operand.hbm [shape: bf16[2,16,16,64], index: 11, kind: output, shape index: {}]  }
   0x1   :  { %9028 = sst [smem:[#allocation35_spill]] %s9014_s4 }
   0x2   :  { %16 = vsyncpa [#allocation4], 0 }
   0x3   :  { %18 = vsyncpa [#allocation4 + $0x1], 0 }
   0x4   :  { %19 = vsyncpa [#allocation7], 0 }
   0x5   :  { %20 = vsyncpa [#allocation5], 0 }
   0x6   :  { %22 = vsyncpa [#allocation5 + $0x1], 0  ;;  %s7088_s17 = smov 0   ;;  %s7090_s18 = smov 0  }
   0x7   :  { %s7092_s19 = smov 0   ;;  %s7094_s20 = smov 0  }
   0x8 LB: > { %9029 = sst [smem:[#allocation12_spill]] %s7008_s17  ;;  %s7109_s21 = sadd.s32 4294967295, %s7020_s20   ;;  %s7020_s20 = sphi %s7094_s20, %s9098_s20   ;;  %s7016_s19 = sphi %s7092_s19, %s9095_s19   ;;  %s7012_s18 = sphi %s7090_s18, %s9097_s18   ;;  %s7008_s17 = sphi %s7088_s17, %s9096_s17  }
   0x9   : > { %9030 = sst [smem:[#allocation13_spill]] %s7016_s19  ;;  %s6103_s22 = sadd.s32 4294967294, %s7020_s20  }
   0xa   : > { %p48_p0 = scmp.ne.s32.totalorder %s7012_s18, %s7008_s17  ;;  %p49_p1 = scmp.eq.s32.totalorder %s7109_s21, 0 }
   0xb   : > { %p302_p2 = scmp.eq.s32.totalorder %s7109_s21, 1  ;;  %p308_p3 = scmp.eq.s32.totalorder %s6103_s22, 1 }
   0xc   : > { %p7118_p4 = por %p49_p1, %p48_p0  ;;  %p6104_p5 = scmp.ge.s32.totalorder %s7020_s20, 1 }
   0xd   : > { %p7123_p6 = por %p308_p3, %p48_p0  ;;  %p315_p7 = scmp.lt.s32.totalorder %s7020_s20, 3 }
   0xe   : > { %s9034_s4 = sld [smem:[#allocation35_spill]]  ;;  %s7022_s29 = smov [#allocation6]  }
   0xf   : > { %s9032_s24 = scalar_select %p7123_p6, 1, 0 }
  0x10   : > { %p7131_p8 = pnand %p6104_p5, %p315_p7  ;;  %s334_s30 = sshll.u32 %s7022_s29, 4  ;;  %s335_s30 = int_to_ptr.vmem [resolvable:$true] %s334_s30 }
  0x11   : > { %9033 = sst [smem:[#allocation14_spill]] %s9032_s24  ;;  %s7141_s12 = sadd.s32 1, %s7020_s20  }
  0x12   : > { %p6825_p9 = pneg %p7131_p8  ;;  %s9024_s13 = smov 64  }
  0x13   : > { %s9025_s14 = smov 4   ;;  %s32_s15 = ssub.s32 %s7020_s20, %s7141_s12 }
  0x14   : > { %s332_s27 = sshll.u32 %s9034_s4, 4  ;;  %p6826_p10 = pnand %p6825_p9, %p49_p1  ;;  %s333_s27 = int_to_ptr.hbm [resolvable:$true] %s332_s27 }
  0x15   : > { %s35_s16 = sadd.s32 1, %s7016_s19  ;;  %p33_p12 = scmp.eq.s32.totalorder %s32_s15, 0 }
  0x16   : > { %6828 = dma.hbm_to_vmem [thread:$0]  (!%p6826_p10), %s333_s27, 1152, %s335_s30, [#allocation7], %s9024_s13, %s9024_s13, %s9025_s14  }
  0x17   : > { %p42_p13 = scmp.ne.s32.totalorder %s7016_s19, %s7012_s18  ;;  %p43_p0 = scmp.eq.s32.totalorder %s7020_s20, 0 }
  0x18   : > { %s7153_s22 = scalar_select %p33_p12, %s7016_s19, %s35_s16  }
  0x19   : > { %p7157_p3 = por %p302_p2, %p42_p13  ;;  %p6838_p5 = scmp.lt.s32.totalorder %s7020_s20, 2 }
  0x1a   : > { %9036 = sst [smem:[#allocation15_spill]] %s7153_s22  ;;  %s357_s26 = sand.u32 1, %s7016_s19  }
  0x1b   : > { %s6655_s29 = sshll.u32 %s7020_s20, 7  ;;  %p44_p7 = por %p43_p0, %p42_p13 }
  0x1c   : > { %s6107_s4 = sshll.u32 %s357_s26, 7  ;;  %s366_s27 = scalar_lea.hbm %s9010_s0, %s6655_s29 }
  0x1d   : > { %s367_s30 = sshll.u32 %s366_s27, 4  ;;  %s361_s15 = scalar_lea.vmem [#allocation3], %s6107_s4  ;;  %s368_s30 = int_to_ptr.hbm [resolvable:$true] %s367_s30 }
  0x1e   : > { %s369_s13 = sshll.u32 %s361_s15, 4  ;;  %p7167_p9 = pnand %p6838_p5, %p44_p7  ;;  %s370_s13 = int_to_ptr.vmem [resolvable:$true] %s369_s13 }
  0x1f   : > { %s358_s14 = scalar_lea.sflag [#allocation4], %s357_s26  ;;  %s6920_s22 = sshra.s32 %s368_s30, 4  ;;  %s6921_s22 = int_to_ptr.hbm [resolvable:$true] %s6920_s22 }
  0x20   : > { %s6922_s19 = scalar_lea.hbm %s6921_s22, 128  ;;  %p6924_p10 = pneg %p7167_p9 }
  0x21   : > { %p6923_p2 = scmp.ne.s32.totalorder %s6921_s22, %s6922_s19  ;;  %s6927_s4 = scalar_lea.hbm %s9010_s0, 256 }
  0x22   : > { %p6928_p0 = scmp.lt.s32.totalorder %s6921_s22, %s9010_s0  ;;  %p6929_p5 = scmp.lt.s32.totalorder %s6927_s4, %s6922_s19 }
  0x23   : > { %p6925_p12 = pnand %p6924_p10, %p6923_p2 }
  0x24   : > { %p6930_p7 = por %p6929_p5, %p6928_p0 }
  0x25   : > { %p6926_p13 = pneg %p6925_p12 }
  0x27   : > { %p6931_p11 = pnand %p6930_p7, %p6926_p13 }
  0x29   : > { %6934 = shalt.err (!%p6931_p11)
}
  0x2a   : > { %s9039_s26 = smov 4   ;;  %s9040_s15 = smov 64  }
  0x2b   : > { %6832 = dma.hbm_to_vmem [thread:$0]  (!%p7167_p9), %s368_s30, 2048, %s370_s13, %s358_s14, %s9040_s15, %s9040_s15, %s9039_s26  }
  0x2c   : > { %405 = sbr.rel (%p7131_p8) target bundleno = 1280 (0x500), region = 64 }
  0x31   : > { %s7187_s17 = sand.u32 1, %s7012_s18  }
  0x32   : > { %s6111_s19 = sshll.u32 %s7187_s17, 7  ;;  %s408_s22 = scalar_lea.sflag [#allocation4], %s7187_s17 }
  0x33   : > { %s7193_s24 = scalar_lea.vmem [#allocation3], %s6111_s19 }
  0x34   : > { %6995 = dma.done.wait (%p7118_p4), %s408_s22, 2048  }
  0x35   : > { %6997 = vsyncadd (%p7118_p4), %s408_s22, 4294965248 }
  0x36   : > { %6999 = dma.done.wait (%p49_p1), [#allocation7], 1152  }
  0x37   : > { %7001 = vsyncadd (%p49_p1), [#allocation7], 4294966144  ;;  %v6675_v0 = vld [vmem:[%s9011_s1 + $0x18] sm:$0xff]  ;;  %p468_p8 = scmp.lt.s32.totalorder %s7109_s21, 1  ;;  %v6674_v1 = vld [vmem:[%s9011_s1 + $0x10] sm:$0xff]  ;;  %vm625_vm0 = vcmask 523264  }
  0x38   : > { %678 = vmatpush.bf16.msra.mxu0 %v6675_v0  ;;  %v6673_v2 = vld [vmem:[%s9011_s1 + $0x8] sm:$0xff]  ;;  %v6672_v3 = vld [vmem:[%s9011_s1] sm:$0xff]  ;;  %v6656_v4 = vld [vmem:[%s7193_s24] sm:$0xff]  ;;  %vm907_vm1 = vcmask 122880   ;;  %vm908_vm2 = vsmask.f32 256 }
  0x39   : > { %s7211_s30 = scalar_select %p468_p8, %s7109_s21, 1  ;;  %v6657_v5 = vld [vmem:[%s7193_s24 + $0x8] sm:$0xff]  ;;  %v6658_v6 = vld [vmem:[%s7193_s24 + $0x10] sm:$0xff]  ;;  %v6659_v7 = vld [vmem:[%s7193_s24 + $0x18] sm:$0xff]  ;;  %vm964_vm4 = vsmask.f32 7938 }
  0x3a   : > { %v6660_v8 = vld [vmem:[%s7193_s24 + $0x20] sm:$0xff]  ;;  %v6661_v9 = vld [vmem:[%s7193_s24 + $0x28] sm:$0xff]  ;;  %v6662_v10 = vld [vmem:[%s7193_s24 + $0x30] sm:$0xff]  ;;  %v9043_v14 = vmov 0  ;;  %vm899_vm6 = vcmask 125952   ;;  %vm2360_vm10 = vcmask 1042432  }
  0x3b   : > { %s7217_s29 = scalar_lea.vmem %s9012_s2, %s7211_s30  ;;  %vm7240_vm3 = vmand %vm907_vm1, %vm908_vm2  ;;  %v913_v12 = vld [vmem:[#allocation2 + $0xc] sm:$0x1]  ;;  %v969_v15 = vld [vmem:[#allocation2 + $0x14] sm:$0x1]  ;;  %vm1020_vm8 = vsmask.f32 4368  ;;  %s8384_s22 = scalar_lea.vmem %s9015_s5, %s7211_s30 }
  0x3c   : > { %679 = vmatpush.bf16.msra.mxu0 %v6674_v1  ;;  %v914_v13 = vsel %vm7240_vm3, 0, %v913_v12  ;;  %vm7247_vm5 = vmand %vm907_vm1, %vm964_vm4  ;;  %v6663_v17 = vld [vmem:[%s7193_s24 + $0x38] sm:$0xff]  ;;  %v916_v18 = vld [vmem:[#allocation2 + $0x18] sm:$0x1]  ;;  %vm2361_vm11 = vcmask 1046532   ;;  %vm1951_vm13 = vcmask 130048   ;;  %s476_s16 = scalar_lea.vmem %s9018_s8, %s7211_s30  ;;  %s479_s27 = scalar_lea.vmem %s9020_s10, %s7211_s30 }
  0x3d   : > { %915 = vst [vmem:[#allocation2 + $0xc] sm:$0x1] %v914_v13  ;;  %v9044_v14 = vsel %vm7247_vm5, 4294967295, %v9043_v14  ;;  %v970_v16 = vsel %vm7247_vm5, 0, %v969_v15  ;;  %v917_v19 = vsel %vm7240_vm3, 0, %v916_v18  ;;  %v6664_v23 = vld [vmem:[%s7193_s24 + $0x40] sm:$0xff]  ;;  %vm7277_vm7 = vmand %vm899_vm6, %vm964_vm4 }
  0x3e   : > { %9045 = vst [vmem:[#allocation16_spill] sm:$0xff] %v9044_v14  ;;  %v7258_v20 = vld [vmem:[%s7217_s29] ss:$0 sm:$0xff]  ;;  %v919_v29 = vld [vmem:[#allocation2 + $0x24] sm:$0x1]  ;;  %vm7290_vm9 = vmor %vm908_vm2, %vm1020_vm8  ;;  %s8751_s15 = scalar_lea.vmem [#allocation8], %s6111_s19 }
  0x3f   : > { %971 = vst [vmem:[#allocation2 + $0x14] sm:$0x1] %v970_v16  ;;  %v972_v21 = vld [vmem:[#allocation2 + $0x20] sm:$0x1]  ;;  %v920_v31 = vsel %vm7240_vm3, 0, %v919_v29  ;;  %v6666_v15 = vld [vmem:[%s7193_s24 + $0x50] sm:$0xff]  ;;  %vm7313_vm12 = vmor %vm2360_vm10, %vm2361_vm11 }
  0x40   : > { %680 = vmatpush.bf16.msra.mxu0 %v6673_v2  ;;  %918 = vst [vmem:[#allocation2 + $0x18] sm:$0x1] %v917_v19  ;;  %v7263_v22 = vld [vmem:[%s9013_s3] ss:$0 sm:$0xff]  ;;  %v973_v24 = vsel %vm7247_vm5, 0, %v972_v21  ;;  %s5981_s23 = sshll.u32 %s8751_s15, 4  ;;  %s5982_s23 = int_to_ptr.vmem [resolvable:$true] %s5981_s23 }
  0x41   : > { %974 = vst [vmem:[#allocation2 + $0x20] sm:$0x1] %v973_v24  ;;  %v975_v42 = vld [vmem:[#allocation2 + $0x2c] sm:$0x1]  ;;  %v6665_v45 = vld [vmem:[%s7193_s24 + $0x48] sm:$0xff]  ;;  %s6970_s26 = scalar_lea.hbm %s9021_s11, 256 }
  0x42   : > { %921 = vst [vmem:[#allocation2 + $0x24] sm:$0x1] %v920_v31  ;;  %v976_v46 = vsel %vm7247_vm5, 0, %v975_v42  ;;  %v922_v59 = vld [vmem:[#allocation2 + $0x30] sm:$0x1] }
  0x43   : > { %977 = vst [vmem:[#allocation2 + $0x2c] sm:$0x1] %v976_v46  ;;  %v923_v63 = vsel %vm7240_vm3, 0, %v922_v59  ;;  %vm1507_vm14 = vsmask.f32 3328 }
  0x44   : > { %681 = vmatpush.bf16.msra.mxu0 %v6672_v3  ;;  %v1345_v39 = vld [vmem:[#allocation2 + $0xc] sm:$0xf]  ;;  %924 = vst [vmem:[#allocation2 + $0x30] sm:$0x1] %v923_v63  ;;  %vm1508_vm15 = vsmask.f32 7440 }
  0x45   : > { %vm7389_vm1 = vmor %vm1507_vm14, %vm1508_vm15 }
  0x46   : > { %v1349_v54 = vld [vmem:[#allocation2 + $0x14] sm:$0x1] }
  0x47   : > { %6194 = vmatmul.msk.bf16.vlgmr.msra.gmra.mxu0 %vm625_vm0, %v6656_v4 }
  0x57   : > { %6195 = vmatmul.msk.bf16.gmra.mxu0 %vm625_vm0, %v6657_v5 }
  0x67   : > { %6196 = vmatmul.msk.bf16.gmra.mxu0 %vm625_vm0, %v6658_v6  ;;  %v1352_v6 = vld [vmem:[#allocation2 + $0x18] sm:$0xf] }
  0x77   : > { %6197 = vmatmul.msk.bf16.gmra.mxu0 %vm625_vm0, %v6659_v7 }
  0x87   : > { %6198 = vmatmul.msk.bf16.gmra.mxu0 %vm625_vm0, %v6660_v8 }
  0x97   : > { %6199 = vmatmul.msk.bf16.gmra.mxu0 %vm625_vm0, %v6661_v9  ;;  %v6692_v9 = vld [vmem:[#allocation6] sm:$0xff] }
  0x98   : > { %6815 = vmatpush.bf16.msra.mxu2 %v6692_v9 }
  0xa7   : > { %6200 = vmatmul.msk.bf16.gmra.mxu0 %vm625_vm0, %v6662_v10  ;;  %v978_v10 = vld [vmem:[#allocation2 + $0x38] sm:$0x1] }
  0xa8   : > { %v979_v16 = vsel %vm7247_vm5, 0, %v978_v10 }
  0xa9   : > { %980 = vst [vmem:[#allocation2 + $0x38] sm:$0x1] %v979_v16 }
  0xb7   : > { %6201 = vmatmul.msk.bf16.gmra.mxu0 %vm625_vm0, %v6663_v17 }
  0xc4   : > { %v683_v25 = vpop.f32.mrf.mxu0 }
  0xc5   : > { %v767_v26 = vmul.f32 %v7258_v20, %v683_v25 }
  0xc7   : > { %v803_v27 = vadd.f32 %v7263_v22, %v767_v26  ;;  %6202 = vmatmul.msk.bf16.gmra.mxu0 %vm625_vm0, %v6664_v23 }
  0xc9   : > { %v835_v28 = vmax.f32 %v803_v27, 0.0 }
  0xcb   : > { %v867_v30 = vpack.c.bf16 %v835_v28, %v835_v28 }
  0xcc   : > { %v685_v32 = vpop.f32.mrf.mxu0 }
  0xcd   : > { %v1023_v33 = vshrl.u32 %v867_v30, 16  ;;  %v768_v34 = vmul.f32 %v7258_v20, %v685_v32  ;;  %v1026_v36 = vshll.u32 %v867_v30, 16  ;;  %v1356_v30 = vld [vmem:[#allocation2 + $0x20] sm:$0x1] }
  0xcf   : > { %v1025_v35 = vrot.slane %v1023_v33, 7  ;;  %v804_v37 = vadd.f32 %v7263_v22, %v768_v34 }
  0xd1   : > { %v1028_v40 = vor.u32 %v1026_v36, %v1025_v35  ;;  %v836_v41 = vmax.f32 %v804_v37, 0.0  ;;  %v1029_v55 = vrot.slane %v1025_v35, 4  ;;  %v7320_v36 = vld [vmem:[#allocation6 + $0x10] sm:$0xff]  ;;  %v925_v37 = vld [vmem:[#allocation2 + $0x3c] sm:$0x1] }
  0xd2   : > { %6816 = vmatpush.bf16.msra.mxu3 %v7320_v36 }
  0xd3   : > { %v1346_v43 = vsel %vm7277_vm7, %v1028_v40, %v1345_v39  ;;  %v868_v44 = vpack.c.bf16 %v836_v41, %v836_v41 }
  0xd4   : > { %1347 = vst [vmem:[#allocation2 + $0xc] sm:$0xf] %v1346_v43  ;;  %v688_v47 = vpop.f32.mrf.mxu0 }
  0xd5   : > { %v1031_v48 = vshrl.u32 %v868_v44, 16  ;;  %v769_v49 = vmul.f32 %v7258_v20, %v688_v47  ;;  %v1034_v51 = vshll.u32 %v868_v44, 16 }
  0xd7   : > { %v1033_v50 = vrot.slane %v1031_v48, 7  ;;  %v805_v52 = vadd.f32 %v7263_v22, %v769_v49  ;;  %6203 = vmatmul.msk.bf16.gmra.mxu0 %vm625_vm0, %v6665_v45  ;;  %v926_v45 = vsel %vm7240_vm3, 0, %v925_v37 }
  0xd8   : > { %927 = vst [vmem:[#allocation2 + $0x3c] sm:$0x1] %v926_v45 }
  0xd9   : > { %v1036_v56 = vor.u32 %v1034_v51, %v1033_v50  ;;  %v1038_v57 = vrot.slane %v1033_v50, 4  ;;  %v837_v58 = vmax.f32 %v805_v52, 0.0  ;;  %v6693_v50 = vld [vmem:[#allocation6 + $0x8] sm:$0xff] }
  0xda   : > { %6814 = vmatpush.bf16.msra.mxu1 %v6693_v50  ;;  %2007 = vmatpush.bf16.msrb.mxu0 %v6693_v50  ;;  %v928_v50 = vld [vmem:[#allocation2 + $0x48] sm:$0x1] }
  0xdb   : > { %v1037_v60 = vsel %vm7290_vm9, %v1029_v55, %v1036_v56  ;;  %v1350_v61 = vsel %vm7240_vm3, %v1038_v57, %v1349_v54  ;;  %v869_v62 = vpack.c.bf16 %v837_v58, %v837_v58  ;;  %v2313_v23 = vld [vmem:[#allocation2 + $0xc] sm:$0xe]  ;;  %v1359_v57 = vld [vmem:[#allocation2 + $0x24] sm:$0xf] }
  0xdc   : > { %1348 = vst.msk [vmem:[#allocation2 + $0x10] sm:$0xf] %vm899_vm6, %v1037_v60  ;;  %v690_v0 = vpop.f32.mrf.mxu0  ;;  %v6315_v31 = vrot.slane %v2313_v23, 9 }
  0xdd   : > { %1351 = vst [vmem:[#allocation2 + $0x14] sm:$0x1] %v1350_v61  ;;  %v1040_v1 = vshrl.u32 %v869_v62, 16  ;;  %v770_v2 = vmul.f32 %v7258_v20, %v690_v0  ;;  %v1043_v4 = vshll.u32 %v869_v62, 16  ;;  %v981_v61 = vld [vmem:[#allocation2 + $0x44] sm:$0x1] }
  0xde   : > { %2230 = vmatpush.bf16.msra.mxu0 %v6692_v9  ;;  %v6667_v0 = vld [vmem:[%s7193_s24 + $0x58] sm:$0xff] }
  0xdf   : > { %v1042_v3 = vrot.slane %v1040_v1, 7  ;;  %v806_v5 = vadd.f32 %v7263_v22, %v770_v2  ;;  %v982_v1 = vsel %vm7247_vm5, 0, %v981_v61 }
  0xe0   : > { %983 = vst [vmem:[#allocation2 + $0x44] sm:$0x1] %v982_v1 }
  0xe1   : > { %v1045_v7 = vor.u32 %v1043_v4, %v1042_v3  ;;  %v838_v8 = vmax.f32 %v806_v5, 0.0  ;;  %v1046_v32 = vrot.slane %v1042_v3, 4 }
  0xe3   : > { %v1353_v12 = vsel %vm7277_vm7, %v1045_v7, %v1352_v6  ;;  %v870_v13 = vpack.c.bf16 %v838_v8, %v838_v8  ;;  %v7308_v18 = vld [vmem:[#allocation2 + $0x10] sm:$0xf]  ;;  %v1459_v7 = vld [vmem:[#allocation2 + $0xc] sm:$0xf] }
  0xe4   : > { %1354 = vst [vmem:[#allocation2 + $0x18] sm:$0xf] %v1353_v12  ;;  %v693_v17 = vpop.f32.mrf.mxu0  ;;  %v7317_v28 = vld [vmem:[#allocation2 + $0x14] sm:$0x1]  ;;  %v2372_v29 = vrot.slane %v7308_v18, 5 }
  0xe5   : > { %v1048_v19 = vshrl.u32 %v870_v13, 16  ;;  %v771_v21 = vmul.f32 %v7258_v20, %v693_v17  ;;  %v1051_v25 = vshll.u32 %v870_v13, 16  ;;  %v2375_v41 = vrot.slane %v7317_v28, 5  ;;  %v1363_v17 = vld [vmem:[#allocation2 + $0x2c] sm:$0x1] }
  0xe6   : > { %v2373_v39 = vsel %vm7313_vm12, %v6315_v31, %v2372_v29  ;;  %v2374_v40 = vrot.slane %v2372_v29, 4 }
  0xe7   : > { %v1050_v24 = vrot.slane %v1048_v19, 7  ;;  %v807_v26 = vadd.f32 %v7263_v22, %v771_v21  ;;  %6204 = vmatmul.msk.bf16.gmra.mxu0 %vm625_vm0, %v6666_v15  ;;  %v2480_v51 = vunpack.c.l.b16 %v2373_v39  ;;  %v1535_v19 = vshrl.u32 %v1459_v7, 16 }
  0xe8   : > { %v2376_v47 = vsel %vm7313_vm12, %v2374_v40, %v2375_v41 }
  0xe9   : > { %v1053_v33 = vor.u32 %v1051_v25, %v1050_v24  ;;  %v1055_v34 = vrot.slane %v1050_v24, 4  ;;  %v839_v35 = vmax.f32 %v807_v26, 0.0  ;;  %v2481_v52 = vunpack.c.l.b16 %v2376_v47 }
  0xeb   : > { %v1054_v42 = vsel %vm7290_vm9, %v1046_v32, %v1053_v33  ;;  %v1357_v43 = vsel %vm7240_vm3, %v1055_v34, %v1356_v30  ;;  %v871_v44 = vpack.c.bf16 %v839_v35, %v839_v35  ;;  %v7337_v58 = vpack.c.b16 %v2481_v52, %v2480_v51  ;;  %v2314_v4 = vld [vmem:[#allocation2 + $0x18] sm:$0xe] }
  0xec   : > { %1355 = vst.msk [vmem:[#allocation2 + $0x1c] sm:$0xf] %vm899_vm6, %v1054_v42  ;;  %v695_v46 = vpop.f32.mrf.mxu0  ;;  %v6316_v15 = vrot.slane %v2314_v4, 9  ;;  %v1538_v30 = vshll.u32 %v1459_v7, 16 }
  0xed   : > { %1358 = vst [vmem:[#allocation2 + $0x20] sm:$0x1] %v1357_v43  ;;  %v1057_v48 = vshrl.u32 %v871_v44, 16  ;;  %v772_v49 = vmul.f32 %v7258_v20, %v695_v46  ;;  %v1060_v55 = vshll.u32 %v871_v44, 16  ;;  %v6712_v44 = vld [vmem:[#allocation6 + $0x20] sm:$0xff]  ;;  %v7363_v46 = vrot.slane %v1535_v19, 4 }
  0xee   : > { %v7365_v51 = vrot.slane %v1538_v30, 5  ;;  %3535 = vmatpush.bf16.msrb.mxu2 %v6712_v44 }
  0xef   : > { %v1059_v54 = vrot.slane %v1057_v48, 7  ;;  %v808_v56 = vadd.f32 %v7263_v22, %v772_v49  ;;  %v6711_v49 = vld [vmem:[#allocation6 + $0x18] sm:$0xff] }
  0xf0   : > { %2877 = vmatpush.bf16.msrb.mxu1 %v6711_v49  ;;  %v1544_v49 = vshll.u32 %v7308_v18, 16 }
  0xf1   : > { %v1062_v59 = vor.u32 %v1060_v55, %v1059_v54  ;;  %v840_v60 = vmax.f32 %v808_v56, 0.0  ;;  %v1063_v16 = vrot.slane %v1059_v54, 4 }
  0xf3   : > { %v1360_v62 = vsel %vm7277_vm7, %v1062_v59, %v1359_v57  ;;  %v872_v63 = vpack.c.bf16 %v840_v60, %v840_v60  ;;  %v7344_v2 = vld [vmem:[#allocation2 + $0x1c] sm:$0xf]  ;;  %v929_v57 = vsel %vm7240_vm3, 0, %v928_v50  ;;  %v1366_v59 = vld [vmem:[#allocation2 + $0x30] sm:$0xf]  ;;  %v1548_v50 = vshrl.u32 %v7308_v18, 16 }
  0xf4   : > { %1361 = vst [vmem:[#allocation2 + $0x24] sm:$0xf] %v1360_v62  ;;  %v698_v3 = vpop.f32.mrf.mxu0  ;;  %v7347_v8 = vld [vmem:[#allocation2 + $0x20] sm:$0x1]  ;;  %v2379_v9 = vrot.slane %v7344_v2, 5 }
  0xf5   : > { %v1065_v5 = vshrl.u32 %v872_v63, 16  ;;  %v773_v6 = vmul.f32 %v7258_v20, %v698_v3  ;;  %v1068_v12 = vshll.u32 %v872_v63, 16  ;;  %v2382_v23 = vrot.slane %v7347_v8, 5  ;;  %930 = vst [vmem:[#allocation2 + $0x48] sm:$0x1] %v929_v57 }
  0xf6   : > { %v2381_v21 = vrot.slane %v2379_v9, 4  ;;  %v2380_v29 = vsel %vm7313_vm12, %v6316_v15, %v2379_v9  ;;  %v1541_v15 = vor.u32 %v7365_v51, %v7363_v46 }
  0xf7   : > { %v1067_v10 = vrot.slane %v1065_v5, 7  ;;  %v809_v13 = vadd.f32 %v7263_v22, %v773_v6  ;;  %6205 = vmatmul.msk.bf16.gmra.mxu0 %vm625_vm0, %v6667_v0  ;;  %v2482_v40 = vunpack.c.l.b16 %v2380_v29  ;;  %v6668_v5 = vld [vmem:[%s7193_s24 + $0x60] sm:$0xff] }
  0xf8   : > { %v2383_v31 = vsel %vm7313_vm12, %v2381_v21, %v2382_v23  ;;  %v984_v23 = vld [vmem:[#allocation2 + $0x50] sm:$0x1] }
  0xf9   : > { %v1070_v24 = vor.u32 %v1068_v12, %v1067_v10  ;;  %v1072_v25 = vrot.slane %v1067_v10, 4  ;;  %v841_v26 = vmax.f32 %v809_v13, 0.0  ;;  %v2483_v41 = vunpack.c.l.b16 %v2383_v31 }
  0xfb   : > { %v1071_v32 = vsel %vm7290_vm9, %v1063_v16, %v1070_v24  ;;  %v1364_v33 = vsel %vm7240_vm3, %v1072_v25, %v1363_v17  ;;  %v873_v34 = vpack.c.bf16 %v841_v26, %v841_v26  ;;  %v1463_v35 = vld [vmem:[#allocation2 + $0x24] sm:$0xf]  ;;  %v7367_v52 = vpack.c.b16 %v2483_v41, %v2482_v40 }
  0xfc   : > { %1362 = vst.msk [vmem:[#allocation2 + $0x28] sm:$0xf] %vm899_vm6, %v1071_v32  ;;  %v700_v37 = vpop.f32.mrf.mxu0  ;;  %v1583_v39 = vshrl.u32 %v1463_v35, 16  ;;  %v1586_v45 = vshll.u32 %v1463_v35, 16  ;;  %v2315_v60 = vld [vmem:[#allocation2 + $0x24] sm:$0xe] }
  0xfd   : > { %1365 = vst [vmem:[#allocation2 + $0x2c] sm:$0x1] %v1364_v33  ;;  %v1074_v42 = vshrl.u32 %v873_v34, 16  ;;  %v774_v43 = vmul.f32 %v7258_v20, %v700_v37  ;;  %v1077_v47 = vshll.u32 %v873_v34, 16  ;;  %v6317_v7 = vrot.slane %v2315_v60, 9 }
  0xfe   : > { %v1585_v48 = vrot.slane %v1583_v39, 4  ;;  %v1588_v56 = vrot.slane %v1586_v45, 5  ;;  %v1370_v34 = vld [vmem:[#allocation2 + $0x38] sm:$0x1]  ;;  %v985_v40 = vsel %vm7247_vm5, 0, %v984_v23  ;;  %v7412_v23 = vrot.slane %v1544_v49, 5 }
  0xff   : > { %v1076_v54 = vrot.slane %v1074_v42, 7  ;;  %v810_v55 = vadd.f32 %v7263_v22, %v774_v43  ;;  %986 = vst [vmem:[#allocation2 + $0x50] sm:$0x1] %v985_v40  ;;  %v987_v49 = vld [vmem:[#allocation2 + $0x5c] sm:$0x1] }
 0x100   : > { %v1589_v63 = vor.u32 %v1588_v56, %v1585_v48 }
 0x101   : > { %v1079_v61 = vor.u32 %v1077_v47, %v1076_v54  ;;  %v842_v62 = vmax.f32 %v810_v55, 0.0  ;;  %v1080_v0 = vrot.slane %v1076_v54, 4 }
 0x102   : > { %v1590_v21 = vrot.slane %v1589_v63, 4 }
 0x103   : > { %v1367_v1 = vsel %vm7277_vm7, %v1079_v61, %v1366_v59  ;;  %v874_v3 = vpack.c.bf16 %v842_v62, %v842_v62  ;;  %v6679_v4 = vld [vmem:[#allocation2 + $0x24] sm:$0xff] }
 0x104   : > { %v1464_v6 = vld [vmem:[#allocation2 + $0x28] sm:$0xf]  ;;  %1368 = vst [vmem:[#allocation2 + $0x30] sm:$0xf] %v1367_v1  ;;  %v703_v9 = vpop.f32.mrf.mxu0  ;;  %v1494_v10 = vld [vmem:[#allocation2 + $0x2c] sm:$0x1]  ;;  %6301 = vmatmul.msk.bf16.vlgmr.msra.gmra.mxu2 %vm1951_vm13, %v6679_v4 }
 0x105   : > { %v2386_v12 = vrot.slane %v1464_v6, 5  ;;  %v1592_v13 = vshll.u32 %v1464_v6, 16  ;;  %v1082_v16 = vshrl.u32 %v874_v3, 16  ;;  %v775_v17 = vmul.f32 %v7258_v20, %v703_v9 }
 0x106   : > { %v2389_v19 = vrot.slane %v1494_v10, 5  ;;  %v1596_v29 = vshrl.u32 %v1464_v6, 16  ;;  %v1085_v31 = vshll.u32 %v874_v3, 16  ;;  %v1602_v39 = vshll.u32 %v1494_v10, 16 }
 0x107   : > { %v2387_v24 = vsel %vm7313_vm12, %v6317_v7, %v2386_v12  ;;  %v2388_v25 = vrot.slane %v2386_v12, 4  ;;  %v1594_v26 = vrot.slane %v1592_v13, 5  ;;  %v1084_v30 = vrot.slane %v1082_v16, 7  ;;  %6206 = vmatmul.msk.bf16.gmra.mxu0 %vm625_vm0, %v6668_v5  ;;  %v931_v5 = vld [vmem:[#allocation2 + $0x54] sm:$0x1] }
 0x108   : > { %v811_v32 = vadd.f32 %v7263_v22, %v775_v17  ;;  %v2484_v33 = vunpack.c.l.b16 %v2387_v24  ;;  %v1598_v37 = vrot.slane %v1596_v29, 4  ;;  %v1604_v62 = vrot.slane %v1602_v39, 5 }
 0x109   : > { %v2390_v35 = vsel %vm7313_vm12, %v2388_v25, %v2389_v19  ;;  %v1087_v41 = vor.u32 %v1085_v31, %v1084_v30  ;;  %v1089_v42 = vrot.slane %v1084_v30, 4  ;;  %v1595_v47 = vsel %vm7389_vm1, %v1590_v21, %v1594_v26  ;;  %v1373_v19 = vld [vmem:[#allocation2 + $0x3c] sm:$0xf]  ;;  %v6669_v31 = vld [vmem:[%s7193_s24 + $0x68] sm:$0xff] }
 0x10a   : > { %v843_v43 = vmax.f32 %v811_v32, 0.0  ;;  %v2485_v44 = vunpack.c.l.b16 %v2390_v35  ;;  %v1599_v48 = vor.u32 %v1598_v37, %v1594_v26  ;;  %v932_v10 = vsel %vm7240_vm3, 0, %v931_v5 }
 0x10b   : > { %v1088_v54 = vsel %vm7290_vm9, %v1080_v0, %v1087_v41  ;;  %v1371_v55 = vsel %vm7240_vm3, %v1089_v42, %v1370_v34  ;;  %v1465_v59 = vld [vmem:[#allocation2 + $0x30] sm:$0xf]  ;;  %v1903_v0 = vunpack.c.l.b16 %v1595_v47  ;;  %933 = vst [vmem:[#allocation2 + $0x54] sm:$0x1] %v932_v10  ;;  %v7025_v21 = vmov 0  }
 0x10c   : > { %v875_v56 = vpack.c.bf16 %v843_v43, %v843_v43  ;;  %v2513_v57 = vpack.c.b16 %v2485_v44, %v2484_v33  ;;  %1369 = vst.msk [vmem:[#allocation2 + $0x34] sm:$0xf] %vm899_vm6, %v1088_v54  ;;  %v705_v60 = vpop.f32.mrf.mxu0  ;;  %v1600_v61 = vrot.slane %v1599_v48, 4  ;;  %v1607_v63 = vshrl.u32 %v1465_v59, 16  ;;  %v2316_v17 = vld [vmem:[#allocation2 + $0x30] sm:$0xe] }
 0x10d   : > { %v1610_v1 = vshll.u32 %v1465_v59, 16  ;;  %1372 = vst [vmem:[#allocation2 + $0x38] sm:$0x1] %v1371_v55  ;;  %v776_v18 = vmul.f32 %v7258_v20, %v705_v60  ;;  %v7414_v24 = vrot.slane %v1548_v50, 4  ;;  %v6318_v32 = vrot.slane %v2316_v17, 9 }
 0x10e   : > { %v1091_v3 = vshrl.u32 %v875_v56, 16  ;;  %v1094_v4 = vshll.u32 %v875_v56, 16  ;;  %6337 = vmatmul.msk.bf16.vlgmr.msra.gmra.mxu3 %vm1951_vm13, %v2513_v57  ;;  %v1605_v6 = vsel %vm7389_vm1, %v1600_v61, %v1604_v62  ;;  %v1609_v7 = vrot.slane %v1607_v63, 4  ;;  %900 = vst.msk [vmem:[#allocation2] sm:$0xf] %vm899_vm6, %v7025_v21 }
 0x10f   : > { %v1612_v9 = vrot.slane %v1610_v1, 5  ;;  %v812_v13 = vadd.f32 %v7263_v22, %v776_v18  ;;  %v1904_v16 = vunpack.c.l.b16 %v1605_v6  ;;  %901 = vst.msk [vmem:[#allocation2 + $0x4] sm:$0xf] %vm899_vm6, %v7025_v21  ;;  %v7423_v33 = vrot.slane %v1541_v15, 4  ;;  %v1377_v50 = vld [vmem:[#allocation2 + $0x44] sm:$0x1] }
 0x110   : > { %v7408_v12 = vrot.slane %v1091_v3, 7  ;;  %902 = vst.msk [vmem:[#allocation2 + $0x8] sm:$0xf] %vm899_vm6, %v7025_v21  ;;  %v1554_v34 = vshll.u32 %v7317_v28, 16  ;;  %v1551_v28 = vor.u32 %v7414_v24, %v7412_v23  ;;  %v988_v18 = vsel %vm7247_vm5, 0, %v987_v49 }
 0x111   : > { %v844_v26 = vmax.f32 %v812_v13, 0.0  ;;  %v1932_v29 = vpack.c.b16 %v1904_v16, %v1903_v0  ;;  %v1613_v30 = vor.u32 %v1612_v9, %v1609_v7  ;;  %904 = vst.msk [vmem:[#allocation2 + $0xcc] sm:$0xf] %vm899_vm6, %v7025_v21 }
 0x112   : > { %v1096_v25 = vor.u32 %v1094_v4, %v7408_v12  ;;  %v1097_v35 = vrot.slane %v7408_v12, 4  ;;  %905 = vst.msk [vmem:[#allocation2 + $0xd0] sm:$0xf] %vm899_vm6, %v7025_v21  ;;  %v7449_v13 = vrot.slane %v1554_v34, 5 }
 0x113   : > { %v876_v39 = vpack.c.bf16 %v844_v26, %v844_v26  ;;  %6217 = vmatmul.msk.bf16.vlgmr.msra.gmra.mxu1 %vm1951_vm13, %v1932_v29  ;;  %v6680_v40 = vld [vmem:[#allocation2 + $0x30] sm:$0xff]  ;;  %v1614_v48 = vrot.slane %v1613_v30, 4  ;;  %906 = vst.msk [vmem:[#allocation2 + $0xd4] sm:$0xf] %vm899_vm6, %v7025_v21 }
 0x114   : > { %v1374_v37 = vsel %vm7277_vm7, %v1096_v25, %v1373_v19  ;;  %v1466_v41 = vld [vmem:[#allocation2 + $0x34] sm:$0xf]  ;;  %v708_v42 = vpop.f32.mrf.mxu0  ;;  %v1495_v43 = vld [vmem:[#allocation2 + $0x38] sm:$0x1]  ;;  %6302 = vmatmul.msk.bf16.gmra.mxu2 %vm1951_vm13, %v6680_v40  ;;  %989 = vst [vmem:[#allocation2 + $0x5c] sm:$0x1] %v988_v18 }
 0x115   : > { %1375 = vst [vmem:[#allocation2 + $0x3c] sm:$0xf] %v1374_v37  ;;  %v2393_v46 = vrot.slane %v1466_v41, 5  ;;  %v1616_v51 = vshll.u32 %v1466_v41, 16  ;;  %v1099_v15 = vshrl.u32 %v876_v39, 16  ;;  %v777_v44 = vmul.f32 %v7258_v20, %v708_v42 }
 0x116   : > { %v2396_v47 = vrot.slane %v1495_v43, 5  ;;  %v1620_v57 = vshrl.u32 %v1466_v41, 16  ;;  %v1102_v60 = vshll.u32 %v876_v39, 16  ;;  %v910_v63 = vld [vmem:[#allocation2] sm:$0x1]  ;;  %v1626_v4 = vshll.u32 %v1495_v43, 16 }
 0x117   : > { %v2394_v54 = vsel %vm7313_vm12, %v6318_v32, %v2393_v46  ;;  %v2395_v55 = vrot.slane %v2393_v46, 4  ;;  %v1618_v56 = vrot.slane %v1616_v51, 5  ;;  %v1101_v59 = vrot.slane %v1099_v15, 7  ;;  %6207 = vmatmul.msk.bf16.gmra.mxu0 %vm625_vm0, %v6669_v31  ;;  %v966_v26 = vld [vmem:[#allocation2 + $0x8] sm:$0x1] }
 0x118   : > { %v813_v61 = vadd.f32 %v7263_v22, %v777_v44  ;;  %v2486_v62 = vunpack.c.l.b16 %v2394_v54  ;;  %v1622_v3 = vrot.slane %v1620_v57, 4  ;;  %v911_v12 = vsel %vm7240_vm3, 0, %v910_v63  ;;  %v934_v41 = vld [vmem:[#allocation2 + $0x60] sm:$0x1]  ;;  %v7458_v42 = vld [vmem:[#allocation2 + $0x18] sm:$0xf] }
 0x119   : > { %v2397_v1 = vsel %vm7313_vm12, %v2395_v55, %v2396_v47  ;;  %v1104_v0 = vor.u32 %v1102_v60, %v1101_v59  ;;  %v1106_v5 = vrot.slane %v1101_v59, 4  ;;  %v1619_v9 = vsel %vm7389_vm1, %v1614_v48, %v1618_v56  ;;  %912 = vst [vmem:[#allocation2] sm:$0x1] %v911_v12  ;;  %v7464_v44 = vld [vmem:[#allocation2 + $0x4] sm:$0xf] }
 0x11a   : > { %v845_v6 = vmax.f32 %v813_v61, 0.0  ;;  %v2487_v7 = vunpack.c.l.b16 %v2397_v1  ;;  %v1623_v10 = vor.u32 %v1622_v3, %v1618_v56  ;;  %v1628_v31 = vrot.slane %v1626_v4, 5  ;;  %v1380_v55 = vld [vmem:[#allocation2 + $0x48] sm:$0xf] }
 0x11b   : > { %v1105_v16 = vsel %vm7290_vm9, %v1097_v35, %v1104_v0  ;;  %v1378_v17 = vsel %vm7240_vm3, %v1106_v5, %v1377_v50  ;;  %v1905_v40 = vunpack.c.l.b16 %v1619_v9  ;;  %v935_v15 = vsel %vm7240_vm3, 0, %v934_v41 }
 0x11c   : > { %v877_v19 = vpack.c.bf16 %v845_v6, %v845_v6  ;;  %v2514_v21 = vpack.c.b16 %v2487_v7, %v2486_v62  ;;  %v1467_v25 = vld [vmem:[#allocation2 + $0x3c] sm:$0xf]  ;;  %1376 = vst.msk [vmem:[#allocation2 + $0x40] sm:$0xf] %vm899_vm6, %v1105_v16  ;;  %v710_v29 = vpop.f32.mrf.mxu0  ;;  %v1624_v30 = vrot.slane %v1623_v10, 4  ;;  %v967_v54 = vsel %vm7247_vm5, 0, %v966_v26 }
 0x11d   : > { %v1631_v32 = vshrl.u32 %v1467_v25, 16  ;;  %v1634_v37 = vshll.u32 %v1467_v25, 16  ;;  %1379 = vst [vmem:[#allocation2 + $0x44] sm:$0x1] %v1378_v17  ;;  %v778_v35 = vmul.f32 %v7258_v20, %v710_v29  ;;  %v2317_v50 = vld [vmem:[#allocation2 + $0x3c] sm:$0xe] }
 0x11e   : > { %v1108_v34 = vshrl.u32 %v877_v19, 16  ;;  %v1111_v39 = vshll.u32 %v877_v19, 16  ;;  %6338 = vmatmul.msk.bf16.gmra.mxu3 %vm1951_vm13, %v2514_v21  ;;  %v1629_v43 = vsel %vm7389_vm1, %v1624_v30, %v1628_v31  ;;  %936 = vst [vmem:[#allocation2 + $0x60] sm:$0x1] %v935_v15  ;;  %v1520_v57 = vshll.u32 %v7464_v44, 16 }
 0x11f   : > { %v1633_v46 = vrot.slane %v1631_v32, 4  ;;  %v1636_v51 = vrot.slane %v1634_v37, 5  ;;  %v814_v48 = vadd.f32 %v7263_v22, %v778_v35  ;;  %v1906_v49 = vunpack.c.l.b16 %v1629_v43  ;;  %968 = vst [vmem:[#allocation2 + $0x8] sm:$0x1] %v967_v54  ;;  %v990_v26 = vld [vmem:[#allocation2 + $0x68] sm:$0x1] }
 0x120   : > { %v7466_v47 = vrot.slane %v1108_v34, 7  ;;  %v7475_v59 = vrot.slane %v1551_v28, 4  ;;  %v1524_v63 = vshrl.u32 %v7464_v44, 16  ;;  %v6319_v3 = vrot.slane %v2317_v50, 9  ;;  %v6670_v28 = vld [vmem:[%s7193_s24 + $0x70] sm:$0xff] }
 0x121   : > { %v1637_v56 = vor.u32 %v1636_v51, %v1633_v46  ;;  %v846_v61 = vmax.f32 %v814_v48, 0.0  ;;  %v1933_v62 = vpack.c.b16 %v1906_v49, %v1905_v40  ;;  %v1559_v4 = vshrl.u32 %v7458_v42, 16  ;;  %v1457_v41 = vld [vmem:[#allocation2] sm:$0xf]  ;;  %v1384_v43 = vld [vmem:[#allocation2 + $0x50] sm:$0x1] }
 0x122   : > { %v1113_v60 = vor.u32 %v1111_v39, %v7466_v47  ;;  %v1114_v1 = vrot.slane %v7466_v47, 4  ;;  %v1562_v18 = vshll.u32 %v7458_v42, 16  ;;  %v7486_v9 = vrot.slane %v1520_v57, 5 }
 0x123   : > { %v878_v5 = vpack.c.bf16 %v846_v61, %v846_v61  ;;  %6218 = vmatmul.msk.bf16.gmra.mxu1 %vm1951_vm13, %v1933_v62  ;;  %v6681_v24 = vld [vmem:[#allocation2 + $0x3c] sm:$0xff]  ;;  %v1638_v7 = vrot.slane %v1637_v56, 4  ;;  %v7490_v29 = vrot.slane %v1524_v63, 4  ;;  %v991_v47 = vsel %vm7247_vm5, 0, %v990_v26 }
 0x124   : > { %v1381_v0 = vsel %vm7277_vm7, %v1113_v60, %v1380_v55  ;;  %v1468_v6 = vld [vmem:[#allocation2 + $0x40] sm:$0xf]  ;;  %v713_v10 = vpop.f32.mrf.mxu0  ;;  %v1496_v12 = vld [vmem:[#allocation2 + $0x44] sm:$0x1]  ;;  %6303 = vmatmul.msk.bf16.gmra.mxu2 %vm1951_vm13, %v6681_v24  ;;  %992 = vst [vmem:[#allocation2 + $0x68] sm:$0x1] %v991_v47 }
 0x125   : > { %1382 = vst [vmem:[#allocation2 + $0x48] sm:$0xf] %v1381_v0  ;;  %v2400_v16 = vrot.slane %v1468_v6, 5  ;;  %v1640_v17 = vshll.u32 %v1468_v6, 16  ;;  %v1116_v19 = vshrl.u32 %v878_v5, 16  ;;  %v779_v21 = vmul.f32 %v7258_v20, %v713_v10 }
 0x126   : > { %v2403_v25 = vrot.slane %v1496_v12, 5  ;;  %v1644_v37 = vshrl.u32 %v1468_v6, 16  ;;  %v1119_v39 = vshll.u32 %v878_v5, 16  ;;  %v1650_v15 = vshll.u32 %v1496_v12, 16 }
 0x127   : > { %v2401_v30 = vsel %vm7313_vm12, %v6319_v3, %v2400_v16  ;;  %v2402_v31 = vrot.slane %v2400_v16, 4  ;;  %v1642_v32 = vrot.slane %v1640_v17, 5  ;;  %v1118_v34 = vrot.slane %v1116_v19, 7  ;;  %6208 = vmatmul.msk.bf16.gmra.mxu0 %vm625_vm0, %v6670_v28  ;;  %v937_v16 = vld [vmem:[#allocation2 + $0x6c] sm:$0x1] }
 0x128   : > { %v815_v35 = vadd.f32 %v7263_v22, %v779_v21  ;;  %v2488_v40 = vunpack.c.l.b16 %v2401_v30  ;;  %v1646_v51 = vrot.slane %v1644_v37, 4  ;;  %v1511_v57 = vshrl.u32 %v1457_v41, 16  ;;  %v7515_v30 = vld [vmem:[#allocation2 + $0x8] sm:$0x1] }
 0x129   : > { %v2404_v46 = vsel %vm7313_vm12, %v2402_v31, %v2403_v25  ;;  %v1121_v48 = vor.u32 %v1119_v39, %v1118_v34  ;;  %v1123_v49 = vrot.slane %v1118_v34, 4  ;;  %v1643_v55 = vsel %vm7389_vm1, %v1638_v7, %v1642_v32 }
 0x12a   : > { %v847_v50 = vmax.f32 %v815_v35, 0.0  ;;  %v2489_v54 = vunpack.c.l.b16 %v2404_v46  ;;  %v1647_v56 = vor.u32 %v1646_v51, %v1642_v32  ;;  %v1514_v60 = vshll.u32 %v1457_v41, 16  ;;  %v1387_v35 = vld [vmem:[#allocation2 + $0x54] sm:$0xf] }
 0x12b   : > { %v1122_v61 = vsel %vm7290_vm9, %v1114_v1, %v1121_v48  ;;  %v1385_v62 = vsel %vm7240_vm3, %v1123_v49, %v1384_v43  ;;  %v1652_v28 = vrot.slane %v1650_v15, 5  ;;  %v1907_v1 = vunpack.c.l.b16 %v1643_v55 }
 0x12c   : > { %v879_v63 = vpack.c.bf16 %v847_v50, %v847_v50  ;;  %v2515_v3 = vpack.c.b16 %v2489_v54, %v2488_v40  ;;  %v1469_v0 = vld [vmem:[#allocation2 + $0x48] sm:$0xf]  ;;  %1383 = vst.msk [vmem:[#allocation2 + $0x4c] sm:$0xf] %vm899_vm6, %v1122_v61  ;;  %v715_v5 = vpop.f32.mrf.mxu0  ;;  %v1648_v24 = vrot.slane %v1647_v56, 4  ;;  %v1527_v17 = vor.u32 %v7490_v29, %v7486_v9 }
 0x12d   : > { %v1655_v6 = vshrl.u32 %v1469_v0, 16  ;;  %v1658_v10 = vshll.u32 %v1469_v0, 16  ;;  %1386 = vst [vmem:[#allocation2 + $0x50] sm:$0x1] %v1385_v62  ;;  %v780_v12 = vmul.f32 %v7258_v20, %v715_v5  ;;  %v938_v26 = vsel %vm7240_vm3, 0, %v937_v16 }
 0x12e   : > { %v1125_v7 = vshrl.u32 %v879_v63, 16  ;;  %6339 = vmatmul.msk.bf16.gmra.mxu3 %vm1951_vm13, %v2515_v3  ;;  %v1653_v19 = vsel %vm7389_vm1, %v1648_v24, %v1652_v28  ;;  %v1128_v32 = vshll.u32 %v879_v63, 16  ;;  %v2318_v39 = vld [vmem:[#allocation2 + $0x48] sm:$0xe]  ;;  %939 = vst [vmem:[#allocation2 + $0x6c] sm:$0x1] %v938_v26 }
 0x12f   : > { %v1657_v21 = vrot.slane %v1655_v6, 4  ;;  %v1660_v25 = vrot.slane %v1658_v10, 5  ;;  %v816_v37 = vadd.f32 %v7263_v22, %v780_v12  ;;  %v1908_v34 = vunpack.c.l.b16 %v1653_v19 }
 0x130   : > { %v1127_v31 = vrot.slane %v1125_v7, 7  ;;  %v1513_v29 = vrot.slane %v1511_v57, 4  ;;  %v1516_v41 = vrot.slane %v1514_v60, 5  ;;  %v7520_v43 = vrot.slane %v1559_v4, 4  ;;  %v6671_v60 = vld [vmem:[%s7193_s24 + $0x78] sm:$0xff] }
 0x131   : > { %v1661_v40 = vor.u32 %v1660_v25, %v1657_v21  ;;  %v848_v51 = vmax.f32 %v816_v37, 0.0  ;;  %v1934_v15 = vpack.c.b16 %v1908_v34, %v1907_v1  ;;  %v1530_v47 = vshll.u32 %v7515_v30, 16 }
 0x132   : > { %v1130_v46 = vor.u32 %v1128_v32, %v1127_v31  ;;  %v6320_v48 = vrot.slane %v2318_v39, 9  ;;  %v7523_v49 = vrot.slane %v1527_v17, 4  ;;  %v1568_v50 = vshll.u32 %v7344_v2, 16 }
 0x133   : > { %v1572_v54 = vshrl.u32 %v7344_v2, 16  ;;  %v1131_v55 = vrot.slane %v1127_v31, 4  ;;  %v880_v57 = vpack.c.bf16 %v848_v51, %v848_v51  ;;  %6219 = vmatmul.msk.bf16.gmra.mxu1 %vm1951_vm13, %v1934_v15  ;;  %v6682_v4 = vld [vmem:[#allocation2 + $0x48] sm:$0xff]  ;;  %v1662_v62 = vrot.slane %v1661_v40, 4  ;;  %v1391_v31 = vld [vmem:[#allocation2 + $0x5c] sm:$0x1] }
 0x134   : > { %v1388_v56 = vsel %vm7277_vm7, %v1130_v46, %v1387_v35  ;;  %v1470_v61 = vld [vmem:[#allocation2 + $0x4c] sm:$0xf]  ;;  %v718_v63 = vpop.f32.mrf.mxu0  ;;  %v1497_v3 = vld [vmem:[#allocation2 + $0x50] sm:$0x1]  ;;  %v1517_v24 = vor.u32 %v1516_v41, %v1513_v29  ;;  %6304 = vmatmul.msk.bf16.gmra.mxu2 %vm1951_vm13, %v6682_v4  ;;  %v1532_v7 = vrot.slane %v1530_v47, 5  ;;  %v1547_v2 = vsel %vm7389_vm1, %v7423_v33, %v7412_v23 }
 0x135   : > { %1389 = vst [vmem:[#allocation2 + $0x54] sm:$0xf] %v1388_v56  ;;  %v2407_v0 = vrot.slane %v1470_v61, 5  ;;  %v1664_v5 = vshll.u32 %v1470_v61, 16  ;;  %v1133_v28 = vshrl.u32 %v880_v57, 16  ;;  %v781_v6 = vmul.f32 %v7258_v20, %v718_v63 }
 0x136   : > { %v2410_v10 = vrot.slane %v1497_v3, 5  ;;  %v1668_v17 = vshrl.u32 %v1470_v61, 16  ;;  %v1136_v21 = vshll.u32 %v880_v57, 16  ;;  %v1674_v34 = vshll.u32 %v1497_v3, 16 }
 0x137   : > { %v2408_v12 = vsel %vm7313_vm12, %v6320_v48, %v2407_v0  ;;  %v2409_v1 = vrot.slane %v2407_v0, 4  ;;  %v1666_v16 = vrot.slane %v1664_v5, 5  ;;  %v1135_v19 = vrot.slane %v1133_v28, 7  ;;  %6209 = vmatmul.msk.bf16.gmra.mxu0 %vm625_vm0, %v6671_v60  ;;  %v993_v60 = vld [vmem:[#allocation2 + $0x74] sm:$0x1] }
 0x138   : > { %v817_v25 = vadd.f32 %v7263_v22, %v781_v6  ;;  %v2490_v26 = vunpack.c.l.b16 %v2408_v12  ;;  %v1670_v37 = vrot.slane %v1668_v17, 4  ;;  %v1518_v39 = vrot.slane %v1517_v24, 4 }
 0x139   : > { %v2411_v32 = vsel %vm7313_vm12, %v2409_v1, %v2410_v10  ;;  %v1138_v35 = vor.u32 %v1136_v21, %v1135_v19  ;;  %v1140_v40 = vrot.slane %v1135_v19, 4  ;;  %v1667_v46 = vsel %vm7389_vm1, %v1662_v62, %v1666_v16  ;;  %v940_v10 = vld [vmem:[#allocation2 + $0x78] sm:$0x1] }
 0x13a   : > { %v849_v29 = vmax.f32 %v817_v25, 0.0  ;;  %v2491_v41 = vunpack.c.l.b16 %v2411_v32  ;;  %v1671_v51 = vor.u32 %v1670_v37, %v1666_v16  ;;  %v1523_v15 = vsel %vm7389_vm1, %v1518_v39, %v7486_v9  ;;  %v1394_v16 = vld [vmem:[#allocation2 + $0x60] sm:$0xf] }
 0x13b   : > { %v1533_v47 = vsel %vm7389_vm1, %v7523_v49, %v1532_v7  ;;  %v1139_v48 = vsel %vm7290_vm9, %v1131_v55, %v1138_v35  ;;  %v1392_v56 = vsel %vm7240_vm3, %v1140_v40, %v1391_v31  ;;  %v1676_v63 = vrot.slane %v1674_v34, 5 }
 0x13c   : > { %v881_v57 = vpack.c.bf16 %v849_v29, %v849_v29  ;;  %v2516_v4 = vpack.c.b16 %v2491_v41, %v2490_v26  ;;  %1390 = vst.msk [vmem:[#allocation2 + $0x58] sm:$0xf] %vm899_vm6, %v1139_v48  ;;  %v720_v61 = vpop.f32.mrf.mxu0  ;;  %v1672_v62 = vrot.slane %v1671_v51, 4  ;;  %v1471_v3 = vld [vmem:[#allocation2 + $0x54] sm:$0xf]  ;;  %v1909_v49 = vunpack.c.l.b16 %v1667_v46 }
 0x13d   : > { %1393 = vst [vmem:[#allocation2 + $0x5c] sm:$0x1] %v1392_v56  ;;  %v782_v0 = vmul.f32 %v7258_v20, %v720_v61  ;;  %v1897_v55 = vunpack.c.l.b16 %v1523_v15  ;;  %v1898_v28 = vunpack.c.l.b16 %v1533_v47  ;;  %v994_v6 = vsel %vm7247_vm5, 0, %v993_v60  ;;  %v2319_v17 = vld [vmem:[#allocation2 + $0x54] sm:$0xe] }
 0x13e   : > { %v1142_v9 = vshrl.u32 %v881_v57, 16  ;;  %6340 = vmatmul.msk.bf16.gmra.mxu3 %vm1951_vm13, %v2516_v4  ;;  %v1145_v5 = vshll.u32 %v881_v57, 16  ;;  %v1677_v24 = vsel %vm7389_vm1, %v1672_v62, %v1676_v63  ;;  %995 = vst [vmem:[#allocation2 + $0x74] sm:$0x1] %v994_v6  ;;  %v1679_v20 = vshrl.u32 %v1471_v3, 16 }
 0x13f   : > { %v818_v12 = vadd.f32 %v7263_v22, %v782_v0  ;;  %v1910_v1 = vunpack.c.l.b16 %v1677_v24  ;;  %v1682_v19 = vshll.u32 %v1471_v3, 16  ;;  %v941_v21 = vsel %vm7240_vm3, 0, %v940_v10  ;;  %v7585_v48 = vld [vmem:[%s7217_s29] ss:$0 sm:$0xff] }
 0x140   : > { %v7558_v7 = vrot.slane %v1142_v9, 7  ;;  %942 = vst [vmem:[#allocation2 + $0x78] sm:$0x1] %v941_v21  ;;  %v7566_v32 = vrot.slane %v1562_v18, 5  ;;  %v1681_v37 = vrot.slane %v1679_v20, 4  ;;  %v7570_v34 = vrot.slane %v1568_v50, 5 }
 0x141   : > { %v850_v26 = vmax.f32 %v818_v12, 0.0  ;;  %v1935_v31 = vpack.c.b16 %v1910_v1, %v1909_v49  ;;  %v1684_v22 = vrot.slane %v1682_v19, 5  ;;  %v7574_v39 = vrot.slane %v1572_v54, 4  ;;  %v996_v4 = vld [vmem:[#allocation2 + $0x80] sm:$0x1] }
 0x142   : > { %v1147_v25 = vor.u32 %v1145_v5, %v7558_v7  ;;  %v1929_v18 = vpack.c.b16 %v1898_v28, %v1897_v55  ;;  %v6321_v41 = vrot.slane %v2319_v17, 9  ;;  %v1148_v54 = vrot.slane %v7558_v7, 4  ;;  %v7594_v9 = vld [vmem:[%s9013_s3] ss:$0 sm:$0xff]  ;;  %v1398_v5 = vld [vmem:[#allocation2 + $0x68] sm:$0x1] }
 0x143   : > { %v882_v40 = vpack.c.bf16 %v850_v26, %v850_v26  ;;  %6220 = vmatmul.msk.bf16.gmra.mxu1 %vm1951_vm13, %v1935_v31  ;;  %v6683_v42 = vld [vmem:[#allocation2 + $0x54] sm:$0xff]  ;;  %v1685_v57 = vor.u32 %v1684_v22, %v1681_v37  ;;  %v997_v10 = vsel %vm7247_vm5, 0, %v996_v4  ;;  %v1557_v19 = vsel %vm7389_vm1, %v7475_v59, %v7449_v13 }
 0x144   : > { %v1395_v35 = vsel %vm7277_vm7, %v1147_v25, %v1394_v16  ;;  %v1472_v29 = vld [vmem:[#allocation2 + $0x58] sm:$0xf]  ;;  %v723_v46 = vpop.f32.mrf.mxu0  ;;  %v1498_v51 = vld [vmem:[#allocation2 + $0x5c] sm:$0x1]  ;;  %6305 = vmatmul.msk.bf16.gmra.mxu2 %vm1951_vm13, %v6683_v42  ;;  %998 = vst [vmem:[#allocation2 + $0x80] sm:$0x1] %v997_v10  ;;  %v1565_v21 = vor.u32 %v7566_v32, %v7520_v43  ;;  %v1575_v13 = vor.u32 %v7574_v39, %v7570_v34 }
 0x145   : > { %1396 = vst [vmem:[#allocation2 + $0x60] sm:$0xf] %v1395_v35  ;;  %v2414_v50 = vrot.slane %v1472_v29, 5  ;;  %v1688_v15 = vshll.u32 %v1472_v29, 16  ;;  %v1150_v47 = vshrl.u32 %v882_v40, 16  ;;  %v783_v56 = vmul.f32 %v7585_v48, %v723_v46 }
 0x146   : > { %v1153_v60 = vshll.u32 %v882_v40, 16  ;;  %v2417_v63 = vrot.slane %v1498_v51, 5  ;;  %v1692_v55 = vshrl.u32 %v1472_v29, 16  ;;  %v1698_v6 = vshll.u32 %v1498_v51, 16  ;;  %v943_v29 = vld [vmem:[#allocation2 + $0x84] sm:$0x1] }
 0x147   : > { %v2415_v61 = vsel %vm7313_vm12, %v6321_v41, %v2414_v50  ;;  %v2416_v62 = vrot.slane %v2414_v50, 4  ;;  %v1152_v3 = vrot.slane %v1150_v47, 7  ;;  %v819_v0 = vadd.f32 %v7594_v9, %v783_v56  ;;  %6214 = vmatmul.msk.bf16.vlgmr.msrb.gmra.mxu0 %vm1951_vm13, %v1929_v18  ;;  %v1401_v56 = vld [vmem:[#allocation2 + $0x6c] sm:$0xf] }
 0x148   : > { %v1690_v49 = vrot.slane %v1688_v15, 5  ;;  %v2492_v28 = vunpack.c.l.b16 %v2415_v61  ;;  %2587 = vmatpush.bf16.msrb.mxu0 %v7320_v36  ;;  %v1686_v16 = vrot.slane %v1685_v57, 4  ;;  %v1694_v17 = vrot.slane %v1692_v55, 4 }
 0x149   : > { %v2418_v24 = vsel %vm7313_vm12, %v2416_v62, %v2417_v63  ;;  %v1155_v7 = vor.u32 %v1153_v60, %v1152_v3  ;;  %v1157_v12 = vrot.slane %v1152_v3, 4  ;;  %v851_v1 = vmax.f32 %v819_v0, 0.0 }
 0x14a   : > { %v2493_v20 = vunpack.c.l.b16 %v2418_v24  ;;  %v1695_v35 = vor.u32 %v1694_v17, %v1690_v49  ;;  %v1691_v32 = vsel %vm7389_vm1, %v1686_v16, %v1690_v49  ;;  %v1700_v18 = vrot.slane %v1698_v6, 5 }
 0x14b   : > { %v1156_v25 = vsel %vm7290_vm9, %v1148_v54, %v1155_v7  ;;  %v1399_v36 = vsel %vm7240_vm3, %v1157_v12, %v1398_v5  ;;  %v883_v26 = vpack.c.bf16 %v851_v1, %v851_v1  ;;  %v944_v50 = vsel %vm7240_vm3, 0, %v943_v29 }
 0x14c   : > { %v2517_v31 = vpack.c.b16 %v2493_v20, %v2492_v28  ;;  %v1473_v37 = vld [vmem:[#allocation2 + $0x60] sm:$0xf]  ;;  %1397 = vst.msk [vmem:[#allocation2 + $0x64] sm:$0xf] %vm899_vm6, %v1156_v25  ;;  %v725_v22 = vpop.f32.mrf.mxu0  ;;  %v1696_v41 = vrot.slane %v1695_v35, 4  ;;  %v1911_v4 = vunpack.c.l.b16 %v1691_v32  ;;  %v1899_v60 = vunpack.c.l.b16 %v1547_v2 }
 0x14d   : > { %v1703_v40 = vshrl.u32 %v1473_v37, 16  ;;  %v1706_v42 = vshll.u32 %v1473_v37, 16  ;;  %1400 = vst [vmem:[#allocation2 + $0x68] sm:$0x1] %v1399_v36  ;;  %v1159_v59 = vshrl.u32 %v883_v26, 16  ;;  %v784_v43 = vmul.f32 %v7585_v48, %v725_v22 }
 0x14e   : > { %6341 = vmatmul.msk.bf16.gmra.mxu3 %vm1951_vm13, %v2517_v31  ;;  %v1162_v54 = vshll.u32 %v883_v26, 16  ;;  %v2320_v47 = vld [vmem:[#allocation2 + $0x60] sm:$0xe]  ;;  %945 = vst [vmem:[#allocation2 + $0x84] sm:$0x1] %v944_v50  ;;  %v1701_v57 = vsel %vm7389_vm1, %v1696_v41, %v1700_v18  ;;  %v1900_v61 = vunpack.c.l.b16 %v1557_v19  ;;  %v7630_v55 = vrot.slane %v1565_v21, 4 }
 0x14f   : > { %v1705_v46 = vrot.slane %v1703_v40, 4  ;;  %v1708_v51 = vrot.slane %v1706_v42, 5  ;;  %v1161_v15 = vrot.slane %v1159_v59, 7  ;;  %v820_v39 = vadd.f32 %v7594_v9, %v784_v43  ;;  %v999_v25 = vld [vmem:[#allocation2 + $0x8c] sm:$0x1] }
 0x150   : > { %v1912_v3 = vunpack.c.l.b16 %v1701_v57  ;;  %v6322_v49 = vrot.slane %v2320_v47, 9  ;;  %v7632_v5 = vrot.slane %v1575_v13, 4  ;;  %v1578_v24 = vshll.u32 %v7347_v8, 16  ;;  %v1405_v13 = vld [vmem:[#allocation2 + $0x74] sm:$0x1] }
 0x151   : > { %v1164_v62 = vor.u32 %v1162_v54, %v1161_v15  ;;  %v852_v63 = vmax.f32 %v820_v39, 0.0  ;;  %v1709_v0 = vor.u32 %v1708_v51, %v1705_v46  ;;  %v1165_v28 = vrot.slane %v1161_v15, 4 }
 0x152   : > { %v1936_v7 = vpack.c.b16 %v1912_v3, %v1911_v4  ;;  %v1930_v12 = vpack.c.b16 %v1900_v61, %v1899_v60  ;;  %v1000_v18 = vsel %vm7247_vm5, 0, %v999_v25  ;;  %v1571_v54 = vsel %vm7389_vm1, %v7630_v55, %v7570_v34 }
 0x153   : > { %v1402_v6 = vsel %vm7277_vm7, %v1164_v62, %v1401_v56  ;;  %v884_v10 = vpack.c.bf16 %v852_v63, %v852_v63  ;;  %v6684_v23 = vld [vmem:[#allocation2 + $0x60] sm:$0xff]  ;;  %v1710_v21 = vrot.slane %v1709_v0, 4  ;;  %1001 = vst [vmem:[#allocation2 + $0x8c] sm:$0x1] %v1000_v18  ;;  %v1580_v39 = vrot.slane %v1578_v24, 5 }
 0x154   : > { %v1474_v33 = vld [vmem:[#allocation2 + $0x64] sm:$0xf]  ;;  %1403 = vst [vmem:[#allocation2 + $0x6c] sm:$0xf] %v1402_v6  ;;  %v728_v2 = vpop.f32.mrf.mxu0  ;;  %v1499_v1 = vld [vmem:[#allocation2 + $0x68] sm:$0x1]  ;;  %6221 = vmatmul.msk.bf16.gmra.mxu1 %vm1951_vm13, %v1936_v7  ;;  %6306 = vmatmul.msk.bf16.gmra.mxu2 %vm1951_vm13, %v6684_v23  ;;  %v1901_v25 = vunpack.c.l.b16 %v1571_v54 }
 0x155   : > { %v2421_v20 = vrot.slane %v1474_v33, 5  ;;  %v1712_v16 = vshll.u32 %v1474_v33, 16  ;;  %v1167_v17 = vshrl.u32 %v884_v10, 16  ;;  %v785_v19 = vmul.f32 %v7585_v48, %v728_v2 }
 0x156   : > { %v2424_v8 = vrot.slane %v1499_v1, 5  ;;  %v1716_v37 = vshrl.u32 %v1474_v33, 16  ;;  %v1170_v35 = vshll.u32 %v884_v10, 16  ;;  %v1722_v32 = vshll.u32 %v1499_v1, 16 }
 0x157   : > { %v2422_v36 = vsel %vm7313_vm12, %v6322_v49, %v2421_v20  ;;  %v2423_v26 = vrot.slane %v2421_v20, 4  ;;  %v1714_v31 = vrot.slane %v1712_v16, 5  ;;  %v1169_v22 = vrot.slane %v1167_v17, 7  ;;  %6215 = vmatmul.msk.bf16.gmra.mxu0 %vm1951_vm13, %v1930_v12  ;;  %v1408_v20 = vld [vmem:[#allocation2 + $0x78] sm:$0xf] }
 0x158   : > { %v821_v40 = vadd.f32 %v7594_v9, %v785_v19  ;;  %v2494_v42 = vunpack.c.l.b16 %v2422_v36  ;;  %v1718_v43 = vrot.slane %v1716_v37, 4  ;;  %v1724_v63 = vrot.slane %v1722_v32, 5 }
 0x159   : > { %v2425_v59 = vsel %vm7313_vm12, %v2423_v26, %v2424_v8  ;;  %v1172_v29 = vor.u32 %v1170_v35, %v1169_v22  ;;  %v1174_v41 = vrot.slane %v1169_v22, 4  ;;  %v1715_v50 = vsel %vm7389_vm1, %v1710_v21, %v1714_v31 }
 0x15a   : > { %v853_v46 = vmax.f32 %v821_v40, 0.0  ;;  %v2495_v51 = vunpack.c.l.b16 %v2425_v59  ;;  %v1719_v15 = vor.u32 %v1718_v43, %v1714_v31  ;;  %v1913_v55 = vunpack.c.l.b16 %v1715_v50 }
 0x15b   : > { %v1173_v47 = vsel %vm7290_vm9, %v1165_v28, %v1172_v29  ;;  %v1406_v56 = vsel %vm7240_vm3, %v1174_v41, %v1405_v13  ;;  %v1475_v60 = vld [vmem:[#allocation2 + $0x6c] sm:$0xf]  ;;  %v1581_v24 = vsel %vm7389_vm1, %v7632_v5, %v1580_v39  ;;  %v946_v28 = vld [vmem:[#allocation2 + $0x90] sm:$0x1]  ;;  %vm5935_vm0 = vcmask 519168  }
 0x15c   : > { %v885_v57 = vpack.c.bf16 %v853_v46, %v853_v46  ;;  %v2518_v4 = vpack.c.b16 %v2495_v51, %v2494_v42  ;;  %1404 = vst.msk [vmem:[#allocation2 + $0x70] sm:$0xf] %vm899_vm6, %v1173_v47  ;;  %v730_v61 = vpop.f32.mrf.mxu0  ;;  %v1720_v62 = vrot.slane %v1719_v15, 4  ;;  %v1727_v3 = vshrl.u32 %v1475_v60, 16  ;;  %v2321_v17 = vld [vmem:[#allocation2 + $0x6c] sm:$0xe] }
 0x15d   : > { %v1730_v0 = vshll.u32 %v1475_v60, 16  ;;  %1407 = vst [vmem:[#allocation2 + $0x74] sm:$0x1] %v1406_v56  ;;  %v786_v34 = vmul.f32 %v7585_v48, %v730_v61  ;;  %v947_v23 = vsel %vm7240_vm3, 0, %v946_v28  ;;  %v1902_v16 = vunpack.c.l.b16 %v1581_v24  ;;  %v1002_v46 = vld [vmem:[#allocation2 + $0x98] sm:$0x1] }
 0x15e   : > { %v1176_v49 = vshrl.u32 %v885_v57, 16  ;;  %6342 = vmatmul.msk.bf16.gmra.mxu3 %vm1951_vm13, %v2518_v4  ;;  %v1725_v6 = vsel %vm7389_vm1, %v1720_v62, %v1724_v63  ;;  %v1729_v10 = vrot.slane %v1727_v3, 4  ;;  %v1179_v2 = vshll.u32 %v885_v57, 16  ;;  %948 = vst [vmem:[#allocation2 + $0x90] sm:$0x1] %v947_v23 }
 0x15f   : > { %v1732_v7 = vrot.slane %v1730_v0, 5  ;;  %v822_v12 = vadd.f32 %v7594_v9, %v786_v34  ;;  %v1914_v1 = vunpack.c.l.b16 %v1725_v6  ;;  %v6323_v35 = vrot.slane %v2321_v17, 9  ;;  %v1412_v4 = vld [vmem:[#allocation2 + $0x80] sm:$0x1] }
 0x160   : > { %v1178_v33 = vrot.slane %v1176_v49, 7  ;;  %v1931_v42 = vpack.c.b16 %v1902_v16, %v1901_v25  ;;  %v1003_v63 = vsel %vm7247_vm5, 0, %v1002_v46  ;;  %v6676_v46 = vld [vmem:[#allocation2] sm:$0xff] }
 0x161   : > { %v854_v5 = vmax.f32 %v822_v12, 0.0  ;;  %v1937_v8 = vpack.c.b16 %v1914_v1, %v1913_v55  ;;  %v1733_v21 = vor.u32 %v1732_v7, %v1729_v10  ;;  %1004 = vst [vmem:[#allocation2 + $0x98] sm:$0x1] %v1003_v63 }
 0x162   : > { %v1181_v19 = vor.u32 %v1179_v2, %v1178_v33  ;;  %v1182_v36 = vrot.slane %v1178_v33, 4 }
 0x163   : > { %v886_v31 = vpack.c.bf16 %v854_v5, %v854_v5  ;;  %v6685_v37 = vld [vmem:[#allocation2 + $0x6c] sm:$0xff]  ;;  %v1734_v41 = vrot.slane %v1733_v21, 4  ;;  %v949_v5 = vld [vmem:[#allocation2 + $0x9c] sm:$0x1] }
 0x164   : > { %v1409_v26 = vsel %vm7277_vm7, %v1181_v19, %v1408_v20  ;;  %v1476_v22 = vld [vmem:[#allocation2 + $0x70] sm:$0xf]  ;;  %v733_v40 = vpop.f32.mrf.mxu0  ;;  %v1500_v13 = vld [vmem:[#allocation2 + $0x74] sm:$0x1]  ;;  %6222 = vmatmul.msk.bf16.gmra.mxu1 %vm1951_vm13, %v1937_v8  ;;  %6307 = vmatmul.msk.bf16.gmra.mxu2 %vm1951_vm13, %v6685_v37 }
 0x165   : > { %1410 = vst [vmem:[#allocation2 + $0x78] sm:$0xf] %v1409_v26  ;;  %v2428_v59 = vrot.slane %v1476_v22, 5  ;;  %v1736_v43 = vshll.u32 %v1476_v22, 16  ;;  %v1184_v32 = vshrl.u32 %v886_v31, 16  ;;  %v787_v18 = vmul.f32 %v7585_v48, %v733_v40 }
 0x166   : > { %v2431_v29 = vrot.slane %v1500_v13, 5  ;;  %v1740_v54 = vshrl.u32 %v1476_v22, 16  ;;  %v1187_v47 = vshll.u32 %v886_v31, 16  ;;  %v1746_v62 = vshll.u32 %v1500_v13, 16 }
 0x167   : > { %v2429_v51 = vsel %vm7313_vm12, %v6323_v35, %v2428_v59  ;;  %v2430_v50 = vrot.slane %v2428_v59, 4  ;;  %v1738_v15 = vrot.slane %v1736_v43, 5  ;;  %v1186_v39 = vrot.slane %v1184_v32, 7  ;;  %6216 = vmatmul.msk.bf16.gmra.mxu0 %vm1951_vm13, %v1931_v42  ;;  %v1415_v35 = vld [vmem:[#allocation2 + $0x84] sm:$0xf] }
 0x168   : > { %v823_v56 = vadd.f32 %v7594_v9, %v787_v18  ;;  %v2496_v57 = vunpack.c.l.b16 %v2429_v51  ;;  %v1742_v61 = vrot.slane %v1740_v54, 4  ;;  %v1748_v12 = vrot.slane %v1746_v62, 5 }
 0x169   : > { %v2432_v60 = vsel %vm7313_vm12, %v2430_v50, %v2431_v29  ;;  %v1189_v3 = vor.u32 %v1187_v47, %v1186_v39  ;;  %v1191_v0 = vrot.slane %v1186_v39, 4  ;;  %v1739_v55 = vsel %vm7389_vm1, %v1734_v41, %v1738_v15 }
 0x16a   : > { %v855_v49 = vmax.f32 %v823_v56, 0.0  ;;  %v2497_v34 = vunpack.c.l.b16 %v2432_v60  ;;  %v1743_v24 = vor.u32 %v1742_v61, %v1738_v15  ;;  %v1915_v19 = vunpack.c.l.b16 %v1739_v55  ;;  %v1005_v61 = vld [vmem:[#allocation2 + $0xa4] sm:$0x1] }
 0x16b   : > { %v1190_v28 = vsel %vm7290_vm9, %v1182_v36, %v1189_v3  ;;  %v1413_v6 = vsel %vm7240_vm3, %v1191_v0, %v1412_v4  ;;  %v950_v36 = vsel %vm7240_vm3, 0, %v949_v5 }
 0x16c   : > { %v887_v10 = vpack.c.bf16 %v855_v49, %v855_v49  ;;  %v2519_v7 = vpack.c.b16 %v2497_v34, %v2496_v57  ;;  %v1477_v23 = vld [vmem:[#allocation2 + $0x78] sm:$0xf]  ;;  %1411 = vst.msk [vmem:[#allocation2 + $0x7c] sm:$0xf] %vm899_vm6, %v1190_v28  ;;  %v735_v33 = vpop.f32.mrf.mxu0  ;;  %v1744_v2 = vrot.slane %v1743_v24, 4 }
 0x16d   : > { %v1751_v1 = vshrl.u32 %v1477_v23, 16  ;;  %v1754_v20 = vshll.u32 %v1477_v23, 16  ;;  %1414 = vst [vmem:[#allocation2 + $0x80] sm:$0x1] %v1413_v6  ;;  %v788_v17 = vmul.f32 %v7585_v48, %v735_v33  ;;  %v2322_v40 = vld [vmem:[#allocation2 + $0x78] sm:$0xe] }
 0x16e   : > { %v1193_v16 = vshrl.u32 %v887_v10, 16  ;;  %6343 = vmatmul.msk.bf16.gmra.mxu3 %vm1951_vm13, %v2519_v7  ;;  %v1749_v8 = vsel %vm7389_vm1, %v1744_v2, %v1748_v12  ;;  %v1196_v31 = vshll.u32 %v887_v10, 16  ;;  %951 = vst [vmem:[#allocation2 + $0x9c] sm:$0x1] %v950_v36  ;;  %v6324_v50 = vrot.slane %v2322_v40, 9 }
 0x16f   : > { %v1753_v21 = vrot.slane %v1751_v1, 4  ;;  %v1756_v25 = vrot.slane %v1754_v20, 5  ;;  %v824_v37 = vadd.f32 %v7594_v9, %v788_v17  ;;  %v1916_v22 = vunpack.c.l.b16 %v1749_v8  ;;  %v1419_v28 = vld [vmem:[#allocation2 + $0x8c] sm:$0x1]  ;;  %v952_v40 = vld [vmem:[#allocation2 + $0xa8] sm:$0x1] }
 0x170   : > { %v1195_v26 = vrot.slane %v1193_v16, 7  ;;  %v1006_v23 = vsel %vm7247_vm5, 0, %v1005_v61 }
 0x171   : > { %v856_v13 = vmax.f32 %v824_v37, 0.0  ;;  %v1938_v59 = vpack.c.b16 %v1916_v22, %v1915_v19  ;;  %v1757_v43 = vor.u32 %v1756_v25, %v1753_v21  ;;  %1007 = vst [vmem:[#allocation2 + $0xa4] sm:$0x1] %v1006_v23 }
 0x172   : > { %v1198_v42 = vor.u32 %v1196_v31, %v1195_v26  ;;  %v1199_v32 = vrot.slane %v1195_v26, 4 }
 0x173   : > { %v888_v29 = vpack.c.bf16 %v856_v13, %v856_v13  ;;  %v6686_v41 = vld [vmem:[#allocation2 + $0x78] sm:$0xff]  ;;  %v1758_v60 = vrot.slane %v1757_v43, 4 }
 0x174   : > { %v1416_v18 = vsel %vm7277_vm7, %v1198_v42, %v1415_v35  ;;  %v1478_v51 = vld [vmem:[#allocation2 + $0x7c] sm:$0xf]  ;;  %v738_v15 = vpop.f32.mrf.mxu0  ;;  %v1501_v54 = vld [vmem:[#allocation2 + $0x80] sm:$0x1]  ;;  %6223 = vmatmul.msk.bf16.gmra.mxu1 %vm1951_vm13, %v1938_v59  ;;  %6308 = vmatmul.msk.bf16.gmra.mxu2 %vm1951_vm13, %v6686_v41  ;;  %v953_v59 = vsel %vm7240_vm3, 0, %v952_v40 }
 0x175   : > { %1417 = vst [vmem:[#allocation2 + $0x84] sm:$0xf] %v1416_v18  ;;  %v2435_v39 = vrot.slane %v1478_v51, 5  ;;  %v1760_v47 = vshll.u32 %v1478_v51, 16  ;;  %v1201_v56 = vshrl.u32 %v888_v29, 16  ;;  %v789_v57 = vmul.f32 %v7585_v48, %v738_v15 }
 0x176   : > { %v2438_v4 = vrot.slane %v1501_v54, 5  ;;  %v1764_v0 = vshrl.u32 %v1478_v51, 16  ;;  %v1204_v34 = vshll.u32 %v888_v29, 16  ;;  %v1770_v7 = vshll.u32 %v1501_v54, 16  ;;  %954 = vst [vmem:[#allocation2 + $0xa8] sm:$0x1] %v953_v59 }
 0x177   : > { %v2436_v62 = vsel %vm7313_vm12, %v6324_v50, %v2435_v39  ;;  %v2437_v63 = vrot.slane %v2435_v39, 4  ;;  %v1762_v3 = vrot.slane %v1760_v47, 5  ;;  %v1203_v49 = vrot.slane %v1201_v56, 7  ;;  %6298 = vmatmul.msk.bf16.vlgmr.msra.gmra.mxu0 %vm1951_vm13, %v6676_v46  ;;  %v1422_v41 = vld [vmem:[#allocation2 + $0x90] sm:$0xf] }
 0x178   : > { %v825_v55 = vadd.f32 %v7594_v9, %v789_v57  ;;  %v2498_v24 = vunpack.c.l.b16 %v2436_v62  ;;  %v1766_v10 = vrot.slane %v1764_v0, 4  ;;  %v1772_v26 = vrot.slane %v1770_v7, 5 }
 0x179   : > { %v2439_v6 = vsel %vm7313_vm12, %v2437_v63, %v2438_v4  ;;  %v1206_v33 = vor.u32 %v1204_v34, %v1203_v49  ;;  %v1208_v2 = vrot.slane %v1203_v49, 4  ;;  %v1763_v20 = vsel %vm7389_vm1, %v1758_v60, %v1762_v3 }
 0x17a   : > { %v857_v12 = vmax.f32 %v825_v55, 0.0  ;;  %v2499_v1 = vunpack.c.l.b16 %v2439_v6  ;;  %v1767_v16 = vor.u32 %v1766_v10, %v1762_v3  ;;  %v1917_v13 = vunpack.c.l.b16 %v1763_v20  ;;  %v1008_v10 = vld [vmem:[#allocation2 + $0xb0] sm:$0x1] }
 0x17b   : > { %v1207_v17 = vsel %vm7290_vm9, %v1199_v32, %v1206_v33  ;;  %v1420_v19 = vsel %vm7240_vm3, %v1208_v2, %v1419_v28  ;;  %v2365_v47 = vrot.slane %v7464_v44, 5  ;;  %v6677_v28 = vld [vmem:[#allocation2 + $0xc] sm:$0xff] }
 0x17c   : > { %v889_v5 = vpack.c.bf16 %v857_v12, %v857_v12  ;;  %v2520_v8 = vpack.c.b16 %v2499_v1, %v2498_v24  ;;  %v1479_v21 = vld [vmem:[#allocation2 + $0x84] sm:$0xf]  ;;  %1418 = vst.msk [vmem:[#allocation2 + $0x88] sm:$0xf] %vm899_vm6, %v1207_v17  ;;  %v740_v25 = vpop.f32.mrf.mxu0  ;;  %v1768_v36 = vrot.slane %v1767_v16, 4 }
 0x17d   : > { %v1775_v31 = vshrl.u32 %v1479_v21, 16  ;;  %v1778_v37 = vshll.u32 %v1479_v21, 16  ;;  %1421 = vst [vmem:[#allocation2 + $0x8c] sm:$0x1] %v1420_v19  ;;  %v790_v35 = vmul.f32 %v7585_v48, %v740_v25  ;;  %v2323_v46 = vld [vmem:[#allocation2 + $0x84] sm:$0xe] }
 0x17e   : > { %v1210_v22 = vshrl.u32 %v889_v5, 16  ;;  %6344 = vmatmul.msk.bf16.gmra.mxu3 %vm1951_vm13, %v2520_v8  ;;  %v1773_v42 = vsel %vm7389_vm1, %v1768_v36, %v1772_v26  ;;  %v1213_v32 = vshll.u32 %v889_v5, 16  ;;  %v6325_v61 = vrot.slane %v2323_v46, 9  ;;  %v2312_v17 = vld [vmem:[#allocation2] sm:$0xe] }
 0x17f   : > { %v826_v18 = vadd.f32 %v7594_v9, %v790_v35  ;;  %v1918_v29 = vunpack.c.l.b16 %v1773_v42  ;;  %v1777_v51 = vrot.slane %v1775_v31, 4  ;;  %v1780_v50 = vrot.slane %v1778_v37, 5  ;;  %v1426_v19 = vld [vmem:[#allocation2 + $0x98] sm:$0x1] }
 0x180   : > { %v1212_v43 = vrot.slane %v1210_v22, 7  ;;  %v1009_v36 = vsel %vm7247_vm5, 0, %v1008_v10  ;;  %v2368_v35 = vrot.slane %v7515_v30, 5 }
 0x181   : > { %v858_v54 = vmax.f32 %v826_v18, 0.0  ;;  %v1939_v39 = vpack.c.b16 %v1918_v29, %v1917_v13  ;;  %v1781_v0 = vor.u32 %v1780_v50, %v1777_v51  ;;  %1010 = vst [vmem:[#allocation2 + $0xb0] sm:$0x1] %v1009_v36  ;;  %v6314_v13 = vrot.slane %v2312_v17, 9 }
 0x182   : > { %v1215_v15 = vor.u32 %v1213_v32, %v1212_v43  ;;  %v1216_v34 = vrot.slane %v1212_v43, 4 }
 0x183   : > { %v890_v57 = vpack.c.bf16 %v858_v54, %v858_v54  ;;  %v6687_v4 = vld [vmem:[#allocation2 + $0x84] sm:$0xff]  ;;  %v1782_v40 = vrot.slane %v1781_v0, 4 }
 0x184   : > { %v1423_v56 = vsel %vm7277_vm7, %v1215_v15, %v1422_v41  ;;  %v1480_v60 = vld [vmem:[#allocation2 + $0x88] sm:$0xf]  ;;  %v743_v62 = vpop.f32.mrf.mxu0  ;;  %v1502_v63 = vld [vmem:[#allocation2 + $0x8c] sm:$0x1]  ;;  %6224 = vmatmul.msk.bf16.gmra.mxu1 %vm1951_vm13, %v1939_v39  ;;  %6309 = vmatmul.msk.bf16.gmra.mxu2 %vm1951_vm13, %v6687_v4 }
 0x185   : > { %1424 = vst [vmem:[#allocation2 + $0x90] sm:$0xf] %v1423_v56  ;;  %v2442_v3 = vrot.slane %v1480_v60, 5  ;;  %v1784_v49 = vshll.u32 %v1480_v60, 16  ;;  %v1218_v55 = vshrl.u32 %v890_v57, 16  ;;  %v791_v24 = vmul.f32 %v7585_v48, %v743_v62  ;;  %v6713_v56 = vld [vmem:[#allocation6 + $0x28] sm:$0xff] }
 0x186   : > { %v2445_v6 = vrot.slane %v1502_v63, 5  ;;  %v1788_v2 = vshrl.u32 %v1480_v60, 16  ;;  %v1221_v1 = vshll.u32 %v890_v57, 16  ;;  %v1794_v25 = vshll.u32 %v1502_v63, 16  ;;  %3937 = vmatpush.bf16.msrb.mxu3 %v6713_v56 }
 0x187   : > { %v2443_v7 = vsel %vm7313_vm12, %v6325_v61, %v2442_v3  ;;  %v2444_v23 = vrot.slane %v2442_v3, 4  ;;  %v1786_v33 = vrot.slane %v1784_v49, 5  ;;  %v1220_v12 = vrot.slane %v1218_v55, 7  ;;  %6299 = vmatmul.msk.bf16.gmra.mxu0 %vm1951_vm13, %v6677_v28  ;;  %v2247_v5 = vpop.f32.mrf.mxu2  ;;  %v955_v61 = vld [vmem:[#allocation2 + $0xb4] sm:$0x1] }
 0x188   : > { %v827_v20 = vadd.f32 %v7594_v9, %v791_v24  ;;  %v2500_v16 = vunpack.c.l.b16 %v2443_v7  ;;  %v1790_v21 = vrot.slane %v1788_v2, 4  ;;  %v1796_v30 = vrot.slane %v1794_v25, 5  ;;  %v1429_v3 = vld [vmem:[#allocation2 + $0x9c] sm:$0xf] }
 0x189   : > { %v2446_v8 = vsel %vm7313_vm12, %v2444_v23, %v2445_v6  ;;  %v1223_v26 = vor.u32 %v1221_v1, %v1220_v12  ;;  %v1225_v31 = vrot.slane %v1220_v12, 4  ;;  %v1787_v46 = vsel %vm7389_vm1, %v1782_v40, %v1786_v33 }
 0x18a   : > { %v859_v37 = vmax.f32 %v827_v20, 0.0  ;;  %v2501_v22 = vunpack.c.l.b16 %v2446_v8  ;;  %v1791_v42 = vor.u32 %v1790_v21, %v1786_v33  ;;  %v2366_v57 = vsel %vm7313_vm12, %v6314_v13, %v2365_v47 }
 0x18b   : > { %v1224_v59 = vsel %vm7290_vm9, %v1216_v34, %v1223_v26  ;;  %v1427_v43 = vsel %vm7240_vm3, %v1225_v31, %v1426_v19  ;;  %v2367_v62 = vrot.slane %v2365_v47, 4  ;;  %v956_v34 = vsel %vm7240_vm3, 0, %v955_v61 }
 0x18c   : > { %v891_v32 = vpack.c.bf16 %v859_v37, %v859_v37  ;;  %v2521_v18 = vpack.c.b16 %v2501_v22, %v2500_v16  ;;  %v1481_v29 = vld [vmem:[#allocation2 + $0x90] sm:$0xf]  ;;  %1425 = vst.msk [vmem:[#allocation2 + $0x94] sm:$0xf] %vm899_vm6, %v1224_v59  ;;  %v745_v41 = vpop.f32.mrf.mxu0  ;;  %v1792_v51 = vrot.slane %v1791_v42, 4  ;;  %v1919_v28 = vunpack.c.l.b16 %v1787_v46  ;;  %v6678_v42 = vld [vmem:[#allocation2 + $0x18] sm:$0xff] }
 0x18d   : > { %v1799_v50 = vshrl.u32 %v1481_v29, 16  ;;  %1428 = vst [vmem:[#allocation2 + $0x98] sm:$0x1] %v1427_v43  ;;  %v792_v54 = vmul.f32 %v7585_v48, %v745_v41  ;;  %v1802_v39 = vshll.u32 %v1481_v29, 16  ;;  %v2324_v6 = vld [vmem:[#allocation2 + $0x90] sm:$0xe]  ;;  %v2369_v44 = vsel %vm7313_vm12, %v2367_v62, %v2368_v35 }
 0x18e   : > { %v1227_v15 = vshrl.u32 %v891_v32, 16  ;;  %6345 = vmatmul.msk.bf16.gmra.mxu3 %vm1951_vm13, %v2521_v18  ;;  %v1230_v4 = vshll.u32 %v891_v32, 16  ;;  %v1797_v60 = vsel %vm7389_vm1, %v1792_v51, %v1796_v30  ;;  %957 = vst [vmem:[#allocation2 + $0xb4] sm:$0x1] %v956_v34  ;;  %v2478_v47 = vunpack.c.l.b16 %v2366_v57  ;;  %v1011_v59 = vld [vmem:[#allocation2 + $0xbc] sm:$0x1] }
 0x18f   : > { %v828_v0 = vadd.f32 %v7594_v9, %v792_v54  ;;  %v1920_v49 = vunpack.c.l.b16 %v1797_v60  ;;  %v1801_v10 = vrot.slane %v1799_v50, 4  ;;  %v2249_v2 = vpop.f32.mrf.mxu2  ;;  %v1804_v12 = vrot.slane %v1802_v39, 5  ;;  %v1433_v50 = vld [vmem:[#allocation2 + $0xa4] sm:$0x1] }
 0x190   : > { %v7755_v63 = vrot.slane %v1227_v15, 7  ;;  %v2024_v55 = vpop.f32.mrf.mxu1  ;;  %v2479_v20 = vunpack.c.l.b16 %v2369_v44  ;;  %v6326_v25 = vrot.slane %v2324_v6, 9 }
 0x191   : > { %v2604_v24 = vpop.f32.mrf.mxu3  ;;  %v860_v23 = vmax.f32 %v828_v0, 0.0  ;;  %v2248_v33 = vadd.f32 %v2247_v5, %v2024_v55  ;;  %v1940_v1 = vpack.c.b16 %v1920_v49, %v1919_v28  ;;  %v1805_v13 = vor.u32 %v1804_v12, %v1801_v10 }
 0x192   : > { %v1232_v7 = vor.u32 %v1230_v4, %v7755_v63  ;;  %v7767_v22 = vpack.c.b16 %v2479_v20, %v2478_v47  ;;  %v1233_v5 = vrot.slane %v7755_v63, 4  ;;  %v1012_v4 = vsel %vm7247_vm5, 0, %v1011_v59 }
 0x193   : > { %v892_v17 = vpack.c.bf16 %v860_v23, %v860_v23  ;;  %v7765_v19 = vadd.f32 %v2604_v24, %v2248_v33  ;;  %v6688_v8 = vld [vmem:[#allocation2 + $0x90] sm:$0xff]  ;;  %1013 = vst [vmem:[#allocation2 + $0xbc] sm:$0x1] %v1012_v4  ;;  %v1806_v34 = vrot.slane %v1805_v13, 4 }
 0x194   : > { %v1430_v16 = vsel %vm7277_vm7, %v1232_v7, %v1429_v3  ;;  %v1482_v21 = vld [vmem:[#allocation2 + $0x94] sm:$0xf]  ;;  %v748_v36 = vpop.f32.mrf.mxu0  ;;  %v1503_v26 = vld [vmem:[#allocation2 + $0x98] sm:$0x1]  ;;  %6225 = vmatmul.msk.bf16.gmra.mxu1 %vm1951_vm13, %v1940_v1  ;;  %6310 = vmatmul.msk.bf16.gmra.mxu2 %vm1951_vm13, %v6688_v8  ;;  %v958_v8 = vld [vmem:[#allocation2 + $0xc0] sm:$0x1] }
 0x195   : > { %1431 = vst [vmem:[#allocation2 + $0x9c] sm:$0xf] %v1430_v16  ;;  %v2449_v31 = vrot.slane %v1482_v21, 5  ;;  %v1808_v37 = vshll.u32 %v1482_v21, 16  ;;  %v1235_v35 = vshrl.u32 %v892_v17, 16  ;;  %v793_v40 = vmul.f32 %v7585_v48, %v748_v36 }
 0x196   : > { %v2452_v32 = vrot.slane %v1503_v26, 5  ;;  %v1812_v29 = vshrl.u32 %v1482_v21, 16  ;;  %v1238_v46 = vshll.u32 %v892_v17, 16  ;;  %v1818_v57 = vshll.u32 %v1503_v26, 16 }
 0x197   : > { %v2451_v43 = vrot.slane %v2449_v31, 4  ;;  %v1810_v18 = vrot.slane %v1808_v37, 5  ;;  %v1237_v41 = vrot.slane %v1235_v35, 7  ;;  %v829_v51 = vadd.f32 %v7594_v9, %v793_v40  ;;  %6300 = vmatmul.msk.bf16.gmra.mxu0 %vm1951_vm13, %v6678_v42  ;;  %v2252_v3 = vpop.f32.mrf.mxu2  ;;  %v1436_v37 = vld [vmem:[#allocation2 + $0xa8] sm:$0xf] }
 0x198   : > { %v2450_v30 = vsel %vm7313_vm12, %v6326_v25, %v2449_v31  ;;  %v2026_v15 = vpop.f32.mrf.mxu1  ;;  %v1814_v56 = vrot.slane %v1812_v29, 4  ;;  %v1820_v33 = vrot.slane %v1818_v57, 5  ;;  %v7797_v31 = vld [vmem:[#allocation2 + $0xc] sm:$0xf]  ;;  %v959_v59 = vsel %vm7240_vm3, 0, %v958_v8 }
 0x199   : > { %v2606_v54 = vpop.f32.mrf.mxu3  ;;  %v2453_v39 = vsel %vm7313_vm12, %v2451_v43, %v2452_v32  ;;  %v1240_v60 = vor.u32 %v1238_v46, %v1237_v41  ;;  %v1242_v61 = vrot.slane %v1237_v41, 4  ;;  %v861_v62 = vmax.f32 %v829_v51, 0.0  ;;  %960 = vst [vmem:[#allocation2 + $0xc0] sm:$0x1] %v959_v59 }
 0x19a   : > { %v2250_v63 = vadd.f32 %v2249_v2, %v2026_v15  ;;  %v2502_v0 = vunpack.c.l.b16 %v2450_v30  ;;  %v2503_v49 = vunpack.c.l.b16 %v2453_v39  ;;  %v1815_v55 = vor.u32 %v1814_v56, %v1810_v18 }
 0x19b   : > { %v1241_v24 = vsel %vm7290_vm9, %v1233_v5, %v1240_v60  ;;  %v1434_v28 = vsel %vm7240_vm3, %v1242_v61, %v1433_v50  ;;  %v893_v6 = vpack.c.bf16 %v861_v62, %v861_v62  ;;  %v1811_v20 = vsel %vm7389_vm1, %v1806_v34, %v1810_v18 }
 0x19c   : > { %v7785_v10 = vadd.f32 %v2606_v54, %v2250_v63  ;;  %v1483_v44 = vld [vmem:[#allocation2 + $0x9c] sm:$0xf]  ;;  %1432 = vst.msk [vmem:[#allocation2 + $0xa0] sm:$0xf] %vm899_vm6, %v1241_v24  ;;  %v750_v47 = vpop.f32.mrf.mxu0  ;;  %v2522_v7 = vpack.c.b16 %v2503_v49, %v2502_v0  ;;  %v1816_v23 = vrot.slane %v1815_v55, 4  ;;  %v1921_v40 = vunpack.c.l.b16 %v1811_v20 }
 0x19d   : > { %v1823_v2 = vshrl.u32 %v1483_v44, 16  ;;  %1435 = vst [vmem:[#allocation2 + $0xa4] sm:$0x1] %v1434_v28  ;;  %v1244_v12 = vshrl.u32 %v893_v6, 16  ;;  %v794_v1 = vmul.f32 %v7585_v48, %v750_v47  ;;  %v1826_v16 = vshll.u32 %v1483_v44, 16 }
 0x19e   : > { %6346 = vmatmul.msk.bf16.gmra.mxu3 %vm1951_vm13, %v2522_v7  ;;  %v1821_v17 = vsel %vm7389_vm1, %v1816_v23, %v1820_v33  ;;  %v1247_v25 = vshll.u32 %v893_v6, 16  ;;  %v2325_v42 = vld [vmem:[#allocation2 + $0x9c] sm:$0xe]  ;;  %v3040_v51 = vshrl.u32 %v7797_v31, 16  ;;  %v1014_v49 = vld [vmem:[#allocation2 + $0xc8] sm:$0x1] }
 0x19f   : > { %v7794_v21 = vrot.slane %v1244_v12, 7  ;;  %v830_v36 = vadd.f32 %v7594_v9, %v794_v1  ;;  %v1922_v26 = vunpack.c.l.b16 %v1821_v17  ;;  %v1825_v13 = vrot.slane %v1823_v2, 4  ;;  %v2254_v29 = vpop.f32.mrf.mxu2  ;;  %v1440_v23 = vld [vmem:[#allocation2 + $0xb0] sm:$0x1] }
 0x1a0   : > { %v2029_v5 = vpop.f32.mrf.mxu1  ;;  %v1828_v41 = vrot.slane %v1826_v16, 5  ;;  %v6327_v56 = vrot.slane %v2325_v42, 9  ;;  %v1015_v20 = vsel %vm7247_vm5, 0, %v1014_v49 }
 0x1a1   : > { %v2609_v35 = vpop.f32.mrf.mxu3  ;;  %v1249_v43 = vor.u32 %v1247_v25, %v7794_v21  ;;  %v862_v32 = vmax.f32 %v830_v36, 0.0  ;;  %v2253_v18 = vadd.f32 %v2252_v3, %v2029_v5  ;;  %v1941_v46 = vpack.c.b16 %v1922_v26, %v1921_v40  ;;  %1016 = vst [vmem:[#allocation2 + $0xc8] sm:$0x1] %v1015_v20 }
 0x1a2   : > { %v1250_v57 = vrot.slane %v7794_v21, 4  ;;  %v1829_v0 = vor.u32 %v1828_v41, %v1825_v13  ;;  %v7826_v13 = vld [vmem:[#allocation2 + $0x10] sm:$0xf] }
 0x1a3   : > { %v1437_v30 = vsel %vm7277_vm7, %v1249_v43, %v1436_v37  ;;  %v894_v50 = vpack.c.bf16 %v862_v32, %v862_v32  ;;  %v7805_v15 = vadd.f32 %v2609_v35, %v2253_v18  ;;  %v6689_v54 = vld [vmem:[#allocation2 + $0x9c] sm:$0xff] }
 0x1a4   : > { %v1484_v39 = vld [vmem:[#allocation2 + $0xa0] sm:$0xf]  ;;  %1438 = vst [vmem:[#allocation2 + $0xa8] sm:$0xf] %v1437_v30  ;;  %v753_v4 = vpop.f32.mrf.mxu0  ;;  %v1504_v60 = vld [vmem:[#allocation2 + $0xa4] sm:$0x1]  ;;  %6226 = vmatmul.msk.bf16.gmra.mxu1 %vm1951_vm13, %v1941_v46  ;;  %6311 = vmatmul.msk.bf16.gmra.mxu2 %vm1951_vm13, %v6689_v54 }
 0x1a5   : > { %v2456_v61 = vrot.slane %v1484_v39, 5  ;;  %v1252_v62 = vshrl.u32 %v894_v50, 16  ;;  %v1255_v63 = vshll.u32 %v894_v50, 16  ;;  %v795_v3 = vmul.f32 %v7585_v48, %v753_v4  ;;  %v7831_v46 = vld [vmem:[%s7217_s29] ss:$0 sm:$0xff] }
 0x1a6   : > { %v2459_v55 = vrot.slane %v1504_v60, 5  ;;  %v1832_v24 = vshll.u32 %v1484_v39, 16  ;;  %v1836_v28 = vshrl.u32 %v1484_v39, 16  ;;  %v1842_v7 = vshll.u32 %v1504_v60, 16 }
 0x1a7   : > { %v2458_v34 = vrot.slane %v2456_v61, 4  ;;  %v1254_v6 = vrot.slane %v1252_v62, 7  ;;  %v831_v44 = vadd.f32 %v7594_v9, %v795_v3  ;;  %6334 = vmatmul.msk.bf16.vlgmr.msrb.gmra.mxu0 %vm1951_vm13, %v7767_v22  ;;  %v2457_v47 = vsel %vm7313_vm12, %v6327_v56, %v2456_v61  ;;  %v2257_v22 = vpop.f32.mrf.mxu2  ;;  %v7846_v62 = vld [vmem:[%s9013_s3] ss:$0 sm:$0xff] }
 0x1a8   : > { %v2031_v48 = vpop.f32.mrf.mxu1  ;;  %v1834_v12 = vrot.slane %v1832_v24, 5  ;;  %v1838_v1 = vrot.slane %v1836_v28, 4  ;;  %v2504_v21 = vunpack.c.l.b16 %v2457_v47  ;;  %v1830_v36 = vrot.slane %v1829_v0, 4  ;;  %v1443_v0 = vld [vmem:[#allocation2 + $0xb4] sm:$0xf] }
 0x1a9   : > { %v2611_v33 = vpop.f32.mrf.mxu3  ;;  %v2460_v2 = vsel %vm7313_vm12, %v2458_v34, %v2459_v55  ;;  %v1257_v16 = vor.u32 %v1255_v63, %v1254_v6  ;;  %v1259_v9 = vrot.slane %v1254_v6, 4  ;;  %v863_v17 = vmax.f32 %v831_v44, 0.0 }
 0x1aa   : > { %v2255_v8 = vadd.f32 %v2254_v29, %v2031_v48  ;;  %v2505_v25 = vunpack.c.l.b16 %v2460_v2  ;;  %v1839_v26 = vor.u32 %v1838_v1, %v1834_v12  ;;  %v1844_v18 = vrot.slane %v1842_v7, 5 }
 0x1ab   : > { %v1258_v37 = vsel %vm7290_vm9, %v1250_v57, %v1257_v16  ;;  %v1441_v5 = vsel %vm7240_vm3, %v1259_v9, %v1440_v23  ;;  %v895_v35 = vpack.c.bf16 %v863_v17, %v863_v17  ;;  %v1485_v42 = vld [vmem:[#allocation2 + $0xa8] sm:$0xf]  ;;  %v3043_v29 = vshll.u32 %v7797_v31, 16 }
 0x1ac   : > { %v7824_v40 = vadd.f32 %v2611_v33, %v2255_v8  ;;  %1439 = vst.msk [vmem:[#allocation2 + $0xac] sm:$0xf] %vm899_vm6, %v1258_v37  ;;  %v755_v59 = vpop.f32.mrf.mxu0  ;;  %v2523_v43 = vpack.c.b16 %v2505_v25, %v2504_v21  ;;  %v1840_v32 = vrot.slane %v1839_v26, 4  ;;  %v1835_v50 = vsel %vm7389_vm1, %v1830_v36, %v1834_v12  ;;  %v2326_v7 = vld [vmem:[#allocation2 + $0xa8] sm:$0xe] }
 0x1ad   : > { %1442 = vst [vmem:[#allocation2 + $0xb0] sm:$0x1] %v1441_v5  ;;  %v1261_v41 = vshrl.u32 %v895_v35, 16  ;;  %v796_v30 = vmul.f32 %v7831_v46, %v755_v59  ;;  %v1847_v54 = vshrl.u32 %v1485_v42, 16  ;;  %v1850_v56 = vshll.u32 %v1485_v42, 16  ;;  %v6730_v5 = vld [vmem:[#allocation6 + $0x30] sm:$0xff] }
 0x1ae   : > { %6347 = vmatmul.msk.bf16.gmra.mxu3 %vm1951_vm13, %v2523_v43  ;;  %v1845_v39 = vsel %vm7389_vm1, %v1840_v32, %v1844_v18  ;;  %v3049_v57 = vshll.u32 %v7826_v13, 16  ;;  %v3053_v4 = vshrl.u32 %v7826_v13, 16  ;;  %v1264_v61 = vshll.u32 %v895_v35, 16  ;;  %4228 = vmatpush.bf16.msra.mxu0 %v6730_v5 }
 0x1af   : > { %v7841_v60 = vrot.slane %v1261_v41, 7  ;;  %v832_v63 = vadd.f32 %v7846_v62, %v796_v30  ;;  %v1924_v3 = vunpack.c.l.b16 %v1845_v39  ;;  %v1923_v55 = vunpack.c.l.b16 %v1835_v50  ;;  %v2259_v47 = vpop.f32.mrf.mxu2  ;;  %v1447_v30 = vld [vmem:[#allocation2 + $0xbc] sm:$0x1] }
 0x1b0   : > { %v2034_v49 = vpop.f32.mrf.mxu1  ;;  %v1849_v24 = vrot.slane %v1847_v54, 4  ;;  %v1852_v23 = vrot.slane %v1850_v56, 5  ;;  %v7852_v33 = vrot.slane %v3040_v51, 4  ;;  %v7854_v2 = vrot.slane %v3043_v29, 5 }
 0x1b1   : > { %v2614_v34 = vpop.f32.mrf.mxu3  ;;  %v1266_v28 = vor.u32 %v1264_v61, %v7841_v60  ;;  %v864_v6 = vmax.f32 %v832_v63, 0.0  ;;  %v2258_v44 = vadd.f32 %v2257_v22, %v2034_v49  ;;  %v1942_v48 = vpack.c.b16 %v1924_v3, %v1923_v55 }
 0x1b2   : > { %v7856_v12 = vrot.slane %v3049_v57, 5  ;;  %v7862_v8 = vrot.slane %v3053_v4, 4  ;;  %v6328_v31 = vrot.slane %v2326_v7, 9  ;;  %v1267_v25 = vrot.slane %v7841_v60, 4 }
 0x1b3   : > { %v1444_v1 = vsel %vm7277_vm7, %v1266_v28, %v1443_v0  ;;  %v896_v20 = vpack.c.bf16 %v864_v6, %v864_v6  ;;  %v7860_v16 = vadd.f32 %v2614_v34, %v2258_v44  ;;  %v6690_v9 = vld [vmem:[#allocation2 + $0xa8] sm:$0xff]  ;;  %v1853_v37 = vor.u32 %v1852_v23, %v1849_v24 }
 0x1b4   : > { %v1486_v17 = vld [vmem:[#allocation2 + $0xac] sm:$0xf]  ;;  %1445 = vst [vmem:[#allocation2 + $0xb4] sm:$0xf] %v1444_v1  ;;  %v758_v22 = vpop.f32.mrf.mxu0  ;;  %v1505_v21 = vld [vmem:[#allocation2 + $0xb0] sm:$0x1]  ;;  %6227 = vmatmul.msk.bf16.gmra.mxu1 %vm1951_vm13, %v1942_v48  ;;  %6312 = vmatmul.msk.bf16.gmra.mxu2 %vm1951_vm13, %v6690_v9 }
 0x1b5   : > { %v2463_v51 = vrot.slane %v1486_v17, 5  ;;  %v1269_v36 = vshrl.u32 %v896_v20, 16  ;;  %v797_v26 = vmul.f32 %v7831_v46, %v758_v22  ;;  %v2466_v42 = vrot.slane %v1505_v21, 5 }
 0x1b6   : > { %v1856_v59 = vshll.u32 %v1486_v17, 16  ;;  %v1860_v43 = vshrl.u32 %v1486_v17, 16  ;;  %v1272_v18 = vshll.u32 %v896_v20, 16  ;;  %v1866_v4 = vshll.u32 %v1505_v21, 16 }
 0x1b7   : > { %v2465_v35 = vrot.slane %v2463_v51, 4  ;;  %v1271_v32 = vrot.slane %v1269_v36, 7  ;;  %v833_v29 = vadd.f32 %v7846_v62, %v797_v26  ;;  %6335 = vmatmul.msk.bf16.gmra.mxu0 %vm1951_vm13, %v7337_v58  ;;  %v2464_v41 = vsel %vm7313_vm12, %v6328_v31, %v2463_v51  ;;  %v2262_v0 = vpop.f32.mrf.mxu2  ;;  %v6732_v36 = vld [vmem:[#allocation6 + $0x40] sm:$0xff] }
 0x1b8   : > { %v2036_v50 = vpop.f32.mrf.mxu1  ;;  %v1858_v56 = vrot.slane %v1856_v59, 5  ;;  %v1862_v57 = vrot.slane %v1860_v43, 4  ;;  %v2506_v49 = vunpack.c.l.b16 %v2464_v41  ;;  %v1854_v34 = vrot.slane %v1853_v37, 4  ;;  %5288 = vmatpush.bf16.msra.mxu2 %v6732_v36 }
 0x1b9   : > { %v2616_v54 = vpop.f32.mrf.mxu3  ;;  %v2467_v39 = vsel %vm7313_vm12, %v2465_v35, %v2466_v42  ;;  %v1274_v60 = vor.u32 %v1272_v18, %v1271_v32  ;;  %v1276_v61 = vrot.slane %v1271_v32, 4  ;;  %v865_v63 = vmax.f32 %v833_v29, 0.0  ;;  %v7893_v35 = vld [vmem:[#allocation2 + $0x14] sm:$0x1]  ;;  %v1450_v42 = vld [vmem:[#allocation2 + $0xc0] sm:$0xf] }
 0x1ba   : > { %v2260_v3 = vadd.f32 %v2259_v47, %v2036_v50  ;;  %v2507_v58 = vunpack.c.l.b16 %v2467_v39  ;;  %v1863_v55 = vor.u32 %v1862_v57, %v1858_v56  ;;  %v1859_v47 = vsel %vm7389_vm1, %v1854_v34, %v1858_v56 }
 0x1bb   : > { %v1275_v24 = vsel %vm7290_vm9, %v1267_v25, %v1274_v60  ;;  %v1448_v28 = vsel %vm7240_vm3, %v1276_v61, %v1447_v30  ;;  %v897_v6 = vpack.c.bf16 %v865_v63, %v865_v63  ;;  %v1487_v7 = vld [vmem:[#allocation2 + $0xb4] sm:$0xf]  ;;  %v1868_v20 = vrot.slane %v1866_v4, 5 }
 0x1bc   : > { %v7879_v44 = vadd.f32 %v2616_v54, %v2260_v3  ;;  %1446 = vst.msk [vmem:[#allocation2 + $0xb8] sm:$0xf] %vm899_vm6, %v1275_v24  ;;  %v760_v23 = vpop.f32.mrf.mxu0  ;;  %v2524_v48 = vpack.c.b16 %v2507_v58, %v2506_v49  ;;  %v1864_v1 = vrot.slane %v1863_v55, 4  ;;  %v1871_v21 = vshrl.u32 %v1487_v7, 16  ;;  %v2327_v30 = vld [vmem:[#allocation2 + $0xb4] sm:$0xe] }
 0x1bd   : > { %1449 = vst [vmem:[#allocation2 + $0xbc] sm:$0x1] %v1448_v28  ;;  %v1278_v9 = vshrl.u32 %v897_v6, 16  ;;  %v1281_v17 = vshll.u32 %v897_v6, 16  ;;  %v798_v22 = vmul.f32 %v7831_v46, %v760_v23  ;;  %v1874_v51 = vshll.u32 %v1487_v7, 16  ;;  %v6731_v28 = vld [vmem:[#allocation6 + $0x38] sm:$0xff] }
 0x1be   : > { %6348 = vmatmul.msk.bf16.gmra.mxu3 %vm1951_vm13, %v2524_v48  ;;  %v1869_v31 = vsel %vm7389_vm1, %v1864_v1, %v1868_v20  ;;  %v3046_v25 = vor.u32 %v7854_v2, %v7852_v33  ;;  %v3056_v46 = vor.u32 %v7862_v8, %v7856_v12  ;;  %v1925_v32 = vunpack.c.l.b16 %v1859_v47  ;;  %4886 = vmatpush.bf16.msra.mxu1 %v6731_v28 }
 0x1bf   : > { %v7890_v26 = vrot.slane %v1278_v9, 7  ;;  %v834_v37 = vadd.f32 %v7846_v62, %v798_v22  ;;  %v1926_v5 = vunpack.c.l.b16 %v1869_v31  ;;  %v1873_v18 = vrot.slane %v1871_v21, 4  ;;  %v2264_v41 = vpop.f32.mrf.mxu2  ;;  %v1454_v22 = vld [vmem:[#allocation2 + $0xc8] sm:$0x1] }
 0x1c0   : > { %v2039_v59 = vpop.f32.mrf.mxu1  ;;  %v1876_v50 = vrot.slane %v1874_v51, 5  ;;  %v7898_v54 = vrot.slane %v3046_v25, 4  ;;  %v3059_v39 = vshll.u32 %v7893_v35, 16  ;;  %v3715_v8 = vrot.slane %v7826_v13, 5 }
 0x1c1   : > { %v2619_v43 = vpop.f32.mrf.mxu3  ;;  %v1283_v29 = vor.u32 %v1281_v17, %v7890_v26  ;;  %v866_v33 = vmax.f32 %v834_v37, 0.0  ;;  %v2263_v2 = vadd.f32 %v2262_v0, %v2039_v59  ;;  %v1943_v62 = vpack.c.b16 %v1926_v5, %v1925_v32  ;;  %v7915_v17 = vld [vmem:[#allocation2 + $0x1c] sm:$0xf] }
 0x1c2   : > { %v3057_v63 = vrot.slane %v3056_v46, 4  ;;  %v6329_v49 = vrot.slane %v2327_v30, 9  ;;  %v1877_v38 = vor.u32 %v1876_v50, %v1873_v18  ;;  %v1284_v47 = vrot.slane %v7890_v26, 4  ;;  %v2994_v50 = vld [vmem:[#allocation2 + $0x18] sm:$0xf] }
 0x1c3   : > { %v1451_v56 = vsel %vm7277_vm7, %v1283_v29, %v1450_v42  ;;  %v898_v57 = vpack.c.bf16 %v866_v33, %v866_v33  ;;  %v7904_v4 = vadd.f32 %v2619_v43, %v2263_v2  ;;  %v6691_v60 = vld [vmem:[#allocation2 + $0xb4] sm:$0xff]  ;;  %v3061_v9 = vrot.slane %v3059_v39, 5 }
 0x1c4   : > { %v1488_v61 = vld [vmem:[#allocation2 + $0xb8] sm:$0xf]  ;;  %1452 = vst [vmem:[#allocation2 + $0xc0] sm:$0xf] %v1451_v56  ;;  %v7906_v3 = vpop.f32.mrf.mxu0  ;;  %v1506_v0 = vld [vmem:[#allocation2 + $0xbc] sm:$0x1]  ;;  %6228 = vmatmul.msk.bf16.gmra.mxu1 %vm1951_vm13, %v1943_v62  ;;  %6313 = vmatmul.msk.bf16.gmra.mxu2 %vm1951_vm13, %v6691_v60  ;;  %v3052_v60 = vsel %vm7389_vm1, %v7898_v54, %v7856_v12 }
 0x1c5   : > { %v2470_v58 = vrot.slane %v1488_v61, 5  ;;  %v1286_v34 = vshrl.u32 %v898_v57, 16  ;;  %v1289_v55 = vshll.u32 %v898_v57, 16  ;;  %v1880_v24 = vshll.u32 %v1488_v61, 16  ;;  %v2996_v54 = vld [vmem:[#allocation2 + $0x20] sm:$0x1] }
 0x1c6   : > { %v2473_v23 = vrot.slane %v1506_v0, 5  ;;  %v1884_v48 = vshrl.u32 %v1488_v61, 16  ;;  %v1890_v37 = vshll.u32 %v1506_v0, 16  ;;  %v3062_v32 = vsel %vm7389_vm1, %v3057_v63, %v3061_v9 }
 0x1c7   : > { %v2471_v6 = vsel %vm7313_vm12, %v6329_v49, %v2470_v58  ;;  %v2472_v7 = vrot.slane %v2470_v58, 4  ;;  %v1288_v1 = vrot.slane %v1286_v34, 7  ;;  %6336 = vmatmul.msk.bf16.gmra.mxu0 %vm1951_vm13, %v7367_v52  ;;  %v1882_v20 = vrot.slane %v1880_v24, 5  ;;  %v2267_v42 = vpop.f32.mrf.mxu2 }
 0x1c8   : > { %v2041_v21 = vpop.f32.mrf.mxu1  ;;  %v2508_v25 = vunpack.c.l.b16 %v2471_v6  ;;  %v1886_v36 = vrot.slane %v1884_v48, 4  ;;  %v1878_v52 = vrot.slane %v1877_v38, 4  ;;  %v3073_v18 = vshll.u32 %v7915_v17, 16 }
 0x1c9   : > { %v2621_v31 = vpop.f32.mrf.mxu3  ;;  %v2474_v51 = vsel %vm7313_vm12, %v2472_v7, %v2473_v23  ;;  %v1291_v5 = vor.u32 %v1289_v55, %v1288_v1  ;;  %v1293_v26 = vrot.slane %v1288_v1, 4  ;;  %v2265_v46 = vadd.f32 %v2264_v41, %v2041_v21  ;;  %v3649_v23 = vld [vmem:[#allocation2 + $0xc] sm:$0xe] }
 0x1ca   : > { %v2509_v59 = vunpack.c.l.b16 %v2474_v51  ;;  %v1887_v43 = vor.u32 %v1886_v36, %v1882_v20  ;;  %v1883_v62 = vsel %vm7389_vm1, %v1878_v52, %v1882_v20  ;;  %v1892_v56 = vrot.slane %v1890_v37, 5  ;;  %v6714_v36 = vld [vmem:[#allocation2 + $0x18] sm:$0xff] }
 0x1cb   : > { %v1292_v29 = vsel %vm7290_vm9, %v1284_v47, %v1291_v5  ;;  %v1455_v33 = vsel %vm7240_vm3, %v1293_v26, %v1454_v22  ;;  %v7926_v2 = vadd.f32 %v2621_v31, %v2265_v46  ;;  %v3077_v57 = vshrl.u32 %v7915_v17, 16 }
 0x1cc   : > { %v2525_v30 = vpack.c.b16 %v2509_v59, %v2508_v25  ;;  %1453 = vst.msk [vmem:[#allocation2 + $0xc4] sm:$0xf] %vm899_vm6, %v1292_v29  ;;  %v7929_v41 = vpop.f32.mrf.mxu0  ;;  %v1888_v39 = vrot.slane %v1887_v43, 4  ;;  %v3427_v61 = vunpack.c.l.b16 %v3062_v32  ;;  %v1927_v63 = vunpack.c.l.b16 %v1883_v62  ;;  %v7957_v43 = vld [vmem:[#allocation2 + $0x28] sm:$0xf] }
 0x1cd   : > { %1456 = vst [vmem:[#allocation2 + $0xc8] sm:$0x1] %v1455_v33  ;;  %v3064_v49 = vshrl.u32 %v2994_v50, 16  ;;  %v3067_v58 = vshll.u32 %v2994_v50, 16  ;;  %v3717_v55 = vrot.slane %v3715_v8, 4  ;;  %v3075_v38 = vrot.slane %v3073_v18, 5 }
 0x1ce   : > { %6349 = vmatmul.msk.bf16.gmra.mxu3 %vm1951_vm13, %v2525_v30  ;;  %v1893_v53 = vsel %vm7389_vm1, %v1888_v39, %v1892_v56  ;;  %v3079_v24 = vrot.slane %v3077_v57, 4  ;;  %v3426_v7 = vunpack.c.l.b16 %v3052_v60  ;;  %v3718_v47 = vrot.slane %v7893_v35, 5  ;;  %v2997_v62 = vld [vmem:[#allocation2 + $0x24] sm:$0xf] }
 0x1cf   : > { %v1928_v0 = vunpack.c.l.b16 %v1893_v53  ;;  %v2269_v6 = vpop.f32.mrf.mxu2  ;;  %v3066_v20 = vrot.slane %v3064_v49, 4  ;;  %v3069_v9 = vrot.slane %v3067_v58, 5  ;;  %v6454_v21 = vrot.slane %v3649_v23, 9  ;;  %v6695_v23 = vld [vmem:[#allocation2 + $0xc] sm:$0xff] }
 0x1d0   : > { %v3458_v12 = vpack.c.b16 %v3427_v61, %v3426_v7  ;;  %v3719_v31 = vsel %vm7313_vm12, %v3717_v55, %v3718_v47  ;;  %v3080_v51 = vor.u32 %v3079_v24, %v3075_v38  ;;  %v3083_v37 = vshll.u32 %v2996_v54, 16  ;;  %v3650_v24 = vld [vmem:[#allocation2 + $0x18] sm:$0xe]  ;;  %v2999_v47 = vld [vmem:[#allocation2 + $0x2c] sm:$0x1] }
 0x1d1   : > { %v2624_v34 = vpop.f32.mrf.mxu3  ;;  %v1944_v28 = vpack.c.b16 %v1928_v0, %v1927_v63  ;;  %v2044_v48 = vpop.f32.mrf.mxu1  ;;  %v3716_v35 = vsel %vm7313_vm12, %v6454_v21, %v3715_v8  ;;  %v3829_v5 = vunpack.c.l.b16 %v3719_v31  ;;  %v3070_v26 = vor.u32 %v3069_v9, %v3066_v20 }
 0x1d2   : > { %v2268_v1 = vadd.f32 %v2267_v42, %v2044_v48  ;;  %v3081_v42 = vrot.slane %v3080_v51, 4  ;;  %v3828_v52 = vunpack.c.l.b16 %v3716_v35  ;;  %v3085_v18 = vrot.slane %v3083_v37, 5 }
 0x1d3   : > { %v3071_v30 = vrot.slane %v3070_v26, 4  ;;  %v3722_v50 = vrot.slane %v7915_v17, 5  ;;  %v3097_v39 = vshll.u32 %v7957_v43, 16  ;;  %v3101_v56 = vshrl.u32 %v7957_v43, 16 }
 0x1d4   : > { %v7944_v22 = vpop.f32.mrf.mxu0  ;;  %v7948_v25 = vadd.f32 %v2624_v34, %v2268_v1  ;;  %6229 = vmatmul.msk.bf16.gmra.mxu1 %vm1951_vm13, %v1944_v28  ;;  %6438 = vmatmul.msk.bf16.vlgmr.msrb.gmra.mxu2 %vm1951_vm13, %v3458_v12  ;;  %v3860_v33 = vpack.c.b16 %v3829_v5, %v3828_v52  ;;  %v3086_v8 = vsel %vm7389_vm1, %v3081_v42, %v3085_v18  ;;  %v3088_v61 = vshrl.u32 %v2997_v62, 16 }
 0x1d5   : > { %v3076_v53 = vsel %vm7389_vm1, %v3071_v30, %v3075_v38  ;;  %v3429_v60 = vunpack.c.l.b16 %v3086_v8  ;;  %v3091_v63 = vshll.u32 %v2997_v62, 16  ;;  %v3724_v49 = vrot.slane %v3722_v50, 4  ;;  %v3000_v62 = vld [vmem:[#allocation2 + $0x30] sm:$0xf] }
 0x1d6   : > { %v3099_v58 = vrot.slane %v3097_v39, 5  ;;  %v3103_v34 = vrot.slane %v3101_v56, 4  ;;  %v3428_v55 = vunpack.c.l.b16 %v3076_v53  ;;  %v3090_v1 = vrot.slane %v3088_v61, 4 }
 0x1d7   : > { %6558 = vmatmul.msk.bf16.vlgmr.msra.gmra.mxu0 %vm1951_vm13, %v6714_v36  ;;  %v2272_v59 = vpop.f32.mrf.mxu2  ;;  %v3093_v12 = vrot.slane %v3091_v63, 5  ;;  %v6455_v38 = vrot.slane %v3650_v24, 9  ;;  %v3107_v36 = vshll.u32 %v2999_v47, 16  ;;  %v3112_v63 = vshrl.u32 %v3000_v62, 16 }
 0x1d8   : > { %v3459_v48 = vpack.c.b16 %v3429_v60, %v3428_v55  ;;  %v3104_v21 = vor.u32 %v3103_v34, %v3099_v58 }
 0x1d9   : > { %v2626_v46 = vpop.f32.mrf.mxu3  ;;  %v2046_v32 = vpop.f32.mrf.mxu1  ;;  %v3723_v51 = vsel %vm7313_vm12, %v6455_v38, %v3722_v50  ;;  %v3094_v37 = vor.u32 %v3093_v12, %v3090_v1  ;;  %v3729_v50 = vrot.slane %v7957_v43, 5  ;;  %v3002_v12 = vld [vmem:[#allocation2 + $0x38] sm:$0x1]  ;;  %v3114_v38 = vrot.slane %v3112_v63, 4 }
 0x1da   : > { %v2270_v29 = vadd.f32 %v2269_v6, %v2046_v32  ;;  %v3725_v6 = vrot.slane %v2996_v54, 5  ;;  %v6715_v54 = vld [vmem:[#allocation2 + $0x24] sm:$0xff]  ;;  %v3105_v26 = vrot.slane %v3104_v21, 4  ;;  %v3830_v42 = vunpack.c.l.b16 %v3723_v51 }
 0x1db   : > { %v3109_v32 = vrot.slane %v3107_v36, 5  ;;  %v3731_v34 = vrot.slane %v3729_v50, 4 }
 0x1dc   : > { %v7959_v13 = vpop.f32.mrf.mxu0  ;;  %v7966_v57 = vadd.f32 %v2626_v46, %v2270_v29  ;;  %v3726_v9 = vsel %vm7313_vm12, %v3724_v49, %v3725_v6 }
 0x1dd   : > { %v3831_v35 = vunpack.c.l.b16 %v3726_v9  ;;  %v3110_v8 = vsel %vm7389_vm1, %v3105_v26, %v3109_v32 }
 0x1de   : > { %6474 = vmatmul.msk.bf16.vlgmr.msrb.gmra.mxu3 %vm1951_vm13, %v3860_v33  ;;  %v3095_v33 = vrot.slane %v3094_v37, 4  ;;  %v3431_v61 = vunpack.c.l.b16 %v3110_v8 }
 0x1df   : > { %v2274_v17 = vpop.f32.mrf.mxu2  ;;  %v3861_v29 = vpack.c.b16 %v3831_v35, %v3830_v42 }
 0x1e0   : > { %v3100_v60 = vsel %vm7389_vm1, %v3095_v33, %v3099_v58 }
 0x1e1   : > { %v2629_v0 = vpop.f32.mrf.mxu3  ;;  %v2049_v28 = vpop.f32.mrf.mxu1  ;;  %v3430_v24 = vunpack.c.l.b16 %v3100_v60 }
 0x1e2   : > { %v2273_v7 = vadd.f32 %v2272_v59, %v2049_v28  ;;  %v7982_v59 = vld [vmem:[#allocation2 + $0x34] sm:$0xf]  ;;  %v3651_v28 = vld [vmem:[#allocation2 + $0x24] sm:$0xe] }
 0x1e3   : > { %v3121_v39 = vshll.u32 %v7982_v59, 16  ;;  %v3125_v56 = vshrl.u32 %v7982_v59, 16  ;;  %v3460_v1 = vpack.c.b16 %v3431_v61, %v3430_v24  ;;  %v6456_v58 = vrot.slane %v3651_v28, 9  ;;  %v3003_v61 = vld [vmem:[#allocation2 + $0x3c] sm:$0xf] }
 0x1e4   : > { %v7971_v20 = vpop.f32.mrf.mxu0  ;;  %v7975_v31 = vadd.f32 %v2629_v0, %v2273_v7  ;;  %6418 = vmatmul.msk.bf16.vlgmr.msrb.gmra.mxu1 %vm1951_vm13, %v6695_v23  ;;  %6439 = vmatmul.msk.bf16.gmra.mxu2 %vm1951_vm13, %v3459_v48  ;;  %v3115_v0 = vshll.u32 %v3000_v62, 16  ;;  %v3732_v7 = vrot.slane %v2999_v47, 5  ;;  %v6696_v48 = vld [vmem:[#allocation2 + $0x18] sm:$0xff]  ;;  %v6716_v47 = vld [vmem:[#allocation2 + $0x30] sm:$0xff]  ;;  %v3736_v60 = vrot.slane %v7982_v59, 5 }
 0x1e5   : > { %v3127_v55 = vrot.slane %v3125_v56, 4  ;;  %v3730_v37 = vsel %vm7313_vm12, %v6456_v58, %v3729_v50  ;;  %v3136_v24 = vshrl.u32 %v3003_v61, 16  ;;  %v3139_v28 = vshll.u32 %v3003_v61, 16 }
 0x1e6   : > { %v3117_v9 = vrot.slane %v3115_v0, 5  ;;  %v3738_v59 = vrot.slane %v3736_v60, 4 }
 0x1e7   : > { %6559 = vmatmul.msk.bf16.gmra.mxu0 %vm1951_vm13, %v6715_v54  ;;  %v2277_v46 = vpop.f32.mrf.mxu2  ;;  %v3733_v54 = vsel %vm7313_vm12, %v3731_v34, %v3732_v7 }
 0x1e8   : > { %v3833_v26 = vunpack.c.l.b16 %v3733_v54 }
 0x1e9   : > { %v2631_v5 = vpop.f32.mrf.mxu3  ;;  %v2051_v52 = vpop.f32.mrf.mxu1 }
 0x1ea   : > { %v2275_v18 = vadd.f32 %v2274_v17, %v2051_v52  ;;  %v3123_v17 = vrot.slane %v3121_v39, 5 }
 0x1ec   : > { %v7984_v30 = vpop.f32.mrf.mxu0  ;;  %v7991_v53 = vadd.f32 %v2631_v5, %v2275_v18  ;;  %v3128_v51 = vor.u32 %v3127_v55, %v3123_v17  ;;  %v3131_v5 = vshll.u32 %v3002_v12, 16  ;;  %v3832_v18 = vunpack.c.l.b16 %v3730_v37 }
 0x1ed   : > { %v3141_v37 = vrot.slane %v3139_v28, 5  ;;  %v3006_v28 = vld [vmem:[#allocation2 + $0x48] sm:$0xf] }
 0x1ee   : > { %6475 = vmatmul.msk.bf16.gmra.mxu3 %vm1951_vm13, %v3861_v29  ;;  %v3129_v52 = vrot.slane %v3128_v51, 4  ;;  %v8008_v29 = vld [vmem:[#allocation2 + $0x40] sm:$0xf]  ;;  %v3862_v62 = vpack.c.b16 %v3833_v26, %v3832_v18  ;;  %v3005_v51 = vld [vmem:[#allocation2 + $0x44] sm:$0x1] }
 0x1ef   : > { %v2279_v43 = vpop.f32.mrf.mxu2  ;;  %v3145_v63 = vshll.u32 %v8008_v29, 16  ;;  %v3149_v0 = vshrl.u32 %v8008_v29, 16  ;;  %v3155_v18 = vshll.u32 %v3005_v51, 16 }
 0x1f1   : > { %v2634_v49 = vpop.f32.mrf.mxu3  ;;  %v2054_v6 = vpop.f32.mrf.mxu1  ;;  %v3147_v7 = vrot.slane %v3145_v63, 5 }
 0x1f2   : > { %v2278_v23 = vadd.f32 %v2277_v46, %v2054_v6  ;;  %v3118_v46 = vor.u32 %v3117_v9, %v3114_v38  ;;  %v3652_v38 = vld [vmem:[#allocation2 + $0x30] sm:$0xe] }
 0x1f4   : > { %v2232_v21 = vpop.f32.mrf.mxu0  ;;  %v7998_v36 = vadd.f32 %v2634_v49, %v2278_v23  ;;  %6419 = vmatmul.msk.bf16.gmra.mxu1 %vm1951_vm13, %v6696_v48  ;;  %6440 = vmatmul.msk.bf16.gmra.mxu2 %vm1951_vm13, %v3460_v1  ;;  %v3119_v39 = vrot.slane %v3118_v46, 4  ;;  %v3151_v23 = vrot.slane %v3149_v0, 4 }
 0x1f5   : > { %v8002_v35 = vadd.f32 %v2232_v21, %v7906_v3  ;;  %v3133_v3 = vrot.slane %v3131_v5, 5  ;;  %v3739_v21 = vrot.slane %v3002_v12, 5  ;;  %v6717_v12 = vld [vmem:[#allocation2 + $0x3c] sm:$0xff] }
 0x1f6   : > { %v3124_v55 = vsel %vm7389_vm1, %v3119_v39, %v3123_v17  ;;  %v6457_v17 = vrot.slane %v3652_v38, 9  ;;  %v3152_v46 = vor.u32 %v3151_v23, %v3147_v7 }
 0x1f7   : > { %6560 = vmatmul.msk.bf16.gmra.mxu0 %vm1951_vm13, %v6716_v47  ;;  %v2282_v32 = vpop.f32.mrf.mxu2  ;;  %v3134_v50 = vsel %vm7389_vm1, %v3129_v52, %v3133_v3  ;;  %v3432_v1 = vunpack.c.l.b16 %v3124_v55  ;;  %v3138_v47 = vrot.slane %v3136_v24, 4  ;;  %v3740_v26 = vsel %vm7313_vm12, %v3738_v59, %v3739_v21 }
 0x1f8   : > { %v3743_v24 = vrot.slane %v8008_v29, 5 }
 0x1f9   : > { %v2636_v42 = vpop.f32.mrf.mxu3  ;;  %v2056_v33 = vpop.f32.mrf.mxu1  ;;  %v3142_v3 = vor.u32 %v3141_v37, %v3138_v47 }
 0x1fa   : > { %v2280_v8 = vadd.f32 %v2279_v43, %v2056_v33  ;;  %v3433_v43 = vunpack.c.l.b16 %v3134_v50  ;;  %v3835_v33 = vunpack.c.l.b16 %v3740_v26  ;;  %v8035_v50 = vld [vmem:[#allocation2 + $0x4c] sm:$0xf]  ;;  %v3745_v29 = vrot.slane %v3743_v24, 4 }
 0x1fb   : > { %v3143_v55 = vrot.slane %v3142_v3, 4  ;;  %v3173_v59 = vshrl.u32 %v8035_v50, 16  ;;  %v3746_v26 = vrot.slane %v3005_v51, 5  ;;  %v6718_v51 = vld [vmem:[#allocation2 + $0x48] sm:$0xff] }
 0x1fc   : > { %v2234_v56 = vpop.f32.mrf.mxu0  ;;  %v8015_v49 = vadd.f32 %v2636_v42, %v2280_v8  ;;  %v3461_v54 = vpack.c.b16 %v3433_v43, %v3432_v1 }
 0x1fd   : > { %v8018_v34 = vadd.f32 %v2234_v56, %v7929_v41  ;;  %v6697_v41 = vld [vmem:[#allocation2 + $0x24] sm:$0xff]  ;;  %v3175_v47 = vrot.slane %v3173_v59, 4 }
 0x1fe   : > { %6476 = vmatmul.msk.bf16.gmra.mxu3 %vm1951_vm13, %v3862_v62  ;;  %v3153_v62 = vrot.slane %v3152_v46, 4 }
 0x1ff   : > { %v2284_v48 = vpop.f32.mrf.mxu2 }
 0x201   : > { %v2639_v6 = vpop.f32.mrf.mxu3  ;;  %v2059_v9 = vpop.f32.mrf.mxu1 }
 0x202   : > { %v2283_v58 = vadd.f32 %v2282_v32, %v2059_v9  ;;  %v3737_v32 = vsel %vm7313_vm12, %v6457_v17, %v3736_v60  ;;  %v3160_v9 = vshrl.u32 %v3006_v28, 16 }
 0x203   : > { %v3834_v56 = vunpack.c.l.b16 %v3737_v32 }
 0x204   : > { %v2237_v5 = vpop.f32.mrf.mxu0  ;;  %v8025_v42 = vadd.f32 %v2639_v6, %v2283_v58  ;;  %6420 = vmatmul.msk.bf16.gmra.mxu1 %vm1951_vm13, %v6697_v41  ;;  %6441 = vmatmul.msk.bf16.gmra.mxu2 %vm1951_vm13, %v3461_v54  ;;  %v3169_v6 = vshll.u32 %v8035_v50, 16  ;;  %v3653_v58 = vld [vmem:[#allocation2 + $0x3c] sm:$0xe]  ;;  %v3163_v41 = vshll.u32 %v3006_v28, 16  ;;  %v3162_v3 = vrot.slane %v3160_v9, 4 }
 0x205   : > { %v8029_v52 = vadd.f32 %v2237_v5, %v7944_v22  ;;  %v3157_v22 = vrot.slane %v3155_v18, 5  ;;  %v3863_v0 = vpack.c.b16 %v3835_v33, %v3834_v56  ;;  %v6458_v32 = vrot.slane %v3653_v58, 9  ;;  %v3008_v18 = vld [vmem:[#allocation2 + $0x50] sm:$0x1] }
 0x206   : > { %v3171_v54 = vrot.slane %v3169_v6, 5  ;;  %v8062_v6 = vld [vmem:[#allocation2 + $0x58] sm:$0xf]  ;;  %v3750_v9 = vrot.slane %v8035_v50, 5 }
 0x207   : > { %6561 = vmatmul.msk.bf16.gmra.mxu0 %vm1951_vm13, %v6717_v12  ;;  %v2287_v39 = vpop.f32.mrf.mxu2  ;;  %v3158_v60 = vsel %vm7389_vm1, %v3153_v62, %v3157_v22  ;;  %v3179_v22 = vshll.u32 %v3008_v18, 16 }
 0x208   : > { %v3435_v38 = vunpack.c.l.b16 %v3158_v60  ;;  %v3176_v62 = vor.u32 %v3175_v47, %v3171_v54  ;;  %v3197_v47 = vshrl.u32 %v8062_v6, 16 }
 0x209   : > { %v2641_v8 = vpop.f32.mrf.mxu3  ;;  %v2061_v61 = vpop.f32.mrf.mxu1 }
 0x20a   : > { %v2285_v63 = vadd.f32 %v2284_v48, %v2061_v61  ;;  %v3148_v48 = vsel %vm7389_vm1, %v3143_v55, %v3147_v7  ;;  %v3747_v7 = vsel %vm7313_vm12, %v3745_v29, %v3746_v26  ;;  %v3009_v29 = vld [vmem:[#allocation2 + $0x54] sm:$0xf] }
 0x20b   : > { %v3434_v5 = vunpack.c.l.b16 %v3148_v48  ;;  %v3184_v26 = vshrl.u32 %v3009_v29, 16 }
 0x20c   : > { %v2239_v43 = vpop.f32.mrf.mxu0  ;;  %v8042_v23 = vadd.f32 %v2641_v8, %v2285_v63  ;;  %v3165_v8 = vrot.slane %v3163_v41, 5  ;;  %v3837_v63 = vunpack.c.l.b16 %v3747_v7  ;;  %v3193_v41 = vshll.u32 %v8062_v6, 16 }
 0x20d   : > { %v8045_v1 = vadd.f32 %v2239_v43, %v7959_v13  ;;  %v6698_v13 = vld [vmem:[#allocation2 + $0x30] sm:$0xff]  ;;  %v3462_v12 = vpack.c.b16 %v3435_v38, %v3434_v5  ;;  %v3177_v43 = vrot.slane %v3176_v62, 4 }
 0x20e   : > { %6477 = vmatmul.msk.bf16.gmra.mxu3 %vm1951_vm13, %v3863_v0  ;;  %v3166_v55 = vor.u32 %v3165_v8, %v3162_v3 }
 0x20f   : > { %v2289_v37 = vpop.f32.mrf.mxu2 }
 0x210   : > { %v3167_v58 = vrot.slane %v3166_v55, 4 }
 0x211   : > { %v2644_v21 = vpop.f32.mrf.mxu3  ;;  %v2064_v17 = vpop.f32.mrf.mxu1 }
 0x212   : > { %v2288_v46 = vadd.f32 %v2287_v39, %v2064_v17  ;;  %v3744_v39 = vsel %vm7313_vm12, %v6458_v32, %v3743_v24  ;;  %v3172_v50 = vsel %vm7389_vm1, %v3167_v58, %v3171_v54  ;;  %v3195_v32 = vrot.slane %v3193_v41, 5 }
 0x213   : > { %v3836_v28 = vunpack.c.l.b16 %v3744_v39  ;;  %v3436_v8 = vunpack.c.l.b16 %v3172_v50  ;;  %v8089_v50 = vld [vmem:[#allocation2 + $0x64] sm:$0xf] }
 0x214   : > { %v2242_v33 = vpop.f32.mrf.mxu0  ;;  %v8052_v56 = vadd.f32 %v2644_v21, %v2288_v46  ;;  %6421 = vmatmul.msk.bf16.gmra.mxu1 %vm1951_vm13, %v6698_v13  ;;  %6442 = vmatmul.msk.bf16.gmra.mxu2 %vm1951_vm13, %v3462_v12  ;;  %v3654_v46 = vld [vmem:[#allocation2 + $0x48] sm:$0xe]  ;;  %v3752_v13 = vrot.slane %v3750_v9, 4  ;;  %v3187_v12 = vshll.u32 %v3009_v29, 16 }
 0x215   : > { %v8056_v61 = vadd.f32 %v2242_v33, %v7971_v20  ;;  %v3181_v20 = vrot.slane %v3179_v22, 5  ;;  %v3864_v38 = vpack.c.b16 %v3837_v63, %v3836_v28  ;;  %v3199_v33 = vrot.slane %v3197_v47, 4 }
 0x216   : > { %v6459_v63 = vrot.slane %v3654_v46, 9  ;;  %v3189_v28 = vrot.slane %v3187_v12, 5 }
 0x217   : > { %6562 = vmatmul.msk.bf16.gmra.mxu0 %vm1951_vm13, %v6718_v51  ;;  %v2292_v60 = vpop.f32.mrf.mxu2  ;;  %v3182_v24 = vsel %vm7389_vm1, %v3177_v43, %v3181_v20  ;;  %v3753_v51 = vrot.slane %v3008_v18, 5  ;;  %v3186_v43 = vrot.slane %v3184_v26, 4  ;;  %v6719_v18 = vld [vmem:[#allocation2 + $0x54] sm:$0xff] }
 0x219   : > { %v2646_v0 = vpop.f32.mrf.mxu3  ;;  %v2066_v59 = vpop.f32.mrf.mxu1  ;;  %v3754_v54 = vsel %vm7313_vm12, %v3752_v13, %v3753_v51  ;;  %v3190_v58 = vor.u32 %v3189_v28, %v3186_v43  ;;  %v3757_v13 = vrot.slane %v8062_v6, 5 }
 0x21a   : > { %v2290_v48 = vadd.f32 %v2289_v37, %v2066_v59  ;;  %v3437_v37 = vunpack.c.l.b16 %v3182_v24  ;;  %v3200_v59 = vor.u32 %v3199_v33, %v3195_v32 }
 0x21b   : > { %v3191_v33 = vrot.slane %v3190_v58, 4 }
 0x21c   : > { %v2244_v21 = vpop.f32.mrf.mxu0  ;;  %v8069_v5 = vadd.f32 %v2646_v0, %v2290_v48  ;;  %v3463_v22 = vpack.c.b16 %v3437_v37, %v3436_v8  ;;  %v3011_v0 = vld [vmem:[#allocation2 + $0x5c] sm:$0x1]  ;;  %v3201_v24 = vrot.slane %v3200_v59, 4  ;;  %v3221_v8 = vshrl.u32 %v8089_v50, 16 }
 0x21d   : > { %v8072_v17 = vadd.f32 %v2244_v21, %v7984_v30  ;;  %v6699_v30 = vld [vmem:[#allocation2 + $0x3c] sm:$0xff]  ;;  %v3839_v21 = vunpack.c.l.b16 %v3754_v54  ;;  %v3196_v6 = vsel %vm7389_vm1, %v3191_v33, %v3195_v32 }
 0x21e   : > { %6478 = vmatmul.msk.bf16.gmra.mxu3 %vm1951_vm13, %v3864_v38  ;;  %v3203_v38 = vshll.u32 %v3011_v0, 16  ;;  %v3223_v43 = vrot.slane %v3221_v8, 4 }
 0x21f   : > { %v2294_v3 = vpop.f32.mrf.mxu2 }
 0x221   : > { %v2649_v7 = vpop.f32.mrf.mxu3  ;;  %v2069_v62 = vpop.f32.mrf.mxu1 }
 0x222   : > { %v2293_v39 = vadd.f32 %v2292_v60, %v2069_v62  ;;  %v3751_v60 = vsel %vm7313_vm12, %v6459_v63, %v3750_v9 }
 0x223   : > { %v3838_v47 = vunpack.c.l.b16 %v3751_v60 }
 0x224   : > { %v2589_v55 = vpop.f32.mrf.mxu0  ;;  %v8079_v20 = vadd.f32 %v2649_v7, %v2293_v39  ;;  %6422 = vmatmul.msk.bf16.gmra.mxu1 %vm1951_vm13, %v6699_v30  ;;  %6443 = vmatmul.msk.bf16.gmra.mxu2 %vm1951_vm13, %v3463_v22  ;;  %v3217_v7 = vshll.u32 %v8089_v50, 16  ;;  %v3012_v39 = vld [vmem:[#allocation2 + $0x60] sm:$0xf]  ;;  %v3759_v30 = vrot.slane %v3757_v13, 4  ;;  %v3655_v22 = vld [vmem:[#allocation2 + $0x54] sm:$0xe] }
 0x225   : > { %v8083_v48 = vadd.f32 %v2589_v55, %v8002_v35  ;;  %v3205_v35 = vrot.slane %v3203_v38, 5  ;;  %v3865_v46 = vpack.c.b16 %v3839_v21, %v3838_v47  ;;  %v3208_v63 = vshrl.u32 %v3012_v39, 16  ;;  %v6700_v21 = vld [vmem:[#allocation2 + $0x48] sm:$0xff] }
 0x226   : > { %v3211_v55 = vshll.u32 %v3012_v39, 16  ;;  %v3219_v54 = vrot.slane %v3217_v7, 5  ;;  %v3760_v38 = vrot.slane %v3011_v0, 5  ;;  %v6720_v0 = vld [vmem:[#allocation2 + $0x60] sm:$0xff] }
 0x227   : > { %6563 = vmatmul.msk.bf16.gmra.mxu0 %vm1951_vm13, %v6719_v18  ;;  %v2297_v41 = vpop.f32.mrf.mxu2  ;;  %v3206_v9 = vsel %vm7389_vm1, %v3201_v24, %v3205_v35  ;;  %v3438_v18 = vunpack.c.l.b16 %v3196_v6  ;;  %v6460_v24 = vrot.slane %v3655_v22, 9 }
 0x228   : > { %v3761_v32 = vsel %vm7313_vm12, %v3759_v30, %v3760_v38  ;;  %v3213_v35 = vrot.slane %v3211_v55, 5  ;;  %v8116_v30 = vld [vmem:[#allocation2 + $0x70] sm:$0xf] }
 0x229   : > { %v2651_v29 = vpop.f32.mrf.mxu3  ;;  %v2071_v37 = vpop.f32.mrf.mxu1  ;;  %v3245_v38 = vshrl.u32 %v8116_v30, 16 }
 0x22a   : > { %v2295_v26 = vadd.f32 %v2294_v3, %v2071_v37  ;;  %v3439_v3 = vunpack.c.l.b16 %v3206_v9  ;;  %v3210_v37 = vrot.slane %v3208_v63, 4  ;;  %v3841_v9 = vunpack.c.l.b16 %v3761_v32 }
 0x22c   : > { %v2591_v12 = vpop.f32.mrf.mxu0  ;;  %v8096_v62 = vadd.f32 %v2651_v29, %v2295_v26  ;;  %v3464_v58 = vpack.c.b16 %v3439_v3, %v3438_v18  ;;  %v3014_v29 = vld [vmem:[#allocation2 + $0x68] sm:$0x1]  ;;  %v3224_v26 = vor.u32 %v3223_v43, %v3219_v54  ;;  %v3214_v7 = vor.u32 %v3213_v35, %v3210_v37 }
 0x22d   : > { %v8099_v51 = vadd.f32 %v2591_v12, %v8018_v34  ;;  %v3227_v33 = vshll.u32 %v3014_v29, 16  ;;  %v3764_v43 = vrot.slane %v8089_v50, 5 }
 0x22e   : > { %6479 = vmatmul.msk.bf16.gmra.mxu3 %vm1951_vm13, %v3865_v46  ;;  %v3225_v8 = vrot.slane %v3224_v26, 4  ;;  %v3215_v18 = vrot.slane %v3214_v7, 4  ;;  %v3247_v26 = vrot.slane %v3245_v38, 4  ;;  %v3767_v7 = vrot.slane %v3014_v29, 5  ;;  %v6721_v29 = vld [vmem:[#allocation2 + $0x6c] sm:$0xff] }
 0x22f   : > { %v2299_v59 = vpop.f32.mrf.mxu2 }
 0x230   : > { %v3220_v50 = vsel %vm7389_vm1, %v3215_v18, %v3219_v54 }
 0x231   : > { %v2654_v28 = vpop.f32.mrf.mxu3  ;;  %v2074_v60 = vpop.f32.mrf.mxu1 }
 0x232   : > { %v2298_v34 = vadd.f32 %v2297_v41, %v2074_v60  ;;  %v3758_v41 = vsel %vm7313_vm12, %v6460_v24, %v3757_v13  ;;  %v3241_v60 = vshll.u32 %v8116_v30, 16  ;;  %v3766_v24 = vrot.slane %v3764_v43, 4 }
 0x233   : > { %v3840_v3 = vunpack.c.l.b16 %v3758_v41 }
 0x234   : > { %v2594_v47 = vpop.f32.mrf.mxu0  ;;  %v8106_v46 = vadd.f32 %v2654_v28, %v2298_v34  ;;  %6423 = vmatmul.msk.bf16.gmra.mxu1 %vm1951_vm13, %v6700_v21  ;;  %6444 = vmatmul.msk.bf16.gmra.mxu2 %vm1951_vm13, %v3464_v58  ;;  %v3015_v58 = vld [vmem:[#allocation2 + $0x6c] sm:$0xf]  ;;  %v3243_v35 = vrot.slane %v3241_v60, 5  ;;  %v3768_v54 = vsel %vm7313_vm12, %v3766_v24, %v3767_v7 }
 0x235   : > { %v8110_v12 = vadd.f32 %v2594_v47, %v8029_v52  ;;  %v3229_v52 = vrot.slane %v3227_v33, 5  ;;  %v3866_v55 = vpack.c.b16 %v3841_v9, %v3840_v3  ;;  %v3656_v47 = vld [vmem:[#allocation2 + $0x60] sm:$0xe]  ;;  %v3232_v32 = vshrl.u32 %v3015_v58, 16 }
 0x236   : > { %v3235_v37 = vshll.u32 %v3015_v58, 16  ;;  %v3440_v33 = vunpack.c.l.b16 %v3220_v50  ;;  %v6461_v3 = vrot.slane %v3656_v47, 9  ;;  %v3843_v38 = vunpack.c.l.b16 %v3768_v54 }
 0x237   : > { %6564 = vmatmul.msk.bf16.gmra.mxu0 %vm1951_vm13, %v6720_v0  ;;  %v2302_v6 = vpop.f32.mrf.mxu2  ;;  %v3230_v13 = vsel %vm7389_vm1, %v3225_v8, %v3229_v52  ;;  %v6701_v8 = vld [vmem:[#allocation2 + $0x54] sm:$0xff] }
 0x239   : > { %v2656_v39 = vpop.f32.mrf.mxu3  ;;  %v2076_v22 = vpop.f32.mrf.mxu1 }
 0x23a   : > { %v2300_v63 = vadd.f32 %v2299_v59, %v2076_v22  ;;  %v3441_v59 = vunpack.c.l.b16 %v3230_v13  ;;  %v3017_v22 = vld [vmem:[#allocation2 + $0x74] sm:$0x1] }
 0x23b   : > { %v3251_v60 = vshll.u32 %v3017_v22, 16 }
 0x23c   : > { %v2596_v28 = vpop.f32.mrf.mxu0  ;;  %v8123_v34 = vadd.f32 %v2656_v39, %v2300_v63  ;;  %v3465_v39 = vpack.c.b16 %v3441_v59, %v3440_v33  ;;  %v3234_v63 = vrot.slane %v3232_v32, 4  ;;  %v8143_v32 = vld [vmem:[#allocation2 + $0x7c] sm:$0xf]  ;;  %v3771_v33 = vrot.slane %v8116_v30, 5 }
 0x23d   : > { %v8126_v21 = vadd.f32 %v2596_v28, %v8045_v1  ;;  %v3248_v28 = vor.u32 %v3247_v26, %v3243_v35 }
 0x23e   : > { %6480 = vmatmul.msk.bf16.gmra.mxu3 %vm1951_vm13, %v3866_v55  ;;  %v3237_v55 = vrot.slane %v3235_v37, 5  ;;  %v3773_v54 = vrot.slane %v3771_v33, 4 }
 0x23f   : > { %v2304_v41 = vpop.f32.mrf.mxu2  ;;  %v3249_v50 = vrot.slane %v3248_v28, 4 }
 0x240   : > { %v3238_v58 = vor.u32 %v3237_v55, %v3234_v63  ;;  %v3657_v63 = vld [vmem:[#allocation2 + $0x6c] sm:$0xe] }
 0x241   : > { %v2659_v0 = vpop.f32.mrf.mxu3  ;;  %v2079_v9 = vpop.f32.mrf.mxu1 }
 0x242   : > { %v2303_v1 = vadd.f32 %v2302_v6, %v2079_v9  ;;  %v3765_v6 = vsel %vm7313_vm12, %v6461_v3, %v3764_v43  ;;  %v3239_v7 = vrot.slane %v3238_v58, 4 }
 0x243   : > { %v3842_v47 = vunpack.c.l.b16 %v3765_v6 }
 0x244   : > { %v2599_v52 = vpop.f32.mrf.mxu0  ;;  %v8133_v18 = vadd.f32 %v2659_v0, %v2303_v1  ;;  %6424 = vmatmul.msk.bf16.gmra.mxu1 %vm1951_vm13, %v6701_v8  ;;  %6445 = vmatmul.msk.bf16.gmra.mxu2 %vm1951_vm13, %v3465_v39  ;;  %v3265_v1 = vshll.u32 %v8143_v32, 16  ;;  %v3269_v8 = vshrl.u32 %v8143_v32, 16  ;;  %v3244_v30 = vsel %vm7389_vm1, %v3239_v7, %v3243_v35 }
 0x245   : > { %v8137_v13 = vadd.f32 %v2599_v52, %v8056_v61  ;;  %v3253_v61 = vrot.slane %v3251_v60, 5  ;;  %v3867_v0 = vpack.c.b16 %v3843_v38, %v3842_v47  ;;  %v3018_v52 = vld [vmem:[#allocation2 + $0x78] sm:$0xf]  ;;  %v3442_v58 = vunpack.c.l.b16 %v3244_v30  ;;  %v6702_v47 = vld [vmem:[#allocation2 + $0x60] sm:$0xff] }
 0x246   : > { %v3256_v55 = vshrl.u32 %v3018_v52, 16  ;;  %v3259_v28 = vshll.u32 %v3018_v52, 16  ;;  %v3271_v6 = vrot.slane %v3269_v8, 4  ;;  %v6733_v52 = vld [vmem:[%s9017_s7] sm:$0xff] }
 0x247   : > { %6565 = vmatmul.msk.bf16.gmra.mxu0 %vm1951_vm13, %v6721_v29  ;;  %v2307_v24 = vpop.f32.mrf.mxu2  ;;  %v3254_v43 = vsel %vm7389_vm1, %v3249_v50, %v3253_v61  ;;  %v3267_v29 = vrot.slane %v3265_v1, 5  ;;  %v6462_v61 = vrot.slane %v3657_v63, 9  ;;  %v6722_v1 = vld [vmem:[#allocation2 + $0x78] sm:$0xff]  ;;  %5585 = vmatpush.bf16.msra.mxu3 %v6733_v52 }
 0x249   : > { %v2661_v59 = vpop.f32.mrf.mxu3  ;;  %v2081_v37 = vpop.f32.mrf.mxu1  ;;  %v3272_v7 = vor.u32 %v3271_v6, %v3267_v29 }
 0x24a   : > { %v2305_v26 = vadd.f32 %v2304_v41, %v2081_v37  ;;  %v3443_v41 = vunpack.c.l.b16 %v3254_v43 }
 0x24c   : > { %v2601_v9 = vpop.f32.mrf.mxu0  ;;  %v8150_v39 = vadd.f32 %v2661_v59, %v2305_v26  ;;  %v3774_v59 = vrot.slane %v3017_v22, 5  ;;  %v3466_v37 = vpack.c.b16 %v3443_v41, %v3442_v58  ;;  %v3020_v26 = vld [vmem:[#allocation2 + $0x80] sm:$0x1]  ;;  %v3772_v22 = vsel %vm7313_vm12, %v6462_v61, %v3771_v33 }
 0x24d   : > { %v8153_v3 = vadd.f32 %v2601_v9, %v8072_v17  ;;  %v3261_v9 = vrot.slane %v3259_v28, 5  ;;  %v3273_v41 = vrot.slane %v3272_v7, 4  ;;  %v8170_v28 = vld [vmem:[#allocation2 + $0x88] sm:$0xf]  ;;  %v3658_v7 = vld [vmem:[#allocation2 + $0x78] sm:$0xe] }
 0x24e   : > { %6481 = vmatmul.msk.bf16.gmra.mxu3 %vm1951_vm13, %v3867_v0  ;;  %v3775_v35 = vsel %vm7313_vm12, %v3773_v54, %v3774_v59  ;;  %v3258_v0 = vrot.slane %v3256_v55, 4  ;;  %v3844_v55 = vunpack.c.l.b16 %v3772_v22 }
 0x24f   : > { %v2309_v38 = vpop.f32.mrf.mxu2  ;;  %v3845_v8 = vunpack.c.l.b16 %v3775_v35  ;;  %v3021_v35 = vld [vmem:[#allocation2 + $0x84] sm:$0xf] }
 0x250   : > { %v3262_v30 = vor.u32 %v3261_v9, %v3258_v0 }
 0x251   : > { %v2664_v60 = vpop.f32.mrf.mxu3  ;;  %v2084_v50 = vpop.f32.mrf.mxu1  ;;  %v3868_v33 = vpack.c.b16 %v3845_v8, %v3844_v55  ;;  %v3781_v55 = vrot.slane %v3020_v26, 5 }
 0x252   : > { %v2308_v17 = vadd.f32 %v2307_v24, %v2084_v50  ;;  %v3275_v24 = vshll.u32 %v3020_v26, 16  ;;  %v3778_v50 = vrot.slane %v8143_v32, 5  ;;  %v3263_v59 = vrot.slane %v3262_v30, 4 }
 0x253   : > { %v3280_v32 = vshrl.u32 %v3021_v35, 16 }
 0x254   : > { %v8160_v43 = vadd.f32 %v2664_v60, %v2308_v17  ;;  %6425 = vmatmul.msk.bf16.gmra.mxu1 %vm1951_vm13, %v6702_v47  ;;  %6446 = vmatmul.msk.bf16.gmra.mxu2 %vm1951_vm13, %v3466_v37  ;;  %v3277_v60 = vrot.slane %v3275_v24, 5  ;;  %v3289_v47 = vshll.u32 %v8170_v28, 16  ;;  %v3293_v37 = vshrl.u32 %v8170_v28, 16 }
 0x255   : > { %v3268_v0 = vsel %vm7389_vm1, %v3263_v59, %v3267_v29  ;;  %v3780_v9 = vrot.slane %v3778_v50, 4  ;;  %v3282_v59 = vrot.slane %v3280_v32, 4 }
 0x256   : > { %v3278_v17 = vsel %vm7389_vm1, %v3273_v41, %v3277_v60  ;;  %v3291_v22 = vrot.slane %v3289_v47, 5  ;;  %v3295_v24 = vrot.slane %v3293_v37, 4  ;;  %v3444_v30 = vunpack.c.l.b16 %v3268_v0  ;;  %v6723_v47 = vld [vmem:[#allocation2 + $0x84] sm:$0xff] }
 0x257   : > { %6566 = vmatmul.msk.bf16.gmra.mxu0 %vm1951_vm13, %v6722_v1  ;;  %v3537_v63 = vpop.f32.mrf.mxu2  ;;  %v3283_v1 = vshll.u32 %v3021_v35, 16  ;;  %v3782_v29 = vsel %vm7313_vm12, %v3780_v9, %v3781_v55 }
 0x258   : > { %v3296_v14 = vor.u32 %v3295_v24, %v3291_v22  ;;  %v3847_v0 = vunpack.c.l.b16 %v3782_v29 }
 0x259   : > { %v2666_v54 = vpop.f32.mrf.mxu3  ;;  %v2086_v6 = vpop.f32.mrf.mxu1 }
 0x25a   : > { %v2310_v58 = vadd.f32 %v2309_v38, %v2086_v6  ;;  %v3445_v38 = vunpack.c.l.b16 %v3278_v17  ;;  %v6703_v6 = vld [vmem:[#allocation2 + $0x6c] sm:$0xff]  ;;  %v3285_v17 = vrot.slane %v3283_v1, 5  ;;  %v3297_v9 = vrot.slane %v3296_v14, 4 }
 0x25c   : > { %v8177_v61 = vadd.f32 %v2666_v54, %v2310_v58  ;;  %v3467_v60 = vpack.c.b16 %v3445_v38, %v3444_v30  ;;  %v6463_v58 = vrot.slane %v3658_v7, 9  ;;  %v3286_v38 = vor.u32 %v3285_v17, %v3282_v59 }
 0x25e   : > { %6482 = vmatmul.msk.bf16.gmra.mxu3 %vm1951_vm13, %v3868_v33  ;;  %v3023_v33 = vld [vmem:[#allocation2 + $0x8c] sm:$0x1]  ;;  %v3779_v26 = vsel %vm7313_vm12, %v6463_v58, %v3778_v50  ;;  %v3785_v50 = vrot.slane %v8170_v28, 5  ;;  %v3024_v58 = vld [vmem:[#allocation2 + $0x90] sm:$0xf] }
 0x25f   : > { %v3539_v52 = vpop.f32.mrf.mxu2  ;;  %v3846_v1 = vunpack.c.l.b16 %v3779_v26  ;;  %v3659_v28 = vld [vmem:[#allocation2 + $0x84] sm:$0xe] }
 0x260   : > { %v3787_v17 = vrot.slane %v3785_v50, 4 }
 0x261   : > { %v3939_v8 = vpop.f32.mrf.mxu3  ;;  %v2879_v41 = vpop.f32.mrf.mxu1  ;;  %v3869_v55 = vpack.c.b16 %v3847_v0, %v3846_v1 }
 0x262   : > { %v2959_v54 = vadd.f32 %v2879_v41, %v8083_v48  ;;  %v3299_v48 = vshll.u32 %v3023_v33, 16 }
 0x264   : > { %v3617_v35 = vadd.f32 %v3537_v63, %v2959_v54  ;;  %6426 = vmatmul.msk.bf16.gmra.mxu1 %vm1951_vm13, %v6703_v6  ;;  %6447 = vmatmul.msk.bf16.gmra.mxu2 %vm1951_vm13, %v3467_v60  ;;  %v8192_v63 = vld [vmem:[#allocation2 + $0x94] sm:$0xf]  ;;  %v3301_v30 = vrot.slane %v3299_v48, 5  ;;  %v3287_v54 = vrot.slane %v3286_v38, 4 }
 0x265   : > { %v3313_v6 = vshll.u32 %v8192_v63, 16  ;;  %v3317_v14 = vshrl.u32 %v8192_v63, 16 }
 0x266   : > { %v8189_v37 = vadd.f32 %v3939_v8, %v3617_v35  ;;  %v3302_v8 = vsel %vm7389_vm1, %v3297_v9, %v3301_v30  ;;  %v3292_v29 = vsel %vm7389_vm1, %v3287_v54, %v3291_v22  ;;  %v3304_v35 = vshrl.u32 %v3024_v58, 16  ;;  %v6704_v30 = vld [vmem:[#allocation2 + $0x78] sm:$0xff] }
 0x267   : > { %6567 = vmatmul.msk.bf16.gmra.mxu0 %vm1951_vm13, %v6723_v47  ;;  %v3542_v32 = vpop.f32.mrf.mxu2  ;;  %v3307_v47 = vshll.u32 %v3024_v58, 16  ;;  %v3315_v26 = vrot.slane %v3313_v6, 5  ;;  %v3319_v48 = vrot.slane %v3317_v14, 4  ;;  %v3446_v9 = vunpack.c.l.b16 %v3292_v29  ;;  %v3026_v22 = vld [vmem:[#allocation2 + $0x98] sm:$0x1]  ;;  %v6724_v6 = vld [vmem:[#allocation2 + $0x90] sm:$0xff] }
 0x268   : > { %v3306_v54 = vrot.slane %v3304_v35, 4 }
 0x269   : > { %v3941_v7 = vpop.f32.mrf.mxu3  ;;  %v2881_v24 = vpop.f32.mrf.mxu1 }
 0x26a   : > { %v2960_v41 = vadd.f32 %v2881_v24, %v8099_v51  ;;  %v3447_v51 = vunpack.c.l.b16 %v3302_v8  ;;  %v3309_v8 = vrot.slane %v3307_v47, 5 }
 0x26c   : > { %v3618_v60 = vadd.f32 %v3539_v52, %v2960_v41  ;;  %v3788_v52 = vrot.slane %v3023_v33, 5  ;;  %v3468_v41 = vpack.c.b16 %v3447_v51, %v3446_v9  ;;  %v3310_v51 = vor.u32 %v3309_v8, %v3306_v54 }
 0x26e   : > { %6483 = vmatmul.msk.bf16.gmra.mxu3 %vm1951_vm13, %v3869_v55  ;;  %v8203_v59 = vadd.f32 %v3941_v7, %v3618_v60  ;;  %v6464_v55 = vrot.slane %v3659_v28, 9  ;;  %v3789_v7 = vsel %vm7313_vm12, %v3787_v17, %v3788_v52  ;;  %v3320_v60 = vor.u32 %v3319_v48, %v3315_v26 }
 0x26f   : > { %v3544_v38 = vpop.f32.mrf.mxu2  ;;  %v3849_v29 = vunpack.c.l.b16 %v3789_v7  ;;  %v3027_v7 = vld [vmem:[#allocation2 + $0x9c] sm:$0xf] }
 0x270   : > { %v3786_v33 = vsel %vm7313_vm12, %v6464_v55, %v3785_v50  ;;  %v3321_v17 = vrot.slane %v3320_v60, 4  ;;  %v3792_v50 = vrot.slane %v8192_v63, 5  ;;  %v8228_v63 = vpop.f32.mrf.mxu0 }
 0x271   : > { %v3944_v0 = vpop.f32.mrf.mxu3  ;;  %v2884_v1 = vpop.f32.mrf.mxu1  ;;  %v3848_v47 = vunpack.c.l.b16 %v3786_v33  ;;  %v3331_v33 = vshll.u32 %v3027_v7, 16 }
 0x272   : > { %v2961_v24 = vadd.f32 %v2884_v1, %v8110_v12  ;;  %v3323_v12 = vshll.u32 %v3026_v22, 16  ;;  %v3794_v60 = vrot.slane %v3792_v50, 4 }
 0x273   : > { %v3870_v52 = vpack.c.b16 %v3849_v29, %v3848_v47 }
 0x274   : > { %v3619_v58 = vadd.f32 %v3542_v32, %v2961_v24  ;;  %6427 = vmatmul.msk.bf16.gmra.mxu1 %vm1951_vm13, %v6704_v30  ;;  %6448 = vmatmul.msk.bf16.gmra.mxu2 %vm1951_vm13, %v3468_v41  ;;  %v8215_v32 = vld [vmem:[#allocation2 + $0xa0] sm:$0xf]  ;;  %v3325_v9 = vrot.slane %v3323_v12, 5  ;;  %v3311_v24 = vrot.slane %v3310_v51, 4 }
 0x275   : > { %v3337_v30 = vshll.u32 %v8215_v32, 16  ;;  %v3341_v41 = vshrl.u32 %v8215_v32, 16 }
 0x276   : > { %v8212_v14 = vadd.f32 %v3944_v0, %v3619_v58  ;;  %v3326_v0 = vsel %vm7389_vm1, %v3321_v17, %v3325_v9  ;;  %v3316_v54 = vsel %vm7389_vm1, %v3311_v24, %v3315_v26  ;;  %v3660_v58 = vld [vmem:[#allocation2 + $0x90] sm:$0xe] }
 0x277   : > { %6568 = vmatmul.msk.bf16.gmra.mxu0 %vm1951_vm13, %v6724_v6  ;;  %v3547_v35 = vpop.f32.mrf.mxu2  ;;  %v3328_v6 = vshrl.u32 %v3027_v7, 16  ;;  %v3339_v12 = vrot.slane %v3337_v30, 5  ;;  %v3343_v29 = vrot.slane %v3341_v41, 4  ;;  %v6725_v30 = vld [vmem:[#allocation2 + $0x9c] sm:$0xff] }
 0x279   : > { %v3946_v28 = vpop.f32.mrf.mxu3  ;;  %v2886_v48 = vpop.f32.mrf.mxu1 }
 0x27a   : > { %v2962_v1 = vadd.f32 %v2886_v48, %v8126_v21  ;;  %v3449_v21 = vunpack.c.l.b16 %v3326_v0  ;;  %v3795_v48 = vrot.slane %v3026_v22, 5  ;;  %v3330_v0 = vrot.slane %v3328_v6, 4 }
 0x27c   : > { %v3620_v55 = vadd.f32 %v3544_v38, %v2962_v1  ;;  %v3448_v38 = vunpack.c.l.b16 %v3316_v54  ;;  %v6705_v1 = vld [vmem:[#allocation2 + $0x84] sm:$0xff]  ;;  %v3796_v24 = vsel %vm7313_vm12, %v3794_v60, %v3795_v48 }
 0x27d   : > { %v3851_v54 = vunpack.c.l.b16 %v3796_v24  ;;  %v3030_v24 = vld [vmem:[#allocation2 + $0xa8] sm:$0xf] }
 0x27e   : > { %6484 = vmatmul.msk.bf16.gmra.mxu3 %vm1951_vm13, %v3870_v52  ;;  %v8226_v8 = vadd.f32 %v3946_v28, %v3620_v55  ;;  %v3469_v26 = vpack.c.b16 %v3449_v21, %v3448_v38  ;;  %v6465_v28 = vrot.slane %v3660_v58, 9  ;;  %v3029_v52 = vld [vmem:[#allocation2 + $0xa4] sm:$0x1]  ;;  %v3333_v55 = vrot.slane %v3331_v33, 5 }
 0x27f   : > { %v3549_v17 = vpop.f32.mrf.mxu2 }
 0x280   : > { %9054 = vst [vmem:[#allocation17_spill] sm:$0xff] %v8226_v8  ;;  %v3344_v8 = vor.u32 %v3343_v29, %v3339_v12  ;;  %v3793_v22 = vsel %vm7313_vm12, %v6465_v28, %v3792_v50  ;;  %v3334_v21 = vor.u32 %v3333_v55, %v3330_v0  ;;  %v8242_v29 = vpop.f32.mrf.mxu0  ;;  %v3799_v28 = vrot.slane %v8215_v32, 5 }
 0x281   : > { %v3949_v51 = vpop.f32.mrf.mxu3  ;;  %v2889_v47 = vpop.f32.mrf.mxu1  ;;  %v3850_v33 = vunpack.c.l.b16 %v3793_v22 }
 0x282   : > { %v2963_v9 = vadd.f32 %v2889_v47, %v8137_v13  ;;  %v3347_v13 = vshll.u32 %v3029_v52, 16  ;;  %v3345_v60 = vrot.slane %v3344_v8, 4 }
 0x283   : > { %v3871_v50 = vpack.c.b16 %v3851_v54, %v3850_v33  ;;  %v3801_v33 = vrot.slane %v3799_v28, 4 }
 0x284   : > { %v3621_v7 = vadd.f32 %v3547_v35, %v2963_v9  ;;  %6428 = vmatmul.msk.bf16.gmra.mxu1 %vm1951_vm13, %v6705_v1  ;;  %6449 = vmatmul.msk.bf16.gmra.mxu2 %vm1951_vm13, %v3469_v26  ;;  %v8240_v35 = vld [vmem:[#allocation2 + $0xac] sm:$0xf]  ;;  %v3349_v47 = vrot.slane %v3347_v13, 5  ;;  %v3335_v9 = vrot.slane %v3334_v21, 4 }
 0x285   : > { %v3361_v1 = vshll.u32 %v8240_v35, 16  ;;  %v3365_v8 = vshrl.u32 %v8240_v35, 16 }
 0x286   : > { %v8237_v41 = vadd.f32 %v3949_v51, %v3621_v7  ;;  %v3350_v51 = vsel %vm7389_vm1, %v3345_v60, %v3349_v47  ;;  %v3340_v0 = vsel %vm7389_vm1, %v3335_v9, %v3339_v12  ;;  %v3352_v7 = vshrl.u32 %v3030_v24, 16  ;;  %v6706_v47 = vld [vmem:[#allocation2 + $0x90] sm:$0xff] }
 0x287   : > { %6569 = vmatmul.msk.bf16.gmra.mxu0 %vm1951_vm13, %v6725_v30  ;;  %v3552_v6 = vpop.f32.mrf.mxu2  ;;  %v3355_v30 = vshll.u32 %v3030_v24, 16  ;;  %v3363_v22 = vrot.slane %v3361_v1, 5  ;;  %v3367_v13 = vrot.slane %v3365_v8, 4  ;;  %v3450_v60 = vunpack.c.l.b16 %v3340_v0  ;;  %v6726_v1 = vld [vmem:[#allocation2 + $0xa8] sm:$0xff] }
 0x288   : > { %9055 = vst [vmem:[#allocation18_spill] sm:$0xff] %v8237_v41  ;;  %v3032_v41 = vld [vmem:[#allocation2 + $0xb0] sm:$0x1]  ;;  %v8256_v12 = vpop.f32.mrf.mxu0 }
 0x289   : > { %v3951_v58 = vpop.f32.mrf.mxu3  ;;  %v2891_v38 = vpop.f32.mrf.mxu1  ;;  %v3357_v9 = vrot.slane %v3355_v30, 5  ;;  %v8267_v30 = vld [vmem:[#allocation2 + $0xb8] sm:$0xf] }
 0x28a   : > { %v2964_v48 = vadd.f32 %v2891_v38, %v8153_v3  ;;  %v3451_v3 = vunpack.c.l.b16 %v3350_v51  ;;  %v3661_v38 = vld [vmem:[#allocation2 + $0x9c] sm:$0xe]  ;;  %v3368_v51 = vor.u32 %v3367_v13, %v3363_v22 }
 0x28b   : > { %v6466_v8 = vrot.slane %v3661_v38, 9 }
 0x28c   : > { %v3622_v26 = vadd.f32 %v3549_v17, %v2964_v48  ;;  %v3470_v48 = vpack.c.b16 %v3451_v3, %v3450_v60 }
 0x28e   : > { %6485 = vmatmul.msk.bf16.gmra.mxu3 %vm1951_vm13, %v3871_v50  ;;  %v8253_v55 = vadd.f32 %v3951_v58, %v3622_v26  ;;  %v3802_v50 = vrot.slane %v3029_v52, 5  ;;  %v3354_v58 = vrot.slane %v3352_v7, 4  ;;  %v3800_v52 = vsel %vm7313_vm12, %v6466_v8, %v3799_v28 }
 0x28f   : > { %v3554_v21 = vpop.f32.mrf.mxu2  ;;  %v3852_v38 = vunpack.c.l.b16 %v3800_v52 }
 0x290   : > { %v3803_v24 = vsel %vm7313_vm12, %v3801_v33, %v3802_v50  ;;  %v3358_v7 = vor.u32 %v3357_v9, %v3354_v58  ;;  %v3806_v58 = vrot.slane %v8240_v35, 5  ;;  %v3662_v35 = vld [vmem:[#allocation2 + $0xa8] sm:$0xe] }
 0x291   : > { %v3954_v54 = vpop.f32.mrf.mxu3  ;;  %v2894_v17 = vpop.f32.mrf.mxu1  ;;  %v3853_v3 = vunpack.c.l.b16 %v3803_v24 }
 0x292   : > { %v2965_v32 = vadd.f32 %v2894_v17, %v7765_v19  ;;  %v3371_v19 = vshll.u32 %v3032_v41, 16 }
 0x293   : > { %v3872_v50 = vpack.c.b16 %v3853_v3, %v3852_v38 }
 0x294   : > { %v3623_v26 = vadd.f32 %v3552_v6, %v2965_v32  ;;  %6429 = vmatmul.msk.bf16.gmra.mxu1 %vm1951_vm13, %v6706_v47  ;;  %6450 = vmatmul.msk.bf16.gmra.mxu2 %vm1951_vm13, %v3470_v48  ;;  %v3369_v6 = vrot.slane %v3368_v51, 4  ;;  %v3373_v32 = vrot.slane %v3371_v19, 5  ;;  %v3033_v47 = vld [vmem:[#allocation2 + $0xb4] sm:$0xf]  ;;  %v3389_v48 = vshrl.u32 %v8267_v30, 16  ;;  %v8275_v51 = vpop.f32.mrf.mxu0 }
 0x295   : > { %v3379_v8 = vshll.u32 %v3033_v47, 16 }
 0x296   : > { %v8262_v0 = vadd.f32 %v3954_v54, %v3623_v26  ;;  %v3385_v54 = vshll.u32 %v8267_v30, 16  ;;  %v3359_v26 = vrot.slane %v3358_v7, 4  ;;  %v3374_v28 = vsel %vm7389_vm1, %v3369_v6, %v3373_v32 }
 0x297   : > { %6570 = vmatmul.msk.bf16.gmra.mxu0 %vm1951_vm13, %v6726_v1  ;;  %v3557_v60 = vpop.f32.mrf.mxu2  ;;  %v3376_v1 = vshrl.u32 %v3033_v47, 16  ;;  %v3453_v19 = vunpack.c.l.b16 %v3374_v28  ;;  %v3391_v3 = vrot.slane %v3389_v48, 4  ;;  %v3808_v7 = vrot.slane %v3806_v58, 4  ;;  %v6727_v28 = vld [vmem:[#allocation2 + $0xb4] sm:$0xff] }
 0x298   : > { %9056 = vst [vmem:[#allocation19_spill] sm:$0xff] %v8262_v0  ;;  %v3387_v52 = vrot.slane %v3385_v54, 5  ;;  %v3809_v32 = vrot.slane %v3032_v41, 5  ;;  %v3381_v47 = vrot.slane %v3379_v8, 5 }
 0x299   : > { %v3956_v13 = vpop.f32.mrf.mxu3  ;;  %v2896_v17 = vpop.f32.mrf.mxu1 }
 0x29a   : > { %v2966_v33 = vadd.f32 %v2896_v17, %v7785_v10  ;;  %v3364_v10 = vsel %vm7389_vm1, %v3359_v26, %v3363_v22  ;;  %v6707_v22 = vld [vmem:[#allocation2 + $0x9c] sm:$0xff]  ;;  %v3810_v54 = vsel %vm7313_vm12, %v3808_v7, %v3809_v32 }
 0x29b   : > { %v3452_v38 = vunpack.c.l.b16 %v3364_v10 }
 0x29c   : > { %v3624_v9 = vadd.f32 %v3554_v21, %v2966_v33  ;;  %v8282_v33 = vld [vmem:[#allocation2 + $0xbc] sm:$0x1] }
 0x29d   : > { %v3471_v26 = vpack.c.b16 %v3453_v19, %v3452_v38  ;;  %v3395_v41 = vshll.u32 %v8282_v33, 16 }
 0x29e   : > { %6486 = vmatmul.msk.bf16.gmra.mxu3 %vm1951_vm13, %v3872_v50  ;;  %v8280_v24 = vadd.f32 %v3956_v13, %v3624_v9  ;;  %v3378_v50 = vrot.slane %v3376_v1, 4  ;;  %v3392_v13 = vor.u32 %v3391_v3, %v3387_v52  ;;  %v6467_v9 = vrot.slane %v3662_v35, 9  ;;  %v8295_v3 = vpop.f32.mrf.mxu0 }
 0x29f   : > { %v3559_v6 = vpop.f32.mrf.mxu2  ;;  %v3855_v1 = vunpack.c.l.b16 %v3810_v54  ;;  %v3397_v38 = vrot.slane %v3395_v41, 5 }
 0x2a0   : > { %v3807_v10 = vsel %vm7313_vm12, %v6467_v9, %v3806_v58  ;;  %v3382_v8 = vor.u32 %v3381_v47, %v3378_v50  ;;  %v3393_v19 = vrot.slane %v3392_v13, 4 }
 0x2a1   : > { %v3959_v17 = vpop.f32.mrf.mxu3  ;;  %v2899_v21 = vpop.f32.mrf.mxu1  ;;  %v3854_v7 = vunpack.c.l.b16 %v3807_v10 }
 0x2a2   : > { %v2967_v0 = vadd.f32 %v2899_v21, %v7805_v15  ;;  %v3398_v58 = vsel %vm7389_vm1, %v3393_v19, %v3397_v38 }
 0x2a3   : > { %v3873_v32 = vpack.c.b16 %v3855_v1, %v3854_v7 }
 0x2a4   : > { %v3625_v48 = vadd.f32 %v3557_v60, %v2967_v0  ;;  %6430 = vmatmul.msk.bf16.gmra.mxu1 %vm1951_vm13, %v6707_v22  ;;  %6451 = vmatmul.msk.bf16.gmra.mxu2 %vm1951_vm13, %v3471_v26  ;;  %v3383_v22 = vrot.slane %v3382_v8, 4  ;;  %v8302_v26 = vld [vmem:[#allocation2 + $0xc4] sm:$0xf] }
 0x2a5   : > { %v3409_v13 = vshll.u32 %v8302_v26, 16  ;;  %v3413_v9 = vshrl.u32 %v8302_v26, 16 }
 0x2a6   : > { %v8292_v15 = vadd.f32 %v3959_v17, %v3625_v48  ;;  %v3036_v17 = vld [vmem:[#allocation2 + $0xc0] sm:$0xf]  ;;  %v3813_v48 = vrot.slane %v8267_v30, 5 }
 0x2a7   : > { %6571 = vmatmul.msk.bf16.gmra.mxu0 %vm1951_vm13, %v6727_v28  ;;  %v3562_v60 = vpop.f32.mrf.mxu2  ;;  %v3400_v50 = vshrl.u32 %v3036_v17, 16  ;;  %v3403_v47 = vshll.u32 %v3036_v17, 16  ;;  %v3455_v28 = vunpack.c.l.b16 %v3398_v58  ;;  %v3411_v1 = vrot.slane %v3409_v13, 5  ;;  %v3038_v17 = vld [vmem:[#allocation2 + $0xc8] sm:$0x1] }
 0x2a8   : > { %9057 = vst [vmem:[#allocation20_spill] sm:$0xff] %v8292_v15  ;;  %v3415_v8 = vrot.slane %v3413_v9, 4  ;;  %v6728_v15 = vld [vmem:[#allocation2 + $0xc0] sm:$0xff] }
 0x2a9   : > { %v8297_v0 = vpop.f32.mrf.mxu3  ;;  %v2901_v35 = vpop.f32.mrf.mxu1  ;;  %v3402_v41 = vrot.slane %v3400_v50, 4  ;;  %v3405_v10 = vrot.slane %v3403_v47, 5  ;;  %v3419_v50 = vshll.u32 %v3038_v17, 16 }
 0x2aa   : > { %9058 = vst [vmem:[#allocation21_spill] sm:$0xff] %v8297_v0  ;;  %v2968_v21 = vadd.f32 %v2901_v35, %v7824_v40  ;;  %v3388_v40 = vsel %vm7389_vm1, %v3383_v22, %v3387_v52  ;;  %v3815_v35 = vrot.slane %v3813_v48, 4  ;;  %v3816_v52 = vrot.slane %v8282_v33, 5 }
 0x2ab   : > { %v3454_v38 = vunpack.c.l.b16 %v3388_v40  ;;  %v3406_v22 = vor.u32 %v3405_v10, %v3402_v41  ;;  %v3416_v58 = vor.u32 %v3415_v8, %v3411_v1  ;;  %v3421_v41 = vrot.slane %v3419_v50, 5 }
 0x2ac   : > { %v8306_v54 = vadd.f32 %v3559_v6, %v2968_v21  ;;  %v3663_v6 = vld [vmem:[#allocation2 + $0xb4] sm:$0xe]  ;;  %v8312_v21 = vpop.f32.mrf.mxu0  ;;  %v3817_v9 = vsel %vm7313_vm12, %v3815_v35, %v3816_v52  ;;  %v3820_v52 = vrot.slane %v8302_v26, 5 }
 0x2ad   : > { %v6468_v13 = vrot.slane %v3663_v6, 9  ;;  %v3857_v33 = vunpack.c.l.b16 %v3817_v9  ;;  %v961_v6 = vld [vmem:[#allocation2 + $0xcc] sm:$0x1]  ;;  %v3823_v9 = vrot.slane %v3038_v17, 5 }
 0x2ae   : > { %9059 = vst [vmem:[#allocation22_spill] sm:$0xff] %v8306_v54  ;;  %6487 = vmatmul.msk.bf16.gmra.mxu3 %vm1951_vm13, %v3873_v32  ;;  %v6708_v32 = vld [vmem:[#allocation2 + $0xa8] sm:$0xff]  ;;  %v3472_v54 = vpack.c.b16 %v3455_v28, %v3454_v38  ;;  %v3417_v28 = vrot.slane %v3416_v58, 4 }
 0x2af   : > { %v3564_v7 = vpop.f32.mrf.mxu2 }
 0x2b1   : > { %v3964_v19 = vpop.f32.mrf.mxu3  ;;  %v2904_v0 = vpop.f32.mrf.mxu1 }
 0x2b2   : > { %v2969_v30 = vadd.f32 %v2904_v0, %v7860_v16  ;;  %v3814_v16 = vsel %vm7313_vm12, %v6468_v13, %v3813_v48  ;;  %v3407_v0 = vrot.slane %v3406_v22, 4  ;;  %v962_v48 = vsel %vm7240_vm3, 0, %v961_v6 }
 0x2b3   : > { %963 = vst [vmem:[#allocation2 + $0xcc] sm:$0x1] %v962_v48  ;;  %v3822_v13 = vrot.slane %v3820_v52, 4 }
 0x2b4   : > { %v3627_v47 = vadd.f32 %v3562_v60, %v2969_v30  ;;  %6431 = vmatmul.msk.bf16.gmra.mxu1 %vm1951_vm13, %v6708_v32  ;;  %6452 = vmatmul.msk.bf16.gmra.mxu2 %vm1951_vm13, %v3472_v54  ;;  %v3856_v54 = vunpack.c.l.b16 %v3814_v16  ;;  %v8334_v30 = vpop.f32.mrf.mxu0  ;;  %v4343_v16 = vld [vmem:[#allocation2 + $0x1c] sm:$0xf] }
 0x2b6   : > { %v8320_v40 = vadd.f32 %v3964_v19, %v3627_v47  ;;  %v3874_v35 = vpack.c.b16 %v3857_v33, %v3856_v54  ;;  %v3412_v19 = vsel %vm7389_vm1, %v3407_v0, %v3411_v1  ;;  %v6709_v0 = vld [vmem:[#allocation2 + $0xb4] sm:$0xff]  ;;  %v3824_v54 = vsel %vm7313_vm12, %v3822_v13, %v3823_v9 }
 0x2b7   : > { %6572 = vmatmul.msk.bf16.gmra.mxu0 %vm1951_vm13, %v6728_v15  ;;  %v3567_v10 = vpop.f32.mrf.mxu2  ;;  %v3422_v15 = vsel %vm7389_vm1, %v3417_v28, %v3421_v41  ;;  %v3456_v22 = vunpack.c.l.b16 %v3412_v19  ;;  %v5066_v28 = vrot.slane %v4343_v16, 5  ;;  %v4342_v13 = vld [vmem:[#allocation2 + $0x18] sm:$0xf]  ;;  %v4400_v9 = vshll.u32 %v4343_v16, 16 }
 0x2b8   : > { %v3457_v58 = vunpack.c.l.b16 %v3422_v15 }
 0x2b9   : > { %v8325_v60 = vpop.f32.mrf.mxu3  ;;  %v2906_v8 = vpop.f32.mrf.mxu1  ;;  %v5068_v19 = vrot.slane %v5066_v28, 4 }
 0x2ba   : > { %v2970_v38 = vadd.f32 %v2906_v8, %v7879_v44  ;;  %v3664_v44 = vld [vmem:[#allocation2 + $0xc0] sm:$0xe]  ;;  %v6729_v41 = vld [vmem:[#allocation2 + $0xcc] sm:$0xff] }
 0x2bb   : > { %v6469_v47 = vrot.slane %v3664_v44, 9 }
 0x2bc   : > { %v8336_v32 = vadd.f32 %v3564_v7, %v2970_v38  ;;  %v3473_v7 = vpack.c.b16 %v3457_v58, %v3456_v22  ;;  %v8347_v17 = vpop.f32.mrf.mxu0 }
 0x2bd   : > { %v3821_v8 = vsel %vm7313_vm12, %v6469_v47, %v3820_v52 }
 0x2be   : > { %6488 = vmatmul.msk.bf16.gmra.mxu3 %vm1951_vm13, %v3874_v35  ;;  %v3858_v6 = vunpack.c.l.b16 %v3821_v8  ;;  %v3859_v35 = vunpack.c.l.b16 %v3824_v54  ;;  %v4402_v8 = vrot.slane %v4400_v9, 5 }
 0x2bf   : > { %v3569_v1 = vpop.f32.mrf.mxu2 }
 0x2c0   : > { %v3875_v47 = vpack.c.b16 %v3859_v35, %v3858_v6 }
 0x2c1   : > { %v3969_v50 = vpop.f32.mrf.mxu3  ;;  %v2909_v11 = vpop.f32.mrf.mxu1 }
 0x2c2   : > { %v2971_v33 = vadd.f32 %v2909_v11, %v7904_v4  ;;  %v4344_v4 = vld [vmem:[#allocation2 + $0x20] sm:$0x1]  ;;  %v4404_v11 = vshrl.u32 %v4343_v16, 16 }
 0x2c3   : > { %v5069_v22 = vrot.slane %v4344_v4, 5  ;;  %v6710_v16 = vld [vmem:[#allocation2 + $0xc0] sm:$0xff] }
 0x2c4   : > { %v3629_v26 = vadd.f32 %v3567_v10, %v2971_v33  ;;  %6432 = vmatmul.msk.bf16.gmra.mxu1 %vm1951_vm13, %v6709_v0  ;;  %6453 = vmatmul.msk.bf16.gmra.mxu2 %vm1951_vm13, %v3473_v7  ;;  %v5000_v10 = vld [vmem:[#allocation2 + $0x18] sm:$0xe] }
 0x2c5   : > { %v6594_v58 = vrot.slane %v5000_v10, 9  ;;  %v4346_v10 = vld [vmem:[#allocation2 + $0x28] sm:$0xf] }
 0x2c6   : > { %v8349_v38 = vadd.f32 %v3969_v50, %v3629_v26  ;;  %v5070_v50 = vsel %vm7313_vm12, %v5068_v19, %v5069_v22  ;;  %v4394_v26 = vshll.u32 %v4342_v13, 16 }
 0x2c7   : > { %6573 = vmatmul.msk.bf16.gmra.mxu0 %vm1951_vm13, %v6729_v41  ;;  %v3572_v48 = vpop.f32.mrf.mxu2  ;;  %v5067_v0 = vsel %vm7313_vm12, %v6594_v58, %v5066_v28  ;;  %v5180_v7 = vunpack.c.l.b16 %v5070_v50  ;;  %v4391_v41 = vshrl.u32 %v4342_v13, 16  ;;  %v4410_v28 = vshll.u32 %v4344_v4, 16  ;;  %v4347_v13 = vld [vmem:[#allocation2 + $0x2c] sm:$0x1] }
 0x2c8   : > { %v5179_v35 = vunpack.c.l.b16 %v5067_v0 }
 0x2c9   : > { %v8352_v15 = vpop.f32.mrf.mxu3  ;;  %v2911_v44 = vpop.f32.mrf.mxu1  ;;  %v4393_v22 = vrot.slane %v4391_v41, 4 }
 0x2ca   : > { %9060 = vst [vmem:[#allocation23_spill] sm:$0xff] %v8352_v15  ;;  %v2972_v52 = vadd.f32 %v2911_v44, %v7926_v2  ;;  %v4406_v2 = vrot.slane %v4404_v11, 4  ;;  %v5073_v15 = vrot.slane %v4346_v10, 5  ;;  %v5001_v11 = vld [vmem:[#allocation2 + $0x24] sm:$0xe] }
 0x2cc   : > { %v8357_v33 = vadd.f32 %v3569_v1, %v2972_v52  ;;  %v5211_v1 = vpack.c.b16 %v5180_v7, %v5179_v35  ;;  %v4396_v52 = vrot.slane %v4394_v26, 5  ;;  %v5075_v0 = vrot.slane %v5073_v15, 4 }
 0x2cd   : > { %v4412_v26 = vrot.slane %v4410_v28, 5 }
 0x2ce   : > { %9061 = vst [vmem:[#allocation24_spill] sm:$0xff] %v8357_v33  ;;  %6489 = vmatmul.msk.bf16.gmra.mxu3 %vm1951_vm13, %v3875_v47  ;;  %v4407_v47 = vor.u32 %v4406_v2, %v4402_v8  ;;  %v4397_v50 = vor.u32 %v4396_v52, %v4393_v22  ;;  %v5076_v2 = vrot.slane %v4347_v13, 5 }
 0x2cf   : > { %v3574_v6 = vpop.f32.mrf.mxu2 }
 0x2d0   : > { %v4408_v9 = vrot.slane %v4407_v47, 4  ;;  %v4398_v35 = vrot.slane %v4397_v50, 4 }
 0x2d1   : > { %v3974_v54 = vpop.f32.mrf.mxu3  ;;  %v2914_v19 = vpop.f32.mrf.mxu1  ;;  %v9080_v27 = vld [vmem:[#allocation23_spill] sm:$0xff] }
 0x2d2   : > { %v2973_v44 = vadd.f32 %v2914_v19, %v7948_v25  ;;  %v6595_v19 = vrot.slane %v5001_v11, 9  ;;  %v4413_v4 = vsel %vm7389_vm1, %v4408_v9, %v4412_v26  ;;  %v4403_v22 = vsel %vm7389_vm1, %v4398_v35, %v4402_v8 }
 0x2d3   : > { %v4778_v47 = vunpack.c.l.b16 %v4413_v4 }
 0x2d4   : > { %v3631_v33 = vadd.f32 %v3572_v48, %v2973_v44  ;;  %6433 = vmatmul.msk.bf16.gmra.mxu1 %vm1951_vm13, %v6710_v16  ;;  %6614 = vmatmul.msk.bf16.vlgmr.msra.gmra.mxu2 %vm1951_vm13, %v5211_v1  ;;  %v4345_v44 = vld [vmem:[#allocation2 + $0x24] sm:$0xf]  ;;  %v4428_v16 = vshrl.u32 %v4346_v10, 16 }
 0x2d5   : > { %v4415_v52 = vshrl.u32 %v4345_v44, 16  ;;  %v4418_v50 = vshll.u32 %v4345_v44, 16 }
 0x2d6   : > { %v8365_v58 = vadd.f32 %v3974_v54, %v3631_v33  ;;  %v5077_v33 = vsel %vm7313_vm12, %v5075_v0, %v5076_v2  ;;  %v4424_v54 = vshll.u32 %v4346_v10, 16  ;;  %v4430_v9 = vrot.slane %v4428_v16, 4 }
 0x2d7   : > { %v3577_v7 = vpop.f32.mrf.mxu2  ;;  %v5182_v28 = vunpack.c.l.b16 %v5077_v33  ;;  %v4777_v0 = vunpack.c.l.b16 %v4403_v22  ;;  %v4420_v35 = vrot.slane %v4418_v50, 5  ;;  %v4434_v33 = vshll.u32 %v4347_v13, 16  ;;  %v4350_v22 = vld [vmem:[#allocation2 + $0x38] sm:$0x1] }
 0x2d8   : > { %9062 = vst [vmem:[#allocation25_spill] sm:$0xff] %v8365_v58  ;;  %v4426_v11 = vrot.slane %v4424_v54, 5  ;;  %v5083_v50 = vrot.slane %v4350_v22, 5 }
 0x2d9   : > { %v8367_v25 = vpop.f32.mrf.mxu3  ;;  %v2916_v41 = vpop.f32.mrf.mxu1  ;;  %v4809_v10 = vpack.c.b16 %v4778_v47, %v4777_v0 }
 0x2da   : > { %9063 = vst [vmem:[#allocation26_spill] sm:$0xff] %v8367_v25  ;;  %v2974_v48 = vadd.f32 %v2916_v41, %v7966_v57  ;;  %v5074_v57 = vsel %vm7313_vm12, %v6595_v19, %v5073_v15  ;;  %v4349_v25 = vld [vmem:[#allocation2 + $0x34] sm:$0xf]  ;;  %v4431_v19 = vor.u32 %v4430_v9, %v4426_v11 }
 0x2db   : > { %v5181_v2 = vunpack.c.l.b16 %v5074_v57  ;;  %v5080_v44 = vrot.slane %v4349_v25, 5 }
 0x2dc   : > { %v8374_v1 = vadd.f32 %v3574_v6, %v2974_v48  ;;  %v4417_v6 = vrot.slane %v4415_v52, 4  ;;  %v4432_v57 = vrot.slane %v4431_v19, 4 }
 0x2dd   : > { %v5212_v48 = vpack.c.b16 %v5182_v28, %v5181_v2  ;;  %v5082_v52 = vrot.slane %v5080_v44, 4  ;;  %v4436_v28 = vrot.slane %v4434_v33, 5  ;;  %v4348_v2 = vld [vmem:[#allocation2 + $0x30] sm:$0xf] }
 0x2de   : > { %9064 = vst [vmem:[#allocation27_spill] sm:$0xff] %v8374_v1  ;;  %v4421_v16 = vor.u32 %v4420_v35, %v4417_v6  ;;  %v5002_v1 = vld [vmem:[#allocation2 + $0x30] sm:$0xe]  ;;  %v4452_v6 = vshrl.u32 %v4349_v25, 16  ;;  %v4442_v19 = vshll.u32 %v4348_v2, 16 }
 0x2df   : > { %v3579_v26 = vpop.f32.mrf.mxu2  ;;  %v6596_v0 = vrot.slane %v5002_v1, 9  ;;  %v4437_v13 = vsel %vm7389_vm1, %v4432_v57, %v4436_v28  ;;  %v4352_v28 = vld [vmem:[#allocation2 + $0x40] sm:$0xf] }
 0x2e0   : > { %v4422_v9 = vrot.slane %v4421_v16, 4  ;;  %v4780_v35 = vunpack.c.l.b16 %v4437_v13  ;;  %v4454_v33 = vrot.slane %v4452_v6, 4 }
 0x2e1   : > { %v3979_v41 = vpop.f32.mrf.mxu3  ;;  %v2919_v8 = vpop.f32.mrf.mxu1 }
 0x2e2   : > { %v2975_v15 = vadd.f32 %v2919_v8, %v7975_v31  ;;  %v4448_v8 = vshll.u32 %v4349_v25, 16 }
 0x2e4   : > { %v3633_v4 = vadd.f32 %v3577_v7, %v2975_v15  ;;  %6578 = vmatmul.msk.bf16.vlgmr.msra.gmra.mxu1 %vm1951_vm13, %v4809_v10  ;;  %6615 = vmatmul.msk.bf16.gmra.mxu2 %vm1951_vm13, %v5212_v48  ;;  %v4427_v10 = vsel %vm7389_vm1, %v4422_v9, %v4426_v11  ;;  %v5081_v48 = vsel %vm7313_vm12, %v6596_v0, %v5080_v44  ;;  %v4444_v9 = vrot.slane %v4442_v19, 5 }
 0x2e5   : > { %v5087_v44 = vrot.slane %v4352_v28, 5 }
 0x2e6   : > { %v8389_v54 = vadd.f32 %v3979_v41, %v3633_v4  ;;  %v5084_v41 = vsel %vm7313_vm12, %v5082_v52, %v5083_v50  ;;  %v4450_v4 = vrot.slane %v4448_v8, 5  ;;  %v5183_v52 = vunpack.c.l.b16 %v5081_v48  ;;  %v4353_v8 = vld [vmem:[#allocation2 + $0x44] sm:$0x1] }
 0x2e7   : > { %v3582_v31 = vpop.f32.mrf.mxu2  ;;  %v5184_v1 = vunpack.c.l.b16 %v5084_v41  ;;  %v5089_v48 = vrot.slane %v5087_v44, 4  ;;  %v5090_v19 = vrot.slane %v4353_v8, 5 }
 0x2e9   : > { %v8391_v58 = vpop.f32.mrf.mxu3  ;;  %v2921_v47 = vpop.f32.mrf.mxu1  ;;  %v5213_v11 = vpack.c.b16 %v5184_v1, %v5183_v52  ;;  %v4351_v52 = vld [vmem:[#allocation2 + $0x3c] sm:$0xf] }
 0x2ea   : > { %9065 = vst [vmem:[#allocation28_spill] sm:$0xff] %v8391_v58  ;;  %v2976_v7 = vadd.f32 %v2921_v47, %v7991_v53  ;;  %v4439_v53 = vshrl.u32 %v4348_v2, 16  ;;  %v4779_v47 = vunpack.c.l.b16 %v4427_v10  ;;  %v4455_v58 = vor.u32 %v4454_v33, %v4450_v4  ;;  %v5003_v10 = vld [vmem:[#allocation2 + $0x3c] sm:$0xe] }
 0x2eb   : > { %v4458_v2 = vshll.u32 %v4350_v22, 16 }
 0x2ec   : > { %v8398_v15 = vadd.f32 %v3579_v26, %v2976_v7  ;;  %v4441_v26 = vrot.slane %v4439_v53, 4  ;;  %v4810_v7 = vpack.c.b16 %v4780_v35, %v4779_v47  ;;  %v4456_v6 = vrot.slane %v4455_v58, 4 }
 0x2ed   : > { %v4460_v1 = vrot.slane %v4458_v2, 5  ;;  %v6597_v47 = vrot.slane %v5003_v10, 9  ;;  %v4472_v58 = vshll.u32 %v4352_v28, 16 }
 0x2ee   : > { %v4445_v41 = vor.u32 %v4444_v9, %v4441_v26 }
 0x2ef   : > { %v3584_v57 = vpop.f32.mrf.mxu2  ;;  %v4461_v22 = vsel %vm7389_vm1, %v4456_v6, %v4460_v1  ;;  %v4474_v2 = vrot.slane %v4472_v58, 5  ;;  %v4355_v1 = vld [vmem:[#allocation2 + $0x4c] sm:$0xf]  ;;  %v4356_v58 = vld [vmem:[#allocation2 + $0x50] sm:$0x1] }
 0x2f0   : > { %v4446_v33 = vrot.slane %v4445_v41, 4 }
 0x2f1   : > { %v3984_v16 = vpop.f32.mrf.mxu3  ;;  %v2924_v25 = vpop.f32.mrf.mxu1 }
 0x2f2   : > { %v2977_v50 = vadd.f32 %v2924_v25, %v7998_v36  ;;  %v4476_v25 = vshrl.u32 %v4352_v28, 16 }
 0x2f4   : > { %v3635_v0 = vadd.f32 %v3582_v31, %v2977_v50  ;;  %6579 = vmatmul.msk.bf16.gmra.mxu1 %vm1951_vm13, %v4810_v7  ;;  %6616 = vmatmul.msk.bf16.gmra.mxu2 %vm1951_vm13, %v5213_v11  ;;  %v4451_v50 = vsel %vm7389_vm1, %v4446_v33, %v4450_v4  ;;  %v5088_v7 = vsel %vm7313_vm12, %v6597_v47, %v5087_v44  ;;  %v4782_v11 = vunpack.c.l.b16 %v4461_v22 }
 0x2f5   : > { %v4478_v41 = vrot.slane %v4476_v25, 4  ;;  %v5094_v44 = vrot.slane %v4355_v1, 5 }
 0x2f6   : > { %v8407_v13 = vadd.f32 %v3984_v16, %v3635_v0  ;;  %v5091_v16 = vsel %vm7313_vm12, %v5089_v48, %v5090_v19  ;;  %v4466_v0 = vshll.u32 %v4351_v52, 16  ;;  %v5185_v48 = vunpack.c.l.b16 %v5088_v7 }
 0x2f7   : > { %v3587_v36 = vpop.f32.mrf.mxu2  ;;  %v5186_v9 = vunpack.c.l.b16 %v5091_v16  ;;  %v5096_v7 = vrot.slane %v5094_v44, 4 }
 0x2f8   : > { %v4468_v33 = vrot.slane %v4466_v0, 5  ;;  %v5097_v0 = vrot.slane %v4356_v58, 5 }
 0x2f9   : > { %v8409_v53 = vpop.f32.mrf.mxu3  ;;  %v2926_v35 = vpop.f32.mrf.mxu1  ;;  %v5214_v4 = vpack.c.b16 %v5186_v9, %v5185_v48  ;;  %v4496_v48 = vshll.u32 %v4355_v1, 16 }
 0x2fa   : > { %9066 = vst [vmem:[#allocation29_spill] sm:$0xff] %v8409_v53  ;;  %v2978_v31 = vadd.f32 %v2926_v35, %v8015_v49  ;;  %v4463_v49 = vshrl.u32 %v4351_v52, 16  ;;  %v4781_v35 = vunpack.c.l.b16 %v4451_v50  ;;  %v4479_v53 = vor.u32 %v4478_v41, %v4474_v2  ;;  %v5004_v50 = vld [vmem:[#allocation2 + $0x48] sm:$0xe] }
 0x2fb   : > { %v4482_v52 = vshll.u32 %v4353_v8, 16 }
 0x2fc   : > { %v8416_v26 = vadd.f32 %v3584_v57, %v2978_v31  ;;  %v4465_v57 = vrot.slane %v4463_v49, 4  ;;  %v4811_v31 = vpack.c.b16 %v4782_v11, %v4781_v35  ;;  %v4480_v25 = vrot.slane %v4479_v53, 4 }
 0x2fd   : > { %v4484_v9 = vrot.slane %v4482_v52, 5  ;;  %v6598_v35 = vrot.slane %v5004_v50, 9  ;;  %v4500_v53 = vshrl.u32 %v4355_v1, 16  ;;  %v4498_v52 = vrot.slane %v4496_v48, 5  ;;  %v4358_v1 = vld [vmem:[#allocation2 + $0x58] sm:$0xf] }
 0x2fe   : > { %v4469_v16 = vor.u32 %v4468_v33, %v4465_v57  ;;  %v4354_v57 = vld [vmem:[#allocation2 + $0x48] sm:$0xf]  ;;  %v4359_v48 = vld [vmem:[#allocation2 + $0x5c] sm:$0x1] }
 0x2ff   : > { %v3589_v10 = vpop.f32.mrf.mxu2  ;;  %v4485_v8 = vsel %vm7389_vm1, %v4480_v25, %v4484_v9  ;;  %v4487_v33 = vshrl.u32 %v4354_v57, 16 }
 0x300   : > { %v4470_v41 = vrot.slane %v4469_v16, 4  ;;  %v4502_v16 = vrot.slane %v4500_v53, 4 }
 0x301   : > { %v3989_v6 = vpop.f32.mrf.mxu3  ;;  %v2929_v28 = vpop.f32.mrf.mxu1 }
 0x302   : > { %v2979_v19 = vadd.f32 %v2929_v28, %v8025_v42 }
 0x304   : > { %v3637_v47 = vadd.f32 %v3587_v36, %v2979_v19  ;;  %6580 = vmatmul.msk.bf16.gmra.mxu1 %vm1951_vm13, %v4811_v31  ;;  %6617 = vmatmul.msk.bf16.gmra.mxu2 %vm1951_vm13, %v5214_v4  ;;  %v4475_v19 = vsel %vm7389_vm1, %v4470_v41, %v4474_v2  ;;  %v5095_v31 = vsel %vm7313_vm12, %v6598_v35, %v5094_v44  ;;  %v4489_v2 = vrot.slane %v4487_v33, 4 }
 0x305   : > { %v5101_v44 = vrot.slane %v4358_v1, 5 }
 0x306   : > { %v8425_v22 = vadd.f32 %v3989_v6, %v3637_v47  ;;  %v5098_v6 = vsel %vm7313_vm12, %v5096_v7, %v5097_v0  ;;  %v4490_v47 = vshll.u32 %v4354_v57, 16  ;;  %v4783_v7 = vunpack.c.l.b16 %v4475_v19 }
 0x307   : > { %v3592_v42 = vpop.f32.mrf.mxu2  ;;  %v5188_v4 = vunpack.c.l.b16 %v5098_v6  ;;  %v5103_v19 = vrot.slane %v5101_v44, 4 }
 0x308   : > { %v4492_v41 = vrot.slane %v4490_v47, 5  ;;  %v5104_v47 = vrot.slane %v4359_v48, 5 }
 0x309   : > { %v8427_v49 = vpop.f32.mrf.mxu3  ;;  %v2931_v11 = vpop.f32.mrf.mxu1 }
 0x30a   : > { %9067 = vst [vmem:[#allocation30_spill] sm:$0xff] %v8427_v49  ;;  %v2980_v36 = vadd.f32 %v2931_v11, %v8042_v23  ;;  %v4784_v23 = vunpack.c.l.b16 %v4485_v8  ;;  %v5187_v11 = vunpack.c.l.b16 %v5095_v31  ;;  %v4503_v49 = vor.u32 %v4502_v16, %v4498_v52  ;;  %v4357_v16 = vld [vmem:[#allocation2 + $0x54] sm:$0xf] }
 0x30b   : > { %v4506_v8 = vshll.u32 %v4356_v58, 16  ;;  %v4493_v53 = vor.u32 %v4492_v41, %v4489_v2  ;;  %v4514_v2 = vshll.u32 %v4357_v16, 16 }
 0x30c   : > { %v8434_v28 = vadd.f32 %v3589_v10, %v2980_v36  ;;  %v4812_v0 = vpack.c.b16 %v4784_v23, %v4783_v7  ;;  %v5215_v36 = vpack.c.b16 %v5188_v4, %v5187_v11  ;;  %v4504_v57 = vrot.slane %v4503_v49, 4  ;;  %v5005_v23 = vld [vmem:[#allocation2 + $0x54] sm:$0xe] }
 0x30d   : > { %v4508_v33 = vrot.slane %v4506_v8, 5  ;;  %v4520_v7 = vshll.u32 %v4358_v1, 16  ;;  %v4524_v11 = vshrl.u32 %v4358_v1, 16  ;;  %v5105_v49 = vsel %vm7313_vm12, %v5103_v19, %v5104_v47 }
 0x30e   : > { %v5190_v1 = vunpack.c.l.b16 %v5105_v49  ;;  %v4516_v47 = vrot.slane %v4514_v2, 5  ;;  %v4362_v49 = vld [vmem:[#allocation2 + $0x68] sm:$0x1]  ;;  %v5006_v2 = vld [vmem:[#allocation2 + $0x60] sm:$0xe] }
 0x30f   : > { %v3594_v50 = vpop.f32.mrf.mxu2  ;;  %v4509_v58 = vsel %vm7389_vm1, %v4504_v57, %v4508_v33  ;;  %v4526_v8 = vrot.slane %v4524_v11, 4  ;;  %v4361_v33 = vld [vmem:[#allocation2 + $0x64] sm:$0xf] }
 0x310   : > { %v4786_v41 = vunpack.c.l.b16 %v4509_v58 }
 0x311   : > { %v3994_v25 = vpop.f32.mrf.mxu3  ;;  %v2934_v10 = vpop.f32.mrf.mxu1 }
 0x312   : > { %v2981_v9 = vadd.f32 %v2934_v10, %v8052_v56  ;;  %v4494_v10 = vrot.slane %v4493_v53, 4 }
 0x314   : > { %v3639_v35 = vadd.f32 %v3592_v42, %v2981_v9  ;;  %6581 = vmatmul.msk.bf16.gmra.mxu1 %vm1951_vm13, %v4812_v0  ;;  %6618 = vmatmul.msk.bf16.gmra.mxu2 %vm1951_vm13, %v5215_v36  ;;  %v4499_v0 = vsel %vm7389_vm1, %v4494_v10, %v4498_v52 }
 0x316   : > { %v8443_v6 = vadd.f32 %v3994_v25, %v3639_v35  ;;  %v6599_v25 = vrot.slane %v5005_v23, 9  ;;  %v4522_v35 = vrot.slane %v4520_v7, 5  ;;  %v4785_v23 = vunpack.c.l.b16 %v4499_v0 }
 0x317   : > { %v3597_v56 = vpop.f32.mrf.mxu2 }
 0x318   : > { %v5102_v36 = vsel %vm7313_vm12, %v6599_v25, %v5101_v44  ;;  %v4813_v52 = vpack.c.b16 %v4786_v41, %v4785_v23  ;;  %v5108_v44 = vrot.slane %v4361_v33, 5 }
 0x319   : > { %v8445_v31 = vpop.f32.mrf.mxu3  ;;  %v2936_v4 = vpop.f32.mrf.mxu1 }
 0x31a   : > { %9068 = vst [vmem:[#allocation31_spill] sm:$0xff] %v8445_v31  ;;  %v2982_v42 = vadd.f32 %v2936_v4, %v8069_v5  ;;  %v4511_v5 = vshrl.u32 %v4357_v16, 16  ;;  %v5189_v4 = vunpack.c.l.b16 %v5102_v36  ;;  %v4527_v31 = vor.u32 %v4526_v8, %v4522_v35 }
 0x31b   : > { %v4530_v16 = vshll.u32 %v4359_v48, 16  ;;  %v5110_v0 = vrot.slane %v5108_v44, 4  ;;  %v5111_v8 = vrot.slane %v4362_v49, 5  ;;  %v4360_v48 = vld [vmem:[#allocation2 + $0x60] sm:$0xf] }
 0x31c   : > { %v8452_v9 = vadd.f32 %v3594_v50, %v2982_v42  ;;  %v4513_v50 = vrot.slane %v4511_v5, 4  ;;  %v5216_v10 = vpack.c.b16 %v5190_v1, %v5189_v4  ;;  %v4528_v58 = vrot.slane %v4527_v31, 4 }
 0x31d   : > { %v4544_v4 = vshll.u32 %v4361_v33, 16  ;;  %v5112_v31 = vsel %vm7313_vm12, %v5110_v0, %v5111_v8 }
 0x31e   : > { %v4517_v7 = vor.u32 %v4516_v47, %v4513_v50 }
 0x31f   : > { %v3599_v57 = vpop.f32.mrf.mxu2 }
 0x320   : > { %v4518_v1 = vrot.slane %v4517_v7, 4 }
 0x321   : > { %v3999_v53 = vpop.f32.mrf.mxu3  ;;  %v2939_v19 = vpop.f32.mrf.mxu1 }
 0x322   : > { %v2983_v42 = vadd.f32 %v2939_v19, %v8079_v20  ;;  %v4532_v20 = vrot.slane %v4530_v16, 5  ;;  %v6600_v19 = vrot.slane %v5006_v2, 9  ;;  %v4523_v47 = vsel %vm7389_vm1, %v4518_v1, %v4522_v35 }
 0x323   : > { %v4546_v16 = vrot.slane %v4544_v4, 5 }
 0x324   : > { %v3641_v25 = vadd.f32 %v3597_v56, %v2983_v42  ;;  %6582 = vmatmul.msk.bf16.gmra.mxu1 %vm1951_vm13, %v4813_v52  ;;  %6619 = vmatmul.msk.bf16.gmra.mxu2 %vm1951_vm13, %v5216_v10  ;;  %v4533_v23 = vsel %vm7389_vm1, %v4528_v58, %v4532_v20  ;;  %v5109_v52 = vsel %vm7313_vm12, %v6600_v19, %v5108_v44  ;;  %v5192_v10 = vunpack.c.l.b16 %v5112_v31  ;;  %v4365_v31 = vld [vmem:[#allocation2 + $0x74] sm:$0x1] }
 0x325   : > { %v4788_v42 = vunpack.c.l.b16 %v4533_v23  ;;  %v4787_v58 = vunpack.c.l.b16 %v4523_v47  ;;  %v5191_v2 = vunpack.c.l.b16 %v5109_v52 }
 0x326   : > { %v8461_v11 = vadd.f32 %v3999_v53, %v3641_v25  ;;  %v4548_v53 = vshrl.u32 %v4361_v33, 16  ;;  %v4538_v25 = vshll.u32 %v4360_v48, 16 }
 0x327   : > { %v3602_v5 = vpop.f32.mrf.mxu2  ;;  %v5217_v35 = vpack.c.b16 %v5192_v10, %v5191_v2  ;;  %v4363_v2 = vld [vmem:[#allocation2 + $0x6c] sm:$0xf] }
 0x328   : > { %v4550_v7 = vrot.slane %v4548_v53, 4  ;;  %v4540_v1 = vrot.slane %v4538_v25, 5  ;;  %v5118_v25 = vrot.slane %v4365_v31, 5 }
 0x329   : > { %v8463_v36 = vpop.f32.mrf.mxu3  ;;  %v2941_v41 = vpop.f32.mrf.mxu1 }
 0x32a   : > { %9069 = vst [vmem:[#allocation32_spill] sm:$0xff] %v8463_v36  ;;  %v2984_v56 = vadd.f32 %v2941_v41, %v8096_v62  ;;  %v4535_v62 = vshrl.u32 %v4360_v48, 16  ;;  %v4364_v41 = vld [vmem:[#allocation2 + $0x70] sm:$0xf]  ;;  %v4551_v23 = vor.u32 %v4550_v7, %v4546_v16  ;;  %v4554_v48 = vshll.u32 %v4362_v49, 16 }
 0x32b   : > { %v5115_v36 = vrot.slane %v4364_v41, 5 }
 0x32c   : > { %v8470_v50 = vadd.f32 %v3599_v57, %v2984_v56  ;;  %v4814_v57 = vpack.c.b16 %v4788_v42, %v4787_v58  ;;  %v4537_v8 = vrot.slane %v4535_v62, 4  ;;  %v4552_v19 = vrot.slane %v4551_v23, 4  ;;  %v5007_v62 = vld [vmem:[#allocation2 + $0x6c] sm:$0xe] }
 0x32d   : > { %v5117_v47 = vrot.slane %v5115_v36, 4  ;;  %v6601_v49 = vrot.slane %v5007_v62, 9  ;;  %v4559_v23 = vshrl.u32 %v4363_v2, 16  ;;  %v4367_v62 = vld [vmem:[#allocation2 + $0x7c] sm:$0xf] }
 0x32e   : > { %v4541_v53 = vor.u32 %v4540_v1, %v4537_v8 }
 0x32f   : > { %v3604_v20 = vpop.f32.mrf.mxu2 }
 0x330   : > { %v4542_v7 = vrot.slane %v4541_v53, 4 }
 0x331   : > { %v4004_v33 = vpop.f32.mrf.mxu3  ;;  %v2944_v0 = vpop.f32.mrf.mxu1 }
 0x332   : > { %v2985_v56 = vadd.f32 %v2944_v0, %v8106_v46  ;;  %v4556_v46 = vrot.slane %v4554_v48, 5  ;;  %v4568_v0 = vshll.u32 %v4364_v41, 16 }
 0x334   : > { %v3643_v44 = vadd.f32 %v3602_v5, %v2985_v56  ;;  %6583 = vmatmul.msk.bf16.gmra.mxu1 %vm1951_vm13, %v4814_v57  ;;  %6620 = vmatmul.msk.bf16.gmra.mxu2 %vm1951_vm13, %v5217_v35  ;;  %v4557_v58 = vsel %vm7389_vm1, %v4552_v19, %v4556_v46  ;;  %v4572_v57 = vshrl.u32 %v4364_v41, 16  ;;  %v4547_v56 = vsel %vm7389_vm1, %v4542_v7, %v4546_v16 }
 0x335   : > { %v4790_v35 = vunpack.c.l.b16 %v4557_v58  ;;  %v4789_v48 = vunpack.c.l.b16 %v4547_v56  ;;  %v4570_v53 = vrot.slane %v4568_v0, 5  ;;  %v4561_v16 = vrot.slane %v4559_v23, 4  ;;  %v4368_v0 = vld [vmem:[#allocation2 + $0x80] sm:$0x1]  ;;  %v5008_v56 = vld [vmem:[#allocation2 + $0x78] sm:$0xe] }
 0x336   : > { %v8479_v4 = vadd.f32 %v4004_v33, %v3643_v44  ;;  %v5119_v33 = vsel %vm7313_vm12, %v5117_v47, %v5118_v25  ;;  %v4562_v44 = vshll.u32 %v4363_v2, 16  ;;  %v4574_v19 = vrot.slane %v4572_v57, 4 }
 0x337   : > { %v3607_v52 = vpop.f32.mrf.mxu2  ;;  %v5194_v1 = vunpack.c.l.b16 %v5119_v33  ;;  %v5125_v23 = vrot.slane %v4368_v0, 5 }
 0x338   : > { %v4564_v7 = vrot.slane %v4562_v44, 5  ;;  %v4575_v58 = vor.u32 %v4574_v19, %v4570_v53 }
 0x339   : > { %v8481_v42 = vpop.f32.mrf.mxu3  ;;  %v2946_v10 = vpop.f32.mrf.mxu1 }
 0x33a   : > { %9070 = vst [vmem:[#allocation33_spill] sm:$0xff] %v8481_v42  ;;  %v2986_v5 = vadd.f32 %v2946_v10, %v8123_v34  ;;  %v5116_v34 = vsel %vm7313_vm12, %v6601_v49, %v5115_v36  ;;  %v5122_v42 = vrot.slane %v4367_v62, 5  ;;  %v4578_v49 = vshll.u32 %v4365_v31, 16 }
 0x33b   : > { %v5193_v47 = vunpack.c.l.b16 %v5116_v34  ;;  %v4565_v2 = vor.u32 %v4564_v7, %v4561_v16  ;;  %v4576_v57 = vrot.slane %v4575_v58, 4 }
 0x33c   : > { %v8488_v8 = vadd.f32 %v3604_v20, %v2986_v5  ;;  %v4815_v20 = vpack.c.b16 %v4790_v35, %v4789_v48  ;;  %v5124_v35 = vrot.slane %v5122_v42, 4 }
 0x33d   : > { %v5218_v5 = vpack.c.b16 %v5194_v1, %v5193_v47  ;;  %v4580_v1 = vrot.slane %v4578_v49, 5  ;;  %v4566_v48 = vrot.slane %v4565_v2, 4 }
 0x33e   : > { %v5126_v47 = vsel %vm7313_vm12, %v5124_v35, %v5125_v23 }
 0x33f   : > { %v3609_v46 = vpop.f32.mrf.mxu2  ;;  %v4581_v31 = vsel %vm7389_vm1, %v4576_v57, %v4580_v1  ;;  %v5196_v7 = vunpack.c.l.b16 %v5126_v47 }
 0x340   : > { %v4792_v16 = vunpack.c.l.b16 %v4581_v31  ;;  %v4602_v31 = vshll.u32 %v4368_v0, 16 }
 0x341   : > { %v2949_v10 = vpop.f32.mrf.mxu1  ;;  %v4009_v41 = vpop.f32.mrf.mxu3 }
 0x342   : > { %v2987_v25 = vadd.f32 %v2949_v10, %v8133_v18  ;;  %v4592_v10 = vshll.u32 %v4367_v62, 16 }
 0x344   : > { %v3645_v36 = vadd.f32 %v3607_v52, %v2987_v25  ;;  %6584 = vmatmul.msk.bf16.gmra.mxu1 %vm1951_vm13, %v4815_v20  ;;  %6621 = vmatmul.msk.bf16.gmra.mxu2 %vm1951_vm13, %v5218_v5  ;;  %v6602_v52 = vrot.slane %v5008_v56, 9  ;;  %v4366_v25 = vld [vmem:[#allocation2 + $0x78] sm:$0xf]  ;;  %v4571_v5 = vsel %vm7389_vm1, %v4566_v48, %v4570_v53  ;;  %v4594_v49 = vrot.slane %v4592_v10, 5  ;;  %v4371_v10 = vld [vmem:[#allocation2 + $0x8c] sm:$0x1] }
 0x345   : > { %v4583_v58 = vshrl.u32 %v4366_v25, 16  ;;  %v4791_v56 = vunpack.c.l.b16 %v4571_v5  ;;  %v5009_v5 = vld [vmem:[#allocation2 + $0x84] sm:$0xe] }
 0x346   : > { %v8497_v33 = vadd.f32 %v4009_v41, %v3645_v36  ;;  %v4596_v41 = vshrl.u32 %v4367_v62, 16  ;;  %v4586_v36 = vshll.u32 %v4366_v25, 16 }
 0x347   : > { %v3612_v34 = vpop.f32.mrf.mxu2  ;;  %v4816_v1 = vpack.c.b16 %v4792_v16, %v4791_v56 }
 0x348   : > { %v4598_v2 = vrot.slane %v4596_v41, 4  ;;  %v4588_v53 = vrot.slane %v4586_v36, 5  ;;  %v4369_v36 = vld [vmem:[#allocation2 + $0x84] sm:$0xf] }
 0x349   : > { %v2951_v18 = vpop.f32.mrf.mxu1  ;;  %v8500_v19 = vpop.f32.mrf.mxu3 }
 0x34a   : > { %v2988_v44 = vadd.f32 %v2951_v18, %v8150_v39  ;;  %9071 = vst [vmem:[#allocation34_spill] sm:$0xff] %v8500_v19  ;;  %v5123_v39 = vsel %vm7313_vm12, %v6602_v52, %v5122_v42  ;;  %v4370_v18 = vld [vmem:[#allocation2 + $0x88] sm:$0xf]  ;;  %v4599_v48 = vor.u32 %v4598_v2, %v4594_v49 }
 0x34b   : > { %v5195_v35 = vunpack.c.l.b16 %v5123_v39  ;;  %v5129_v19 = vrot.slane %v4370_v18, 5  ;;  %v4616_v2 = vshll.u32 %v4370_v18, 16 }
 0x34c   : > { %v8506_v20 = vadd.f32 %v3609_v46, %v2988_v44  ;;  %v4585_v44 = vrot.slane %v4583_v58, 4  ;;  %v4600_v25 = vrot.slane %v4599_v48, 4  ;;  %v5132_v58 = vrot.slane %v4371_v10, 5 }
 0x34d   : > { %v5219_v23 = vpack.c.b16 %v5196_v7, %v5195_v35  ;;  %v4604_v7 = vrot.slane %v4602_v31, 5  ;;  %v6603_v35 = vrot.slane %v5009_v5, 9  ;;  %v4618_v48 = vrot.slane %v4616_v2, 5  ;;  %v4373_v31 = vld [vmem:[#allocation2 + $0x94] sm:$0xf] }
 0x34e   : > { %v4589_v41 = vor.u32 %v4588_v53, %v4585_v44  ;;  %v4607_v44 = vshrl.u32 %v4369_v36, 16  ;;  %v4626_v2 = vshll.u32 %v4371_v10, 16 }
 0x34f   : > { %v3614_v57 = vpop.f32.mrf.mxu2  ;;  %v4605_v0 = vsel %vm7389_vm1, %v4600_v25, %v4604_v7 }
 0x351   : > { %v2954_v62 = vpop.f32.mrf.mxu1  ;;  %v4014_v52 = vpop.f32.mrf.mxu3 }
 0x352   : > { %v2989_v46 = vadd.f32 %v2954_v62, %v8160_v43  ;;  %v5131_v43 = vrot.slane %v5129_v19, 4  ;;  %v4590_v62 = vrot.slane %v4589_v41, 4  ;;  %v4310_v41 = vadd.f32 %v8228_v63, %v8189_v37  ;;  %v4374_v37 = vld [vmem:[#allocation2 + $0x98] sm:$0x1] }
 0x354   : > { %v3647_v42 = vadd.f32 %v3612_v34, %v2989_v46  ;;  %6585 = vmatmul.msk.bf16.gmra.mxu1 %vm1951_vm13, %v4816_v1  ;;  %6622 = vmatmul.msk.bf16.gmra.mxu2 %vm1951_vm13, %v5219_v23  ;;  %v4620_v34 = vshrl.u32 %v4370_v18, 16  ;;  %v5133_v46 = vsel %vm7313_vm12, %v5131_v43, %v5132_v58  ;;  %v5130_v23 = vsel %vm7313_vm12, %v6603_v35, %v5129_v19 }
 0x355   : > { %v4595_v53 = vsel %vm7389_vm1, %v4590_v62, %v4594_v49  ;;  %v4610_v18 = vshll.u32 %v4369_v36, 16  ;;  %v5136_v36 = vrot.slane %v4373_v31, 5  ;;  %v8533_v62 = vld [vmem:[%s8384_s22] ss:$0 sm:$0xff] }
 0x356   : > { %v8515_v47 = vadd.f32 %v4014_v52, %v3647_v42  ;;  %v4794_v42 = vunpack.c.l.b16 %v4605_v0  ;;  %v5198_v52 = vunpack.c.l.b16 %v5133_v46  ;;  %v4793_v25 = vunpack.c.l.b16 %v4595_v53  ;;  %v5010_v0 = vld [vmem:[#allocation2 + $0x90] sm:$0xe] }
 0x357   : > { %v5290_v39 = vpop.f32.mrf.mxu2  ;;  %v4612_v19 = vrot.slane %v4610_v18, 5  ;;  %v5138_v46 = vrot.slane %v5136_v36, 4  ;;  %v5139_v18 = vrot.slane %v4374_v37, 5 }
 0x359   : > { %v2956_v16 = vpop.f32.mrf.mxu1 }
 0x35a   : > { %v2990_v56 = vadd.f32 %v2956_v16, %v8177_v61  ;;  %v4622_v61 = vrot.slane %v4620_v34, 4  ;;  %v4609_v16 = vrot.slane %v4607_v44, 4  ;;  %v4311_v44 = vadd.f32 %v8242_v29, %v8203_v59  ;;  %v4372_v29 = vld [vmem:[#allocation2 + $0x90] sm:$0xf] }
 0x35b   : > { %v5140_v59 = vsel %vm7313_vm12, %v5138_v46, %v5139_v18 }
 0x35c   : > { %v8522_v1 = vadd.f32 %v3614_v57, %v2990_v56  ;;  %v5197_v57 = vunpack.c.l.b16 %v5130_v23  ;;  %v4623_v7 = vor.u32 %v4622_v61, %v4618_v48  ;;  %v4817_v56 = vpack.c.b16 %v4794_v42, %v4793_v25 }
 0x35d   : > { %v4613_v34 = vor.u32 %v4612_v19, %v4609_v16  ;;  %v4628_v23 = vrot.slane %v4626_v2, 5  ;;  %v4634_v2 = vshll.u32 %v4372_v29, 16 }
 0x35e   : > { %v5220_v49 = vpack.c.b16 %v5198_v52, %v5197_v57  ;;  %v4624_v35 = vrot.slane %v4623_v7, 4  ;;  %v6604_v52 = vrot.slane %v5010_v0, 9 }
 0x35f   : > { %v5292_v5 = vpop.f32.mrf.mxu2  ;;  %v4614_v10 = vrot.slane %v4613_v34, 4 }
 0x360   : > { %v4629_v42 = vsel %vm7389_vm1, %v4624_v35, %v4628_v23  ;;  %v5137_v7 = vsel %vm7313_vm12, %v6604_v52, %v5136_v36  ;;  %v4636_v52 = vrot.slane %v4634_v2, 5 }
 0x361   : > { %v4888_v43 = vpop.f32.mrf.mxu1  ;;  %v4619_v19 = vsel %vm7389_vm1, %v4614_v10, %v4618_v48  ;;  %v5199_v23 = vunpack.c.l.b16 %v5137_v7  ;;  %v4312_v48 = vadd.f32 %v8256_v12, %v8212_v14  ;;  %v4377_v7 = vld [vmem:[#allocation2 + $0xa4] sm:$0x1] }
 0x362   : > { %v4968_v58 = vadd.f32 %v4888_v43, %v4310_v41  ;;  %v4640_v41 = vshll.u32 %v4373_v31, 16  ;;  %v4644_v43 = vshrl.u32 %v4373_v31, 16  ;;  %v4795_v46 = vunpack.c.l.b16 %v4619_v19  ;;  %v8553_v31 = vpop.f32.mrf.mxu0 }
 0x364   : > { %6586 = vmatmul.msk.bf16.gmra.mxu1 %vm1951_vm13, %v4817_v56  ;;  %6623 = vmatmul.msk.bf16.gmra.mxu2 %vm1951_vm13, %v5220_v49  ;;  %v5370_v63 = vadd.f32 %v5290_v39, %v4968_v58  ;;  %v8543_v39 = vld [vmem:[%s9016_s6] ss:$0 sm:$0xff]  ;;  %v4796_v58 = vunpack.c.l.b16 %v4629_v42  ;;  %v5200_v56 = vunpack.c.l.b16 %v5140_v59  ;;  %v4631_v49 = vshrl.u32 %v4372_v29, 16 }
 0x365   : > { %v4646_v0 = vrot.slane %v4644_v43, 4 }
 0x366   : > { %v5406_v25 = vmul.f32 %v8533_v62, %v5370_v63  ;;  %v4642_v63 = vrot.slane %v4640_v41, 5  ;;  %v5221_v10 = vpack.c.b16 %v5200_v56, %v5199_v23  ;;  %v4633_v42 = vrot.slane %v4631_v49, 4  ;;  %v9072_v56 = vld [vmem:[#allocation17_spill] sm:$0xff]  ;;  %v4375_v23 = vld [vmem:[#allocation2 + $0x9c] sm:$0xf] }
 0x367   : > { %v5295_v53 = vpop.f32.mrf.mxu2  ;;  %v4313_v49 = vadd.f32 %v8275_v51, %v9072_v56 }
 0x368   : > { %v5442_v34 = vadd.f32 %v8543_v39, %v5406_v25  ;;  %v4647_v59 = vor.u32 %v4646_v0, %v4642_v63  ;;  %v4637_v14 = vor.u32 %v4636_v52, %v4633_v42 }
 0x369   : > { %v4890_v61 = vpop.f32.mrf.mxu1 }
 0x36a   : > { %v4969_v57 = vadd.f32 %v4890_v61, %v4311_v44  ;;  %v4376_v44 = vld [vmem:[#allocation2 + $0xa0] sm:$0xf]  ;;  %v4818_v61 = vpack.c.b16 %v4796_v58, %v4795_v46  ;;  %v5474_v25 = vmax.f32 %v5442_v34, 0.0  ;;  %v4648_v12 = vrot.slane %v4647_v59, 4 }
 0x36b   : > { %v5143_v29 = vrot.slane %v4376_v44, 5  ;;  %v5146_v46 = vrot.slane %v4377_v7, 5 }
 0x36c   : > { %v5371_v16 = vadd.f32 %v5292_v5, %v4969_v57 }
 0x36d   : > { %v5145_v58 = vrot.slane %v5143_v29, 4 }
 0x36e   : > { %v5407_v35 = vmul.f32 %v8533_v62, %v5371_v16  ;;  %v4650_v16 = vshll.u32 %v4374_v37, 16 }
 0x36f   : > { %v5297_v36 = vpop.f32.mrf.mxu2  ;;  %v5147_v51 = vsel %vm7313_vm12, %v5145_v58, %v5146_v46 }
 0x370   : > { %v5443_v5 = vadd.f32 %v8543_v39, %v5407_v35  ;;  %v4652_v34 = vrot.slane %v4650_v16, 5  ;;  %v5011_v35 = vld [vmem:[#allocation2 + $0x9c] sm:$0xe] }
 0x371   : > { %v4893_v18 = vpop.f32.mrf.mxu1  ;;  %v6605_v42 = vrot.slane %v5011_v35, 9  ;;  %v4379_v35 = vld [vmem:[#allocation2 + $0xac] sm:$0xf] }
 0x372   : > { %v5475_v57 = vmax.f32 %v5443_v5, 0.0  ;;  %v4970_v41 = vadd.f32 %v4893_v18, %v4312_v48  ;;  %v4664_v5 = vshll.u32 %v4376_v44, 16  ;;  %v4668_v48 = vshrl.u32 %v4376_v44, 16  ;;  %v8563_v18 = vpop.f32.mrf.mxu0 }
 0x373   : > { %v5144_v59 = vsel %vm7313_vm12, %v6605_v42, %v5143_v29 }
 0x374   : > { %v5506_v43 = vpack.c.bf16 %v5475_v57, %v5474_v25  ;;  %6587 = vmatmul.msk.bf16.gmra.mxu1 %vm1951_vm13, %v4818_v61  ;;  %6624 = vmatmul.msk.bf16.gmra.mxu2 %vm1951_vm13, %v5221_v10  ;;  %v5372_v19 = vadd.f32 %v5295_v53, %v4970_v41  ;;  %v4638_v61 = vrot.slane %v4637_v14, 4  ;;  %v4653_v10 = vsel %vm7389_vm1, %v4648_v12, %v4652_v34 }
 0x375   : > { %v4655_v57 = vshrl.u32 %v4375_v23, 16  ;;  %v4658_v41 = vshll.u32 %v4375_v23, 16  ;;  %v4798_v44 = vunpack.c.l.b16 %v4653_v10  ;;  %v4670_v16 = vrot.slane %v4668_v48, 4 }
 0x376   : > { %6634 = vmatmul.msk.bf16.vlgmr.msra.gmra.mxu3 %vm1951_vm13, %v5506_v43  ;;  %v5408_v37 = vmul.f32 %v8533_v62, %v5372_v19  ;;  %v4643_v25 = vsel %vm7389_vm1, %v4638_v61, %v4642_v63  ;;  %v4666_v43 = vrot.slane %v4664_v5, 5  ;;  %v5202_v12 = vunpack.c.l.b16 %v5147_v51 }
 0x377   : > { %v5300_v2 = vpop.f32.mrf.mxu2  ;;  %v4797_v56 = vunpack.c.l.b16 %v4643_v25  ;;  %v5201_v34 = vunpack.c.l.b16 %v5144_v59  ;;  %v4657_v23 = vrot.slane %v4655_v57, 4  ;;  %v4660_v29 = vrot.slane %v4658_v41, 5  ;;  %v4380_v41 = vld [vmem:[#allocation2 + $0xb0] sm:$0x1] }
 0x378   : > { %v5444_v19 = vadd.f32 %v8543_v39, %v5408_v37  ;;  %v4671_v5 = vor.u32 %v4670_v16, %v4666_v43  ;;  %v5150_v10 = vrot.slane %v4379_v35, 5  ;;  %v4315_v59 = vadd.f32 %v8312_v21, %v8253_v55 }
 0x379   : > { %v4895_v0 = vpop.f32.mrf.mxu1  ;;  %v4819_v46 = vpack.c.b16 %v4798_v44, %v4797_v56  ;;  %v5222_v61 = vpack.c.b16 %v5202_v12, %v5201_v34  ;;  %v4661_v25 = vor.u32 %v4660_v29, %v4657_v23  ;;  %v5153_v56 = vrot.slane %v4380_v41, 5 }
 0x37a   : > { %v4971_v53 = vadd.f32 %v4895_v0, %v4313_v49  ;;  %v5476_v48 = vmax.f32 %v5444_v19, 0.0  ;;  %v8579_v42 = vpop.f32.mrf.mxu0  ;;  %v4672_v57 = vrot.slane %v4671_v5, 4  ;;  %v5152_v44 = vrot.slane %v5150_v10, 4 }
 0x37b   : > { %v4662_v34 = vrot.slane %v4661_v25, 4 }
 0x37c   : > { %v5373_v52 = vadd.f32 %v5297_v36, %v4971_v53  ;;  %v9073_v36 = vld [vmem:[#allocation18_spill] sm:$0xff]  ;;  %v5154_v23 = vsel %vm7313_vm12, %v5152_v44, %v5153_v56 }
 0x37d   : > { %v4314_v49 = vadd.f32 %v8295_v3, %v9073_v36  ;;  %v4674_v3 = vshll.u32 %v4377_v7, 16  ;;  %v4688_v36 = vshll.u32 %v4379_v35, 16  ;;  %v4667_v21 = vsel %vm7389_vm1, %v4662_v34, %v4666_v43 }
 0x37e   : > { %v5409_v14 = vmul.f32 %v8533_v62, %v5373_v52  ;;  %v4799_v25 = vunpack.c.l.b16 %v4667_v21  ;;  %v8605_v21 = vld [vmem:[#allocation2 + $0xbc] sm:$0x1] }
 0x37f   : > { %v5302_v63 = vpop.f32.mrf.mxu2  ;;  %v4676_v19 = vrot.slane %v4674_v3, 5 }
 0x380   : > { %v5445_v58 = vadd.f32 %v8543_v39, %v5409_v14  ;;  %v5012_v14 = vld [vmem:[#allocation2 + $0xa8] sm:$0xe] }
 0x381   : > { %v4898_v0 = vpop.f32.mrf.mxu1 }
 0x382   : > { %v5477_v53 = vmax.f32 %v5445_v58, 0.0  ;;  %v4972_v37 = vadd.f32 %v4898_v0, %v4314_v49  ;;  %v4378_v58 = vld [vmem:[#allocation2 + $0xa8] sm:$0xf]  ;;  %v4692_v49 = vshrl.u32 %v4379_v35, 16  ;;  %v4677_v0 = vsel %vm7389_vm1, %v4672_v57, %v4676_v19  ;;  %v9074_v57 = vld [vmem:[#allocation19_spill] sm:$0xff] }
 0x383   : > { %v4679_v29 = vshrl.u32 %v4378_v58, 16  ;;  %v4682_v5 = vshll.u32 %v4378_v58, 16  ;;  %v4316_v43 = vadd.f32 %v8334_v30, %v9074_v57  ;;  %v4382_v19 = vld [vmem:[#allocation2 + $0xb8] sm:$0xf] }
 0x384   : > { %6588 = vmatmul.msk.bf16.gmra.mxu1 %vm1951_vm13, %v4819_v46  ;;  %v5507_v51 = vpack.c.bf16 %v5477_v53, %v5476_v48  ;;  %6625 = vmatmul.msk.bf16.gmra.mxu2 %vm1951_vm13, %v5222_v61  ;;  %v5374_v52 = vadd.f32 %v5300_v2, %v4972_v37  ;;  %v6606_v46 = vrot.slane %v5012_v14, 9  ;;  %v4800_v48 = vunpack.c.l.b16 %v4677_v0  ;;  %v8595_v61 = vpop.f32.mrf.mxu0 }
 0x385   : > { %v4690_v53 = vrot.slane %v4688_v36, 5  ;;  %v4694_v37 = vrot.slane %v4692_v49, 4  ;;  %v4684_v56 = vrot.slane %v4682_v5, 5  ;;  %v5157_v34 = vrot.slane %v4382_v19, 5 }
 0x386   : > { %6635 = vmatmul.msk.bf16.gmra.mxu3 %vm1951_vm13, %v5507_v51  ;;  %v5410_v7 = vmul.f32 %v8533_v62, %v5374_v52  ;;  %v5151_v35 = vsel %vm7313_vm12, %v6606_v46, %v5150_v10  ;;  %v5204_v52 = vunpack.c.l.b16 %v5154_v23  ;;  %v4820_v10 = vpack.c.b16 %v4800_v48, %v4799_v25 }
 0x387   : > { %v5305_v16 = vpop.f32.mrf.mxu2  ;;  %v4695_v58 = vor.u32 %v4694_v37, %v4690_v53  ;;  %v4698_v46 = vshll.u32 %v4380_v41, 16  ;;  %v4317_v48 = vadd.f32 %v8347_v17, %v8280_v24  ;;  %v4381_v41 = vld [vmem:[#allocation2 + $0xb4] sm:$0xf]  ;;  %v4716_v25 = vshrl.u32 %v4382_v19, 16 }
 0x388   : > { %v5446_v51 = vadd.f32 %v8543_v39, %v5410_v7 }
 0x389   : > { %v4900_v12 = vpop.f32.mrf.mxu1  ;;  %v4700_v37 = vrot.slane %v4698_v46, 5 }
 0x38a   : > { %v4973_v2 = vadd.f32 %v4900_v12, %v4315_v59  ;;  %v5203_v59 = vunpack.c.l.b16 %v5151_v35  ;;  %v4681_v12 = vrot.slane %v4679_v29, 4  ;;  %v5478_v36 = vmax.f32 %v5446_v51, 0.0  ;;  %v5013_v51 = vld [vmem:[#allocation2 + $0xb4] sm:$0xe] }
 0x38b   : > { %v5159_v29 = vrot.slane %v5157_v34, 4 }
 0x38c   : > { %v5375_v55 = vadd.f32 %v5302_v63, %v4973_v2  ;;  %v5223_v2 = vpack.c.b16 %v5204_v52, %v5203_v59  ;;  %v4685_v23 = vor.u32 %v4684_v56, %v4681_v12  ;;  %v8607_v5 = vpop.f32.mrf.mxu0  ;;  %v5160_v52 = vrot.slane %v8605_v21, 5 }
 0x38d   : > { %v4703_v12 = vshrl.u32 %v4381_v41, 16  ;;  %v4706_v56 = vshll.u32 %v4381_v41, 16 }
 0x38e   : > { %v5411_v3 = vmul.f32 %v8533_v62, %v5375_v55  ;;  %v4696_v55 = vrot.slane %v4695_v58, 4  ;;  %v5161_v24 = vsel %vm7313_vm12, %v5159_v29, %v5160_v52 }
 0x38f   : > { %v5307_v44 = vpop.f32.mrf.mxu2 }
 0x390   : > { %v5447_v63 = vadd.f32 %v8543_v39, %v5411_v3  ;;  %v4701_v59 = vsel %vm7389_vm1, %v4696_v55, %v4700_v37  ;;  %v4705_v37 = vrot.slane %v4703_v12, 4 }
 0x391   : > { %v4903_v14 = vpop.f32.mrf.mxu1  ;;  %v4802_v58 = vunpack.c.l.b16 %v4701_v59  ;;  %v9077_v59 = vld [vmem:[#allocation21_spill] sm:$0xff] }
 0x392   : > { %v5479_v49 = vmax.f32 %v5447_v63, 0.0  ;;  %v4974_v7 = vadd.f32 %v4903_v14, %v4316_v43  ;;  %v4686_v43 = vrot.slane %v4685_v23, 4  ;;  %v6607_v14 = vrot.slane %v5013_v51, 9 }
 0x393   : > { %v4708_v51 = vrot.slane %v4706_v56, 5 }
 0x394   : > { %6589 = vmatmul.msk.bf16.gmra.mxu1 %vm1951_vm13, %v4820_v10  ;;  %v5508_v0 = vpack.c.bf16 %v5479_v49, %v5478_v36  ;;  %6626 = vmatmul.msk.bf16.gmra.mxu2 %vm1951_vm13, %v5223_v2  ;;  %v5376_v30 = vadd.f32 %v5305_v16, %v4974_v7  ;;  %v4712_v16 = vshll.u32 %v4382_v19, 16  ;;  %v4691_v10 = vsel %vm7389_vm1, %v4686_v43, %v4690_v53  ;;  %v9076_v43 = vld [vmem:[#allocation22_spill] sm:$0xff] }
 0x395   : > { %v5158_v19 = vsel %vm7313_vm12, %v6607_v14, %v5157_v34  ;;  %v4718_v49 = vrot.slane %v4716_v25, 4  ;;  %v4801_v46 = vunpack.c.l.b16 %v4691_v10  ;;  %v4028_v14 = vadd.f32 %v9077_v59, %v9076_v43  ;;  %v5014_v10 = vld [vmem:[#allocation2 + $0xc0] sm:$0xe] }
 0x396   : > { %6636 = vmatmul.msk.bf16.gmra.mxu3 %vm1951_vm13, %v5508_v0  ;;  %v5412_v63 = vmul.f32 %v8533_v62, %v5376_v30  ;;  %v4714_v36 = vrot.slane %v4712_v16, 5  ;;  %v5206_v0 = vunpack.c.l.b16 %v5161_v24  ;;  %v5205_v55 = vunpack.c.l.b16 %v5158_v19  ;;  %v4384_v19 = vld [vmem:[#allocation2 + $0xc0] sm:$0xf] }
 0x397   : > { %v5310_v35 = vpop.f32.mrf.mxu2  ;;  %v4722_v24 = vshll.u32 %v8605_v21, 16  ;;  %v4709_v56 = vor.u32 %v4708_v51, %v4705_v37  ;;  %v4730_v21 = vshll.u32 %v4384_v19, 16 }
 0x398   : > { %v5448_v7 = vadd.f32 %v8543_v39, %v5412_v63  ;;  %v4719_v34 = vor.u32 %v4718_v49, %v4714_v36  ;;  %v5224_v25 = vpack.c.b16 %v5206_v0, %v5205_v55  ;;  %v4385_v63 = vld [vmem:[#allocation2 + $0xc4] sm:$0xf]  ;;  %v6608_v49 = vrot.slane %v5014_v10, 9 }
 0x399   : > { %v4905_v3 = vpop.f32.mrf.mxu1  ;;  %v4319_v0 = vadd.f32 %v8563_v18, %v4028_v14  ;;  %v4740_v18 = vshrl.u32 %v4385_v63, 16  ;;  %v4732_v59 = vrot.slane %v4730_v21, 5 }
 0x39a   : > { %v4975_v57 = vadd.f32 %v4905_v3, %v4317_v48  ;;  %v4821_v48 = vpack.c.b16 %v4802_v58, %v4801_v46  ;;  %v8626_v3 = vpop.f32.mrf.mxu0  ;;  %v5480_v52 = vmax.f32 %v5448_v7, 0.0  ;;  %v4720_v58 = vrot.slane %v4719_v34, 4 }
 0x39b   : > { %v4736_v34 = vshll.u32 %v4385_v63, 16 }
 0x39c   : > { %v5377_v17 = vadd.f32 %v5307_v44, %v4975_v57  ;;  %v9075_v44 = vld [vmem:[#allocation20_spill] sm:$0xff]  ;;  %v5164_v57 = vrot.slane %v4385_v63, 5 }
 0x39d   : > { %v4318_v23 = vadd.f32 %v8553_v31, %v9075_v44 }
 0x39e   : > { %v5413_v2 = vmul.f32 %v8533_v62, %v5377_v17  ;;  %v8633_v17 = vld [vmem:[#allocation2 + $0xc8] sm:$0x1]  ;;  %v5166_v7 = vrot.slane %v5164_v57, 4  ;;  %v5165_v37 = vsel %vm7313_vm12, %v6608_v49, %v5164_v57 }
 0x39f   : > { %v5312_v53 = vpop.f32.mrf.mxu2 }
 0x3a0   : > { %v5449_v30 = vadd.f32 %v8543_v39, %v5413_v2  ;;  %v5167_v2 = vrot.slane %v8633_v17, 5 }
 0x3a1   : > { %v4908_v29 = vpop.f32.mrf.mxu1 }
 0x3a2   : > { %v5481_v41 = vmax.f32 %v5449_v30, 0.0  ;;  %v4976_v16 = vadd.f32 %v4908_v29, %v4318_v23  ;;  %v4724_v30 = vrot.slane %v4722_v24, 5  ;;  %v4727_v23 = vshrl.u32 %v4384_v19, 16 }
 0x3a3   : > { %v5168_v51 = vsel %vm7313_vm12, %v5166_v7, %v5167_v2  ;;  %v5207_v24 = vunpack.c.l.b16 %v5165_v37 }
 0x3a4   : > { %6590 = vmatmul.msk.bf16.gmra.mxu1 %vm1951_vm13, %v4821_v48  ;;  %v5509_v31 = vpack.c.bf16 %v5481_v41, %v5480_v52  ;;  %6627 = vmatmul.msk.bf16.gmra.mxu2 %vm1951_vm13, %v5224_v25  ;;  %v5378_v12 = vadd.f32 %v5310_v35, %v4976_v16  ;;  %v4710_v35 = vrot.slane %v4709_v56, 4  ;;  %v4725_v48 = vsel %vm7389_vm1, %v4720_v58, %v4724_v30  ;;  %v8645_v52 = vpop.f32.mrf.mxu0 }
 0x3a5   : > { %v4804_v25 = vunpack.c.l.b16 %v4725_v48  ;;  %v4729_v43 = vrot.slane %v4727_v23, 4  ;;  %v5208_v57 = vunpack.c.l.b16 %v5168_v51  ;;  %v4742_v56 = vrot.slane %v4740_v18, 4  ;;  %v4388_v23 = vld [vmem:[#allocation2 + $0xd0] sm:$0xf]  ;;  %v5015_v48 = vld [vmem:[#allocation2 + $0xcc] sm:$0xe] }
 0x3a6   : > { %6637 = vmatmul.msk.bf16.gmra.mxu3 %vm1951_vm13, %v5509_v31  ;;  %v5414_v55 = vmul.f32 %v8533_v62, %v5378_v12  ;;  %v4715_v16 = vsel %vm7389_vm1, %v4710_v35, %v4714_v36  ;;  %v4738_v12 = vrot.slane %v4736_v34, 5  ;;  %v6609_v51 = vrot.slane %v5015_v48, 9 }
 0x3a7   : > { %v5315_v46 = vpop.f32.mrf.mxu2  ;;  %v4803_v10 = vunpack.c.l.b16 %v4715_v16  ;;  %v4733_v49 = vor.u32 %v4732_v59, %v4729_v43  ;;  %v5225_v30 = vpack.c.b16 %v5208_v57, %v5207_v24  ;;  %v5171_v34 = vrot.slane %v4388_v23, 5  ;;  %v4387_v57 = vld [vmem:[#allocation2 + $0xcc] sm:$0xf] }
 0x3a8   : > { %v5450_v14 = vadd.f32 %v8543_v39, %v5414_v55  ;;  %v4743_v21 = vor.u32 %v4742_v56, %v4738_v12  ;;  %v4746_v55 = vshll.u32 %v8633_v17, 16 }
 0x3a9   : > { %v4910_v44 = vpop.f32.mrf.mxu1  ;;  %v4822_v36 = vpack.c.b16 %v4804_v25, %v4803_v10  ;;  %v4734_v37 = vrot.slane %v4733_v49, 4  ;;  %v5172_v59 = vsel %vm7313_vm12, %v6609_v51, %v5171_v34  ;;  %v4764_v10 = vshrl.u32 %v4388_v23, 16 }
 0x3aa   : > { %v4977_v29 = vadd.f32 %v4910_v44, %v4319_v0  ;;  %v5482_v7 = vmax.f32 %v5450_v14, 0.0  ;;  %v1017_v44 = vld [vmem:[#allocation2 + $0xd4] sm:$0x1]  ;;  %v4744_v17 = vrot.slane %v4743_v21, 4  ;;  %v4748_v16 = vrot.slane %v4746_v55, 5 }
 0x3ab   : > { %v1018_v35 = vsel %vm7247_vm5, 0, %v1017_v44  ;;  %v5173_v14 = vrot.slane %v5171_v34, 4 }
 0x3ac   : > { %v5379_v41 = vadd.f32 %v5312_v53, %v4977_v29  ;;  %v4320_v53 = vadd.f32 %v8579_v42, %v8320_v40  ;;  %v4030_v40 = vadd.f32 %v8325_v60, %v8336_v32  ;;  %1019 = vst [vmem:[#allocation2 + $0xd4] sm:$0x1] %v1018_v35  ;;  %v8661_v18 = vpop.f32.mrf.mxu0  ;;  %v4739_v32 = vsel %vm7389_vm1, %v4734_v37, %v4738_v12 }
 0x3ad   : > { %v4749_v56 = vsel %vm7389_vm1, %v4744_v17, %v4748_v16  ;;  %v5209_v12 = vunpack.c.l.b16 %v5172_v59 }
 0x3ae   : > { %v5415_v31 = vmul.f32 %v8533_v62, %v5379_v41  ;;  %v4321_v25 = vadd.f32 %v8595_v61, %v4030_v40  ;;  %v4751_v61 = vshrl.u32 %v4387_v57, 16  ;;  %v4806_v55 = vunpack.c.l.b16 %v4749_v56 }
 0x3af   : > { %v5317_v58 = vpop.f32.mrf.mxu2 }
 0x3b0   : > { %v5451_v63 = vadd.f32 %v8543_v39, %v5415_v31 }
 0x3b1   : > { %v4913_v19 = vpop.f32.mrf.mxu1 }
 0x3b2   : > { %v5483_v2 = vmax.f32 %v5451_v63, 0.0  ;;  %v4978_v0 = vadd.f32 %v4913_v19, %v4320_v53  ;;  %v4754_v53 = vshll.u32 %v4387_v57, 16 }
 0x3b3   : > { %v4389_v63 = vld [vmem:[#allocation2 + $0xd4] sm:$0x1] }
 0x3b4   : > { %6591 = vmatmul.msk.bf16.gmra.mxu1 %vm1951_vm13, %v4822_v36  ;;  %v5510_v42 = vpack.c.bf16 %v5483_v2, %v5482_v7  ;;  %6628 = vmatmul.msk.bf16.gmra.mxu2 %vm1951_vm13, %v5225_v30  ;;  %v5380_v41 = vadd.f32 %v5315_v46, %v4978_v0  ;;  %v4760_v46 = vshll.u32 %v4388_v23, 16  ;;  %v4805_v36 = vunpack.c.l.b16 %v4739_v32  ;;  %v4270_v35 = vpop.f32.mrf.mxu0  ;;  %v9079_v32 = vld [vmem:[#allocation24_spill] sm:$0xff] }
 0x3b5   : > { %v5174_v49 = vrot.slane %v4389_v63, 5  ;;  %v4753_v7 = vrot.slane %v4751_v61, 4  ;;  %v4756_v2 = vrot.slane %v4754_v53, 5  ;;  %v4766_v30 = vrot.slane %v4764_v10, 4 }
 0x3b6   : > { %6638 = vmatmul.msk.bf16.gmra.mxu3 %vm1951_vm13, %v5510_v42  ;;  %v5416_v31 = vmul.f32 %v8533_v62, %v5380_v41  ;;  %v4762_v0 = vrot.slane %v4760_v46, 5  ;;  %v4770_v41 = vshll.u32 %v4389_v63, 16  ;;  %v4032_v59 = vadd.f32 %v9080_v27, %v9079_v32 }
 0x3b7   : > { %v5320_v43 = vpop.f32.mrf.mxu2  ;;  %v5175_v23 = vsel %vm7313_vm12, %v5173_v14, %v5174_v49  ;;  %v4757_v51 = vor.u32 %v4756_v2, %v4753_v7  ;;  %v9081_v2 = vld [vmem:[#allocation25_spill] sm:$0xff] }
 0x3b8   : > { %v5452_v44 = vadd.f32 %v8543_v39, %v5416_v31  ;;  %v5210_v29 = vunpack.c.l.b16 %v5175_v23  ;;  %v4767_v34 = vor.u32 %v4766_v30, %v4762_v0  ;;  %v4323_v57 = vadd.f32 %v8626_v3, %v4032_v59 }
 0x3b9   : > { %v4915_v60 = vpop.f32.mrf.mxu1  ;;  %v4758_v31 = vrot.slane %v4757_v51, 4  ;;  %v4324_v30 = vadd.f32 %v8645_v52, %v9081_v2  ;;  %v4326_v59 = vadd.f32 %v4270_v35, %v8389_v54 }
 0x3ba   : > { %v4979_v24 = vadd.f32 %v4915_v60, %v4321_v25  ;;  %v5226_v37 = vpack.c.b16 %v5210_v29, %v5209_v12  ;;  %v5484_v17 = vmax.f32 %v5452_v44, 0.0  ;;  %v4823_v60 = vpack.c.b16 %v4806_v55, %v4805_v36  ;;  %v9082_v29 = vld [vmem:[#allocation27_spill] sm:$0xff] }
 0x3bb   : > { %v4763_v56 = vsel %vm7389_vm1, %v4758_v31, %v4762_v0 }
 0x3bc   : > { %v5381_v19 = vadd.f32 %v5317_v58, %v4979_v24  ;;  %v4322_v58 = vadd.f32 %v8607_v5, %v8349_v38  ;;  %v4768_v38 = vrot.slane %v4767_v34, 4  ;;  %v4772_v5 = vrot.slane %v4770_v41, 5  ;;  %v4272_v61 = vpop.f32.mrf.mxu0 }
 0x3bd   : > { %v4807_v49 = vunpack.c.l.b16 %v4763_v56 }
 0x3be   : > { %v5417_v21 = vmul.f32 %v8533_v62, %v5381_v19  ;;  %v4773_v63 = vsel %vm7389_vm1, %v4768_v38, %v4772_v5 }
 0x3bf   : > { %v5322_v40 = vpop.f32.mrf.mxu2  ;;  %v4808_v12 = vunpack.c.l.b16 %v4773_v63 }
 0x3c0   : > { %v5453_v48 = vadd.f32 %v8543_v39, %v5417_v21 }
 0x3c1   : > { %v4918_v42 = vpop.f32.mrf.mxu1  ;;  %v4824_v0 = vpack.c.b16 %v4808_v12, %v4807_v49 }
 0x3c2   : > { %v5485_v16 = vmax.f32 %v5453_v48, 0.0  ;;  %v4980_v25 = vadd.f32 %v4918_v42, %v4322_v58  ;;  %v9083_v48 = vld [vmem:[#allocation26_spill] sm:$0xff] }
 0x3c3   : > { %v4034_v58 = vadd.f32 %v9083_v48, %v9082_v29 }
 0x3c4   : > { %6592 = vmatmul.msk.bf16.gmra.mxu1 %vm1951_vm13, %v4823_v60  ;;  %v5511_v14 = vpack.c.bf16 %v5485_v16, %v5484_v17  ;;  %6629 = vmatmul.msk.bf16.gmra.mxu2 %vm1951_vm13, %v5226_v37  ;;  %v5382_v24 = vadd.f32 %v5320_v43, %v4980_v25 }
 0x3c5   : > { %v4325_v51 = vadd.f32 %v8661_v18, %v4034_v58 }
 0x3c6   : > { %6639 = vmatmul.msk.bf16.gmra.mxu3 %vm1951_vm13, %v5511_v14  ;;  %v5418_v53 = vmul.f32 %v8533_v62, %v5382_v24  ;;  %v9084_v24 = vld [vmem:[#allocation28_spill] sm:$0xff] }
 0x3c7   : > { %v5325_v46 = vpop.f32.mrf.mxu2 }
 0x3c8   : > { %v5454_v43 = vadd.f32 %v8543_v39, %v5418_v53 }
 0x3c9   : > { %v4920_v10 = vpop.f32.mrf.mxu1 }
 0x3ca   : > { %v4981_v19 = vadd.f32 %v4920_v10, %v4323_v57  ;;  %v5486_v21 = vmax.f32 %v5454_v43, 0.0  ;;  %v4036_v57 = vadd.f32 %v9084_v24, %v8398_v15 }
 0x3cc   : > { %v5383_v36 = vadd.f32 %v5322_v40, %v4981_v19  ;;  %v4275_v40 = vpop.f32.mrf.mxu0  ;;  %v4327_v63 = vadd.f32 %v4272_v61, %v4036_v57 }
 0x3cd   : > { %v4328_v61 = vadd.f32 %v4275_v40, %v8407_v13 }
 0x3ce   : > { %v5419_v7 = vmul.f32 %v8533_v62, %v5383_v36 }
 0x3cf   : > { %v5327_v44 = vpop.f32.mrf.mxu2 }
 0x3d0   : > { %v5455_v3 = vadd.f32 %v8543_v39, %v5419_v7  ;;  %v8721_v7 = vpop.f32.mrf.mxu3 }
 0x3d1   : > { %v4923_v45 = vpop.f32.mrf.mxu1 }
 0x3d2   : > { %v5487_v55 = vmax.f32 %v5455_v3, 0.0  ;;  %v4982_v23 = vadd.f32 %v4923_v45, %v4324_v30  ;;  %v5667_v45 = vld [vmem:[%s476_s16] sm:$0x1] }
 0x3d4   : > { %6593 = vmatmul.msk.bf16.gmra.mxu1 %vm1951_vm13, %v4824_v0  ;;  %v5512_v42 = vpack.c.bf16 %v5487_v55, %v5486_v21  ;;  %v5384_v37 = vadd.f32 %v5325_v46, %v4982_v23  ;;  %v4277_v25 = vpop.f32.mrf.mxu0  ;;  %v5803_v21 = vld [vmem:[%s479_s27] sm:$0x1]  ;;  %v6736_v55 = vld [vmem:[%s7193_s24] sm:$0xff]   ;;  %v9085_v23 = vld [vmem:[#allocation29_spill] sm:$0xff] }
 0x3d5   : > { %v4038_v29 = vadd.f32 %v9085_v23, %v8416_v26  ;;  %v6737_v13 = vunpack.c.l.bf16 %v6736_v55  ;;  %v8729_v40 = vperm.slane %v5803_v21, 0 }
 0x3d6   : > { %6640 = vmatmul.msk.bf16.gmra.mxu3 %vm1951_vm13, %v5512_v42  ;;  %v5420_v41 = vmul.f32 %v8533_v62, %v5384_v37  ;;  %v8727_v42 = vperm.slane %v5667_v45, 0 }
 0x3d7   : > { %v5330_v34 = vpop.f32.mrf.mxu2  ;;  %v4329_v37 = vadd.f32 %v4277_v25, %v4038_v29 }
 0x3d8   : > { %v5456_v60 = vadd.f32 %v8543_v39, %v5420_v41 }
 0x3d9   : > { %v4925_v52 = vpop.f32.mrf.mxu1 }
 0x3da   : > { %v4983_v17 = vadd.f32 %v4925_v52, %v4325_v51  ;;  %v5488_v38 = vmax.f32 %v5456_v60, 0.0  ;;  %v8734_v51 = vld [vmem:[%s9019_s9] ss:$0 sm:$0xff]  ;;  %v5807_v60 = vmul.f32 %v6737_v13, %v8729_v40 }
 0x3dc   : > { %v5385_v16 = vadd.f32 %v5327_v44, %v4983_v17  ;;  %v4280_v56 = vpop.f32.mrf.mxu0 }
 0x3dd   : > { %v4330_v24 = vadd.f32 %v4280_v56, %v8425_v22 }
 0x3de   : > { %v5421_v32 = vmul.f32 %v8533_v62, %v5385_v16 }
 0x3df   : > { %v5332_v14 = vpop.f32.mrf.mxu2 }
 0x3e0   : > { %v5457_v27 = vadd.f32 %v8543_v39, %v5421_v32 }
 0x3e1   : > { %v4928_v31 = vpop.f32.mrf.mxu1 }
 0x3e2   : > { %v5489_v18 = vmax.f32 %v5457_v27, 0.0  ;;  %v4984_v5 = vadd.f32 %v4928_v31, %v4326_v59 }
 0x3e4   : > { %v5513_v46 = vpack.c.bf16 %v5489_v18, %v5488_v38  ;;  %v5386_v10 = vadd.f32 %v5330_v34, %v4984_v5  ;;  %v4282_v2 = vpop.f32.mrf.mxu0 }
 0x3e6   : > { %6641 = vmatmul.msk.bf16.gmra.mxu3 %vm1951_vm13, %v5513_v46  ;;  %v5422_v54 = vmul.f32 %v8533_v62, %v5386_v10 }
 0x3e7   : > { %v5335_v53 = vpop.f32.mrf.mxu2 }
 0x3e8   : > { %v5458_v49 = vadd.f32 %v8543_v39, %v5422_v54 }
 0x3e9   : > { %v4930_v19 = vpop.f32.mrf.mxu1 }
 0x3ea   : > { %v4985_v35 = vadd.f32 %v4930_v19, %v4327_v63  ;;  %v5490_v30 = vmax.f32 %v5458_v49, 0.0  ;;  %v6799_v49 = vld [vmem:[%s7193_s24 + $0x8] sm:$0xff]  }
 0x3ec   : > { %v5387_v36 = vadd.f32 %v5332_v14, %v4985_v35  ;;  %v4285_v32 = vpop.f32.mrf.mxu0  ;;  %v6738_v14 = vunpack.c.h.bf16 %v6736_v55 }
 0x3ee   : > { %v5423_v12 = vmul.f32 %v8533_v62, %v5387_v36 }
 0x3ef   : > { %v5337_v43 = vpop.f32.mrf.mxu2 }
 0x3f0   : > { %v5459_v15 = vadd.f32 %v8543_v39, %v5423_v12  ;;  %v9086_v12 = vld [vmem:[#allocation30_spill] sm:$0xff] }
 0x3f1   : > { %v4933_v3 = vpop.f32.mrf.mxu1 }
 0x3f2   : > { %v5491_v0 = vmax.f32 %v5459_v15, 0.0  ;;  %v4986_v44 = vadd.f32 %v4933_v3, %v4328_v61  ;;  %v4040_v15 = vadd.f32 %v9086_v12, %v8434_v28 }
 0x3f4   : > { %v5514_v48 = vpack.c.bf16 %v5491_v0, %v5490_v30  ;;  %v5388_v58 = vadd.f32 %v5335_v53, %v4986_v44  ;;  %v5808_v53 = vmul.f32 %v6738_v14, %v8729_v40  ;;  %v6741_v30 = vunpack.c.l.bf16 %v6799_v49 }
 0x3f5   : > { %v4331_v44 = vadd.f32 %v4282_v2, %v4040_v15 }
 0x3f6   : > { %6642 = vmatmul.msk.bf16.gmra.mxu3 %vm1951_vm13, %v5514_v48  ;;  %v5424_v52 = vmul.f32 %v8533_v62, %v5388_v58  ;;  %v5809_v58 = vmul.f32 %v6741_v30, %v8729_v40 }
 0x3f7   : > { %v5340_v34 = vpop.f32.mrf.mxu2 }
 0x3f8   : > { %v5460_v25 = vadd.f32 %v8543_v39, %v5424_v52  ;;  %v6742_v52 = vunpack.c.h.bf16 %v6799_v49 }
 0x3f9   : > { %v4935_v41 = vpop.f32.mrf.mxu1  ;;  %v5587_v26 = vpop.f32.mrf.mxu3 }
 0x3fa   : > { %v4987_v17 = vadd.f32 %v4935_v41, %v4329_v37  ;;  %v5671_v16 = vmul.f32 %v8727_v42, %v5587_v26  ;;  %v5492_v46 = vmax.f32 %v5460_v25, 0.0 }
 0x3fc   : > { %v5389_v27 = vadd.f32 %v5337_v43, %v4987_v17  ;;  %v5707_v59 = vadd.f32 %v8734_v51, %v5671_v16  ;;  %v4287_v43 = vpop.f32.mrf.mxu0 }
 0x3fe   : > { %v5425_v31 = vmul.f32 %v8533_v62, %v5389_v27  ;;  %v5839_v38 = vadd.f32 %v5807_v60, %v5707_v59  ;;  %v4332_v60 = vadd.f32 %v4285_v32, %v8443_v6 }
 0x3ff   : > { %v5342_v57 = vpop.f32.mrf.mxu2 }
 0x400   : > { %v5461_v18 = vadd.f32 %v8543_v39, %v5425_v31  ;;  %v5871_v5 = vmax.f32 %v5839_v38, 0.0  ;;  %v5810_v31 = vmul.f32 %v6742_v52, %v8729_v40 }
 0x401   : > { %v4938_v10 = vpop.f32.mrf.mxu1  ;;  %v5589_v63 = vpop.f32.mrf.mxu3 }
 0x402   : > { %v5493_v19 = vmax.f32 %v5461_v18, 0.0  ;;  %v5903_v54 = vpack.c.bf16 %v5871_v5, %v5871_v5  ;;  %v4988_v35 = vadd.f32 %v4938_v10, %v4330_v24  ;;  %v5672_v36 = vmul.f32 %v8727_v42, %v5589_v63 }
 0x404   : > { %5936 = vst.msk [vmem:[%s8751_s15] sm:$0xf] %vm5935_vm0, %v5903_v54  ;;  %v5708_v22 = vadd.f32 %v8734_v51, %v5672_v36  ;;  %v5515_v56 = vpack.c.bf16 %v5493_v19, %v5492_v46  ;;  %v5390_v61 = vadd.f32 %v5340_v34, %v4988_v35  ;;  %v4290_v26 = vpop.f32.mrf.mxu0  ;;  %v9087_v46 = vld [vmem:[#allocation31_spill] sm:$0xff] }
 0x405   : > { %v4042_v10 = vadd.f32 %v9087_v46, %v8452_v9 }
 0x406   : > { %v5840_v3 = vadd.f32 %v5808_v53, %v5708_v22  ;;  %6643 = vmatmul.msk.bf16.gmra.mxu3 %vm1951_vm13, %v5515_v56  ;;  %v5426_v28 = vmul.f32 %v8533_v62, %v5390_v61 }
 0x407   : > { %v5345_v45 = vpop.f32.mrf.mxu2  ;;  %v4333_v35 = vadd.f32 %v4287_v43, %v4042_v10 }
 0x408   : > { %v5872_v0 = vmax.f32 %v5840_v3, 0.0  ;;  %v5462_v34 = vadd.f32 %v8543_v39, %v5426_v28 }
 0x409   : > { %v4940_v21 = vpop.f32.mrf.mxu1  ;;  %v5592_v55 = vpop.f32.mrf.mxu3 }
 0x40a   : > { %v5904_v23 = vpack.c.bf16 %v5872_v0, %v5872_v0  ;;  %v4989_v29 = vadd.f32 %v4940_v21, %v4331_v44  ;;  %v5673_v48 = vmul.f32 %v8727_v42, %v5592_v55  ;;  %v5494_v59 = vmax.f32 %v5462_v34, 0.0 }
 0x40c   : > { %5937 = vst.msk [vmem:[%s8751_s15 + $0x4] sm:$0xf] %vm5935_vm0, %v5904_v23  ;;  %v5391_v13 = vadd.f32 %v5342_v57, %v4989_v29  ;;  %v5709_v37 = vadd.f32 %v8734_v51, %v5673_v48  ;;  %v6800_v57 = vld [vmem:[%s7193_s24 + $0x10] sm:$0xff]   ;;  %v4292_v22 = vpop.f32.mrf.mxu0  ;;  %v4334_v23 = vadd.f32 %v4290_v26, %v8461_v11 }
 0x40d   : > { %v6745_v19 = vunpack.c.l.bf16 %v6800_v57  ;;  %v6746_v43 = vunpack.c.h.bf16 %v6800_v57 }
 0x40e   : > { %v5427_v2 = vmul.f32 %v8533_v62, %v5391_v13  ;;  %v5841_v41 = vadd.f32 %v5809_v58, %v5709_v37 }
 0x40f   : > { %v5347_v27 = vpop.f32.mrf.mxu2  ;;  %v5811_v3 = vmul.f32 %v6745_v19, %v8729_v40  ;;  %v5812_v37 = vmul.f32 %v6746_v43, %v8729_v40 }
 0x410   : > { %v5463_v17 = vadd.f32 %v8543_v39, %v5427_v2  ;;  %v5873_v16 = vmax.f32 %v5841_v41, 0.0 }
 0x411   : > { %v4943_v25 = vpop.f32.mrf.mxu1  ;;  %v5594_v14 = vpop.f32.mrf.mxu3 }
 0x412   : > { %v5495_v38 = vmax.f32 %v5463_v17, 0.0  ;;  %v5905_v18 = vpack.c.bf16 %v5873_v16, %v5873_v16  ;;  %v4990_v5 = vadd.f32 %v4943_v25, %v4332_v60  ;;  %v5674_v24 = vmul.f32 %v8727_v42, %v5594_v14  ;;  %v9088_v16 = vld [vmem:[#allocation32_spill] sm:$0xff] }
 0x414   : > { %5938 = vst.msk [vmem:[%s8751_s15 + $0x8] sm:$0xf] %vm5935_vm0, %v5905_v18  ;;  %v5710_v63 = vadd.f32 %v8734_v51, %v5674_v24  ;;  %v5516_v6 = vpack.c.bf16 %v5495_v38, %v5494_v59  ;;  %v5392_v32 = vadd.f32 %v5345_v45, %v4990_v5  ;;  %v4295_v17 = vpop.f32.mrf.mxu0  ;;  %v8796_v38 = vld [vmem:[%s8384_s22] ss:$0 sm:$0xff] }
 0x416   : > { %v5842_v53 = vadd.f32 %v5810_v31, %v5710_v63  ;;  %6644 = vmatmul.msk.bf16.gmra.mxu3 %vm1951_vm13, %v5516_v6  ;;  %v5428_v49 = vmul.f32 %v8533_v62, %v5392_v32  ;;  %v8807_v32 = vld [vmem:[%s9016_s6] ss:$0 sm:$0xff] }
 0x417   : > { %v5350_v36 = vpop.f32.mrf.mxu2 }
 0x418   : > { %v5874_v54 = vmax.f32 %v5842_v53, 0.0  ;;  %v5464_v44 = vadd.f32 %v8543_v39, %v5428_v49 }
 0x419   : > { %v4945_v12 = vpop.f32.mrf.mxu1  ;;  %v5597_v15 = vpop.f32.mrf.mxu3 }
 0x41a   : > { %v5906_v9 = vpack.c.bf16 %v5874_v54, %v5874_v54  ;;  %v4991_v56 = vadd.f32 %v4945_v12, %v4333_v35  ;;  %v5675_v61 = vmul.f32 %v8727_v42, %v5597_v15  ;;  %v5496_v48 = vmax.f32 %v5464_v44, 0.0 }
 0x41b   : > { %v4336_v15 = vadd.f32 %v4295_v17, %v8479_v4 }
 0x41c   : > { %5939 = vst.msk [vmem:[%s8751_s15 + $0xc] sm:$0xf] %vm5935_vm0, %v5906_v9  ;;  %v5393_v30 = vadd.f32 %v5347_v27, %v4991_v56  ;;  %v5711_v0 = vadd.f32 %v8734_v51, %v5675_v61  ;;  %v4297_v54 = vpop.f32.mrf.mxu0 }
 0x41e   : > { %v5429_v45 = vmul.f32 %v8533_v62, %v5393_v30  ;;  %v5843_v28 = vadd.f32 %v5811_v3, %v5711_v0  ;;  %v6801_v62 = vld [vmem:[%s7193_s24 + $0x18] sm:$0xff]  }
 0x41f   : > { %v5352_v29 = vpop.f32.mrf.mxu2  ;;  %v6749_v59 = vunpack.c.l.bf16 %v6801_v62  ;;  %v6750_v19 = vunpack.c.h.bf16 %v6801_v62 }
 0x420   : > { %v5465_v21 = vadd.f32 %v8543_v39, %v5429_v45  ;;  %v5875_v55 = vmax.f32 %v5843_v28, 0.0  ;;  %v4044_v39 = vadd.f32 %v9088_v16, %v8470_v50  ;;  %v6802_v45 = vld [vmem:[%s7193_s24 + $0x20] sm:$0xff]   ;;  %v9089_v28 = vld [vmem:[#allocation33_spill] sm:$0xff] }
 0x421   : > { %v4948_v58 = vpop.f32.mrf.mxu1  ;;  %v5599_v13 = vpop.f32.mrf.mxu3  ;;  %v5813_v10 = vmul.f32 %v6749_v59, %v8729_v40  ;;  %v5814_v61 = vmul.f32 %v6750_v19, %v8729_v40  ;;  %v9090_v19 = vld [vmem:[#allocation34_spill] sm:$0xff] }
 0x422   : > { %v5497_v34 = vmax.f32 %v5465_v21, 0.0  ;;  %v5907_v52 = vpack.c.bf16 %v5875_v55, %v5875_v55  ;;  %v4992_v2 = vadd.f32 %v4948_v58, %v4334_v23  ;;  %v5676_v41 = vmul.f32 %v8727_v42, %v5599_v13 }
 0x423   : > { %v4335_v14 = vadd.f32 %v4292_v22, %v4044_v39  ;;  %v4046_v21 = vadd.f32 %v9089_v28, %v8488_v8 }
 0x424   : > { %5940 = vst.msk [vmem:[%s8751_s15 + $0x10] sm:$0xf] %vm5935_vm0, %v5907_v52  ;;  %v5712_v11 = vadd.f32 %v8734_v51, %v5676_v41  ;;  %v5517_v26 = vpack.c.bf16 %v5497_v34, %v5496_v48  ;;  %v5394_v60 = vadd.f32 %v5350_v36, %v4992_v2  ;;  %v6753_v48 = vunpack.c.l.bf16 %v6802_v45  ;;  %v4300_v58 = vpop.f32.mrf.mxu0 }
 0x426   : > { %v5844_v27 = vadd.f32 %v5812_v37, %v5712_v11  ;;  %6645 = vmatmul.msk.bf16.gmra.mxu3 %vm1951_vm13, %v5517_v26  ;;  %v5430_v18 = vmul.f32 %v8796_v38, %v5394_v60  ;;  %v4337_v37 = vadd.f32 %v4297_v54, %v4046_v21  ;;  %v5815_v17 = vmul.f32 %v6753_v48, %v8729_v40 }
 0x427   : > { %v5355_v31 = vpop.f32.mrf.mxu2  ;;  %v6754_v60 = vunpack.c.h.bf16 %v6802_v45  ;;  %v4048_v54 = vadd.f32 %v9090_v19, %v8506_v20 }
 0x428   : > { %v5876_v25 = vmax.f32 %v5844_v27, 0.0  ;;  %v5466_v53 = vadd.f32 %v8807_v32, %v5430_v18 }
 0x429   : > { %v4950_v5 = vpop.f32.mrf.mxu1  ;;  %v5602_v50 = vpop.f32.mrf.mxu3 }
 0x42a   : > { %v5908_v24 = vpack.c.bf16 %v5876_v25, %v5876_v25  ;;  %v4993_v57 = vadd.f32 %v4950_v5, %v4335_v14  ;;  %v5677_v46 = vmul.f32 %v8727_v42, %v5602_v50  ;;  %v5498_v22 = vmax.f32 %v5466_v53, 0.0  ;;  %v6803_v53 = vld [vmem:[%s7193_s24 + $0x28] sm:$0xff]  }
 0x42c   : > { %5941 = vst.msk [vmem:[%s8751_s15 + $0x14] sm:$0xf] %vm5935_vm0, %v5908_v24  ;;  %v5395_v63 = vadd.f32 %v5352_v29, %v4993_v57  ;;  %v5713_v6 = vadd.f32 %v8734_v51, %v5677_v46  ;;  %v5816_v24 = vmul.f32 %v6754_v60, %v8729_v40 }
 0x42e   : > { %v5431_v35 = vmul.f32 %v8796_v38, %v5395_v63  ;;  %v5845_v36 = vadd.f32 %v5813_v10, %v5713_v6  ;;  %v4302_v6 = vpop.f32.mrf.mxu0 }
 0x42f   : > { %v5357_v43 = vpop.f32.mrf.mxu2 }
 0x430   : > { %v5467_v49 = vadd.f32 %v8807_v32, %v5431_v35  ;;  %v5877_v12 = vmax.f32 %v5845_v36, 0.0 }
 0x431   : > { %v4953_v9 = vpop.f32.mrf.mxu1  ;;  %v5604_v56 = vpop.f32.mrf.mxu3 }
 0x432   : > { %v5499_v3 = vmax.f32 %v5467_v49, 0.0  ;;  %v5909_v30 = vpack.c.bf16 %v5877_v12, %v5877_v12  ;;  %v4994_v0 = vadd.f32 %v4953_v9, %v4336_v15  ;;  %v5678_v44 = vmul.f32 %v8727_v42, %v5604_v56 }
 0x433   : > { %v6757_v15 = vunpack.c.l.bf16 %v6803_v53  ;;  %v4339_v9 = vadd.f32 %v4302_v6, %v4048_v54 }
 0x434   : > { %5942 = vst.msk [vmem:[%s8751_s15 + $0x18] sm:$0xf] %vm5935_vm0, %v5909_v30  ;;  %v5714_v55 = vadd.f32 %v8734_v51, %v5678_v44  ;;  %v5518_v4 = vpack.c.bf16 %v5499_v3, %v5498_v22  ;;  %v5396_v23 = vadd.f32 %v5355_v31, %v4994_v0  ;;  %v4338_v31 = vadd.f32 %v4300_v58, %v8497_v33 }
 0x435   : > { %v5817_v44 = vmul.f32 %v6757_v15, %v8729_v40 }
 0x436   : > { %v5846_v29 = vadd.f32 %v5814_v61, %v5714_v55  ;;  %6646 = vmatmul.msk.bf16.gmra.mxu3 %vm1951_vm13, %v5518_v4  ;;  %v5432_v34 = vmul.f32 %v8796_v38, %v5396_v23  ;;  %v6758_v55 = vunpack.c.h.bf16 %v6803_v53 }
 0x437   : > { %v5360_v11 = vpop.f32.mrf.mxu2 }
 0x438   : > { %v5878_v13 = vmax.f32 %v5846_v29, 0.0  ;;  %v5468_v26 = vadd.f32 %v8807_v32, %v5432_v34 }
 0x439   : > { %v4955_v52 = vpop.f32.mrf.mxu1  ;;  %v5607_v2 = vpop.f32.mrf.mxu3 }
 0x43a   : > { %v5910_v41 = vpack.c.bf16 %v5878_v13, %v5878_v13  ;;  %v4995_v8 = vadd.f32 %v4955_v52, %v4337_v37  ;;  %v5679_v62 = vmul.f32 %v8727_v42, %v5607_v2  ;;  %v5500_v18 = vmax.f32 %v5468_v26, 0.0 }
 0x43b   : > { %v5818_v2 = vmul.f32 %v6758_v55, %v8729_v40 }
 0x43c   : > { %5943 = vst.msk [vmem:[%s8751_s15 + $0x1c] sm:$0xf] %vm5935_vm0, %v5910_v41  ;;  %v5397_v16 = vadd.f32 %v5357_v43, %v4995_v8  ;;  %v5715_v39 = vadd.f32 %v8734_v51, %v5679_v62  ;;  %v4305_v43 = vpop.f32.mrf.mxu0 }
 0x43d   : > { %v4340_v29 = vadd.f32 %v4305_v43, %v8515_v47 }
 0x43e   : > { %v5433_v27 = vmul.f32 %v8796_v38, %v5397_v16  ;;  %v5847_v59 = vadd.f32 %v5815_v17, %v5715_v39  ;;  %v6804_v16 = vld [vmem:[%s7193_s24 + $0x30] sm:$0xff]   ;;  %v4050_v39 = vadd.f32 %v8721_v7, %v8522_v1 }
 0x43f   : > { %v5362_v12 = vpop.f32.mrf.mxu2  ;;  %v6761_v60 = vunpack.c.l.bf16 %v6804_v16 }
 0x440   : > { %v5469_v25 = vadd.f32 %v8807_v32, %v5433_v27  ;;  %v5879_v14 = vmax.f32 %v5847_v59, 0.0 }
 0x441   : > { %v4958_v5 = vpop.f32.mrf.mxu1  ;;  %v5609_v50 = vpop.f32.mrf.mxu3 }
 0x442   : > { %v5501_v57 = vmax.f32 %v5469_v25, 0.0  ;;  %v5911_v46 = vpack.c.bf16 %v5879_v14, %v5879_v14  ;;  %v4996_v10 = vadd.f32 %v4958_v5, %v4338_v31  ;;  %v5680_v63 = vmul.f32 %v8727_v42, %v5609_v50 }
 0x443   : > { %v5819_v5 = vmul.f32 %v6761_v60, %v8729_v40 }
 0x444   : > { %5944 = vst.msk [vmem:[%s8751_s15 + $0x20] sm:$0xf] %vm5935_vm0, %v5911_v46  ;;  %v5716_v35 = vadd.f32 %v8734_v51, %v5680_v63  ;;  %v5519_v33 = vpack.c.bf16 %v5501_v57, %v5500_v18  ;;  %v5398_v36 = vadd.f32 %v5360_v11, %v4996_v10  ;;  %v4307_v26 = vpop.f32.mrf.mxu0  ;;  %v6762_v63 = vunpack.c.h.bf16 %v6804_v16 }
 0x445   : > { %v4341_v25 = vadd.f32 %v4307_v26, %v4050_v39 }
 0x446   : > { %v5848_v49 = vadd.f32 %v5816_v24, %v5716_v35  ;;  %6647 = vmatmul.msk.bf16.gmra.mxu3 %vm1951_vm13, %v5519_v33  ;;  %v5434_v56 = vmul.f32 %v8796_v38, %v5398_v36  ;;  %v5820_v36 = vmul.f32 %v6762_v63, %v8729_v40 }
 0x447   : > { %v5365_v13 = vpop.f32.mrf.mxu2 }
 0x448   : > { %v5880_v22 = vmax.f32 %v5848_v49, 0.0  ;;  %v5470_v21 = vadd.f32 %v8807_v32, %v5434_v56 }
 0x449   : > { %v4960_v61 = vpop.f32.mrf.mxu1  ;;  %v5612_v3 = vpop.f32.mrf.mxu3 }
 0x44a   : > { %v5912_v30 = vpack.c.bf16 %v5880_v22, %v5880_v22  ;;  %v4997_v20 = vadd.f32 %v4960_v61, %v4339_v9  ;;  %v5681_v0 = vmul.f32 %v8727_v42, %v5612_v3  ;;  %v5502_v37 = vmax.f32 %v5470_v21, 0.0  ;;  %v6805_v9 = vld [vmem:[%s7193_s24 + $0x38] sm:$0xff]  }
 0x44c   : > { %5945 = vst.msk [vmem:[%s8751_s15 + $0x24] sm:$0xf] %vm5935_vm0, %v5912_v30  ;;  %v5399_v45 = vadd.f32 %v5362_v12, %v4997_v20  ;;  %v5717_v28 = vadd.f32 %v8734_v51, %v5681_v0 }
 0x44e   : > { %v5435_v4 = vmul.f32 %v8796_v38, %v5399_v45  ;;  %v5849_v23 = vadd.f32 %v5817_v44, %v5717_v28  ;;  %v6766_v28 = vunpack.c.h.bf16 %v6805_v9 }
 0x44f   : > { %v5367_v57 = vpop.f32.mrf.mxu2 }
 0x450   : > { %v5471_v48 = vadd.f32 %v8807_v32, %v5435_v4  ;;  %v5881_v58 = vmax.f32 %v5849_v23, 0.0 }
 0x451   : > { %v4963_v34 = vpop.f32.mrf.mxu1  ;;  %v5614_v52 = vpop.f32.mrf.mxu3 }
 0x452   : > { %v5503_v41 = vmax.f32 %v5471_v48, 0.0  ;;  %v5913_v8 = vpack.c.bf16 %v5881_v58, %v5881_v58  ;;  %v4998_v62 = vadd.f32 %v4963_v34, %v4340_v29  ;;  %v5682_v17 = vmul.f32 %v8727_v42, %v5614_v52  ;;  %v6806_v48 = vld [vmem:[%s7193_s24 + $0x40] sm:$0xff]  }
 0x453   : > { %v5822_v29 = vmul.f32 %v6766_v28, %v8729_v40  ;;  %v6770_v16 = vunpack.c.h.bf16 %v6806_v48 }
 0x454   : > { %5946 = vst.msk [vmem:[%s8751_s15 + $0x28] sm:$0xf] %vm5935_vm0, %v5913_v8  ;;  %v5718_v47 = vadd.f32 %v8734_v51, %v5682_v17  ;;  %v5520_v11 = vpack.c.bf16 %v5503_v41, %v5502_v37  ;;  %v5400_v27 = vadd.f32 %v5365_v13, %v4998_v62  ;;  %v6769_v37 = vunpack.c.l.bf16 %v6806_v48 }
 0x455   : > { %v5824_v60 = vmul.f32 %v6770_v16, %v8729_v40 }
 0x456   : > { %v5850_v59 = vadd.f32 %v5818_v2, %v5718_v47  ;;  %6648 = vmatmul.msk.bf16.gmra.mxu3 %vm1951_vm13, %v5520_v11  ;;  %v5436_v1 = vmul.f32 %v8796_v38, %v5400_v27  ;;  %v5823_v8 = vmul.f32 %v6769_v37, %v8729_v40  ;;  %v6807_v27 = vld [vmem:[%s7193_s24 + $0x48] sm:$0xff]  }
 0x458   : > { %v5882_v14 = vmax.f32 %v5850_v59, 0.0  ;;  %v5472_v6 = vadd.f32 %v8807_v32, %v5436_v1 }
 0x459   : > { %v4965_v31 = vpop.f32.mrf.mxu1  ;;  %v5617_v18 = vpop.f32.mrf.mxu3 }
 0x45a   : > { %v5914_v7 = vpack.c.bf16 %v5882_v14, %v5882_v14  ;;  %v4999_v50 = vadd.f32 %v4965_v31, %v4341_v25  ;;  %v5683_v24 = vmul.f32 %v8727_v42, %v5617_v18  ;;  %v5504_v49 = vmax.f32 %v5472_v6, 0.0 }
 0x45b   : > { %v6773_v14 = vunpack.c.l.bf16 %v6807_v27 }
 0x45c   : > { %5947 = vst.msk [vmem:[%s8751_s15 + $0x2c] sm:$0xf] %vm5935_vm0, %v5914_v7  ;;  %v5401_v46 = vadd.f32 %v5367_v57, %v4999_v50  ;;  %v5719_v10 = vadd.f32 %v8734_v51, %v5683_v24  ;;  %v6774_v57 = vunpack.c.h.bf16 %v6807_v27 }
 0x45d   : > { %v5825_v7 = vmul.f32 %v6773_v14, %v8729_v40 }
 0x45e   : > { %v5437_v53 = vmul.f32 %v8796_v38, %v5401_v46  ;;  %v5851_v19 = vadd.f32 %v5819_v5, %v5719_v10 }
 0x460   : > { %v5473_v54 = vadd.f32 %v8807_v32, %v5437_v53  ;;  %v5883_v35 = vmax.f32 %v5851_v19, 0.0  ;;  %v6765_v32 = vunpack.c.l.bf16 %v6805_v9  ;;  %v5826_v53 = vmul.f32 %v6774_v57, %v8729_v40  ;;  %v6808_v19 = vld [vmem:[%s7193_s24 + $0x50] sm:$0xff]  }
 0x461   : > { %v5619_v33 = vpop.f32.mrf.mxu3 }
 0x462   : > { %v5505_v12 = vmax.f32 %v5473_v54, 0.0  ;;  %v5915_v15 = vpack.c.bf16 %v5883_v35, %v5883_v35  ;;  %v5684_v22 = vmul.f32 %v8727_v42, %v5619_v33  ;;  %v5821_v44 = vmul.f32 %v6765_v32, %v8729_v40 }
 0x463   : > { %v6777_v33 = vunpack.c.l.bf16 %v6808_v19 }
 0x464   : > { %5948 = vst.msk [vmem:[%s8751_s15 + $0x30] sm:$0xf] %vm5935_vm0, %v5915_v15  ;;  %v5720_v56 = vadd.f32 %v8734_v51, %v5684_v22  ;;  %v5521_v61 = vpack.c.bf16 %v5505_v12, %v5504_v49 }
 0x465   : > { %v5827_v22 = vmul.f32 %v6777_v33, %v8729_v40 }
 0x466   : > { %v5852_v38 = vadd.f32 %v5820_v36, %v5720_v56  ;;  %6649 = vmatmul.msk.bf16.gmra.mxu3 %vm1951_vm13, %v5521_v61  ;;  %v6778_v61 = vunpack.c.h.bf16 %v6808_v19 }
 0x468   : > { %v5884_v3 = vmax.f32 %v5852_v38, 0.0 }
 0x469   : > { %v5622_v30 = vpop.f32.mrf.mxu3 }
 0x46a   : > { %v5916_v20 = vpack.c.bf16 %v5884_v3, %v5884_v3  ;;  %v5685_v0 = vmul.f32 %v8727_v42, %v5622_v30 }
 0x46c   : > { %5949 = vst.msk [vmem:[%s8751_s15 + $0x34] sm:$0xf] %vm5935_vm0, %v5916_v20  ;;  %v5721_v43 = vadd.f32 %v8734_v51, %v5685_v0  ;;  %v5828_v20 = vmul.f32 %v6778_v61, %v8729_v40  ;;  %v6809_v0 = vld [vmem:[%s7193_s24 + $0x58] sm:$0xff]  }
 0x46e   : > { %v5853_v45 = vadd.f32 %v5821_v44, %v5721_v43 }
 0x470   : > { %v5885_v21 = vmax.f32 %v5853_v45, 0.0  ;;  %v6781_v45 = vunpack.c.l.bf16 %v6809_v0 }
 0x471   : > { %v5624_v55 = vpop.f32.mrf.mxu3 }
 0x472   : > { %v5917_v4 = vpack.c.bf16 %v5885_v21, %v5885_v21  ;;  %v5686_v23 = vmul.f32 %v8727_v42, %v5624_v55 }
 0x474   : > { %5950 = vst.msk [vmem:[%s8751_s15 + $0x38] sm:$0xf] %vm5935_vm0, %v5917_v4  ;;  %v5722_v58 = vadd.f32 %v8734_v51, %v5686_v23  ;;  %v5829_v23 = vmul.f32 %v6781_v45, %v8729_v40 }
 0x476   : > { %v5854_v13 = vadd.f32 %v5822_v29, %v5722_v58  ;;  %v6782_v58 = vunpack.c.h.bf16 %v6809_v0 }
 0x478   : > { %v5886_v34 = vmax.f32 %v5854_v13, 0.0 }
 0x479   : > { %v5627_v52 = vpop.f32.mrf.mxu3 }
 0x47a   : > { %v5918_v2 = vpack.c.bf16 %v5886_v34, %v5886_v34  ;;  %v5687_v41 = vmul.f32 %v8727_v42, %v5627_v52 }
 0x47c   : > { %5951 = vst.msk [vmem:[%s8751_s15 + $0x3c] sm:$0xf] %vm5935_vm0, %v5918_v2  ;;  %v5723_v62 = vadd.f32 %v8734_v51, %v5687_v41  ;;  %v5830_v2 = vmul.f32 %v6782_v58, %v8729_v40  ;;  %v6810_v41 = vld [vmem:[%s7193_s24 + $0x60] sm:$0xff]  }
 0x47e   : > { %v5855_v17 = vadd.f32 %v5823_v8, %v5723_v62 }
 0x480   : > { %v5887_v39 = vmax.f32 %v5855_v17, 0.0  ;;  %v6785_v17 = vunpack.c.l.bf16 %v6810_v41 }
 0x481   : > { %v5629_v47 = vpop.f32.mrf.mxu3 }
 0x482   : > { %v5919_v11 = vpack.c.bf16 %v5887_v39, %v5887_v39  ;;  %v5688_v26 = vmul.f32 %v8727_v42, %v5629_v47 }
 0x484   : > { %5952 = vst.msk [vmem:[%s8751_s15 + $0x40] sm:$0xf] %vm5935_vm0, %v5919_v11  ;;  %v5724_v59 = vadd.f32 %v8734_v51, %v5688_v26  ;;  %v5831_v26 = vmul.f32 %v6785_v17, %v8729_v40 }
 0x486   : > { %v5856_v25 = vadd.f32 %v5824_v60, %v5724_v59  ;;  %v6786_v59 = vunpack.c.h.bf16 %v6810_v41 }
 0x488   : > { %v5888_v31 = vmax.f32 %v5856_v25, 0.0 }
 0x489   : > { %v5632_v18 = vpop.f32.mrf.mxu3 }
 0x48a   : > { %v5920_v5 = vpack.c.bf16 %v5888_v31, %v5888_v31  ;;  %v5689_v1 = vmul.f32 %v8727_v42, %v5632_v18 }
 0x48c   : > { %5953 = vst.msk [vmem:[%s8751_s15 + $0x44] sm:$0xf] %vm5935_vm0, %v5920_v5  ;;  %v5725_v50 = vadd.f32 %v8734_v51, %v5689_v1  ;;  %v5832_v5 = vmul.f32 %v6786_v59, %v8729_v40  ;;  %v6811_v1 = vld [vmem:[%s7193_s24 + $0x68] sm:$0xff]  }
 0x48e   : > { %v5857_v24 = vadd.f32 %v5825_v7, %v5725_v50 }
 0x490   : > { %v5889_v46 = vmax.f32 %v5857_v24, 0.0  ;;  %v6789_v24 = vunpack.c.l.bf16 %v6811_v1 }
 0x491   : > { %v5634_v10 = vpop.f32.mrf.mxu3 }
 0x492   : > { %v5921_v63 = vpack.c.bf16 %v5889_v46, %v5889_v46  ;;  %v5690_v6 = vmul.f32 %v8727_v42, %v5634_v10 }
 0x494   : > { %5954 = vst.msk [vmem:[%s8751_s15 + $0x48] sm:$0xf] %vm5935_vm0, %v5921_v63  ;;  %v5726_v54 = vadd.f32 %v8734_v51, %v5690_v6  ;;  %v5833_v6 = vmul.f32 %v6789_v24, %v8729_v40 }
 0x496   : > { %v5858_v35 = vadd.f32 %v5826_v53, %v5726_v54  ;;  %v6790_v54 = vunpack.c.h.bf16 %v6811_v1 }
 0x498   : > { %v5890_v36 = vmax.f32 %v5858_v35, 0.0 }
 0x499   : > { %v5637_v49 = vpop.f32.mrf.mxu3 }
 0x49a   : > { %v5922_v12 = vpack.c.bf16 %v5890_v36, %v5890_v36  ;;  %v5691_v15 = vmul.f32 %v8727_v42, %v5637_v49 }
 0x49c   : > { %5955 = vst.msk [vmem:[%s8751_s15 + $0x4c] sm:$0xf] %vm5935_vm0, %v5922_v12  ;;  %v5727_v9 = vadd.f32 %v8734_v51, %v5691_v15  ;;  %v5834_v12 = vmul.f32 %v6790_v54, %v8729_v40  ;;  %v6812_v15 = vld [vmem:[%s7193_s24 + $0x70] sm:$0xff]  }
 0x49e   : > { %v5859_v56 = vadd.f32 %v5827_v22, %v5727_v9 }
 0x4a0   : > { %v5891_v38 = vmax.f32 %v5859_v56, 0.0  ;;  %v6793_v56 = vunpack.c.l.bf16 %v6812_v15 }
 0x4a1   : > { %v5639_v32 = vpop.f32.mrf.mxu3 }
 0x4a2   : > { %v5923_v3 = vpack.c.bf16 %v5891_v38, %v5891_v38  ;;  %v5692_v30 = vmul.f32 %v8727_v42, %v5639_v32 }
 0x4a4   : > { %5956 = vst.msk [vmem:[%s8751_s15 + $0x50] sm:$0xf] %vm5935_vm0, %v5923_v3  ;;  %v5728_v44 = vadd.f32 %v8734_v51, %v5692_v30  ;;  %v5835_v30 = vmul.f32 %v6793_v56, %v8729_v40 }
 0x4a6   : > { %v5860_v43 = vadd.f32 %v5828_v20, %v5728_v44  ;;  %v6794_v44 = vunpack.c.h.bf16 %v6812_v15 }
 0x4a8   : > { %v5892_v28 = vmax.f32 %v5860_v43, 0.0 }
 0x4a9   : > { %v5642_v21 = vpop.f32.mrf.mxu3 }
 0x4aa   : > { %v5924_v55 = vpack.c.bf16 %v5892_v28, %v5892_v28  ;;  %v5693_v4 = vmul.f32 %v8727_v42, %v5642_v21 }
 0x4ac   : > { %5957 = vst.msk [vmem:[%s8751_s15 + $0x54] sm:$0xf] %vm5935_vm0, %v5924_v55  ;;  %v5729_v29 = vadd.f32 %v8734_v51, %v5693_v4  ;;  %v5836_v55 = vmul.f32 %v6794_v44, %v8729_v40  ;;  %v6813_v4 = vld [vmem:[%s7193_s24 + $0x78] sm:$0xff]   ;;  %s6734_s24 = sshll.u32 %s7109_s21, 7  ;;  %s5969_s21 = scalar_lea.sflag [#allocation5], %s7187_s17 }
 0x4ad   : > { %s5980_s14 = scalar_lea.hbm %s9021_s11, %s6734_s24 }
 0x4ae   : > { %v5861_v48 = vadd.f32 %v5829_v23, %v5729_v29  ;;  %s5983_s16 = sshll.u32 %s5980_s14, 4  ;;  %s5984_s16 = int_to_ptr.hbm [resolvable:$true] %s5983_s16 }
 0x4af   : > { %s6964_s4 = sshra.s32 %s5984_s16, 4  ;;  %s6965_s4 = int_to_ptr.hbm [resolvable:$true] %s6964_s4 }
 0x4b0   : > { %v5893_v13 = vmax.f32 %v5861_v48, 0.0  ;;  %v6797_v48 = vunpack.c.l.bf16 %v6813_v4  ;;  %s6966_s29 = scalar_lea.hbm %s6965_s4, 128  ;;  %p6971_p9 = scmp.lt.s32.totalorder %s6965_s4, %s9021_s11 }
 0x4b1   : > { %v5644_v37 = vpop.f32.mrf.mxu3  ;;  %p6967_p1 = scmp.ne.s32.totalorder %s6965_s4, %s6966_s29  ;;  %p6972_p2 = scmp.lt.s32.totalorder %s6970_s26, %s6966_s29 }
 0x4b2   : > { %v5925_v34 = vpack.c.bf16 %v5893_v13, %v5893_v13  ;;  %v5694_v52 = vmul.f32 %v8727_v42, %v5644_v37 }
 0x4b3   : > { %p6968_p4 = pnand %p6967_p1, %p7157_p3  ;;  %p6973_p10 = por %p6972_p2, %p6971_p9 }
 0x4b4   : > { %5958 = vst.msk [vmem:[%s8751_s15 + $0x58] sm:$0xf] %vm5935_vm0, %v5925_v34  ;;  %v5730_v8 = vadd.f32 %v8734_v51, %v5694_v52  ;;  %v5837_v52 = vmul.f32 %v6797_v48, %v8729_v40 }
 0x4b5   : > { %p6969_p11 = pneg %p6968_p4 }
 0x4b6   : > { %v5862_v62 = vadd.f32 %v5830_v2, %v5730_v8  ;;  %v6798_v8 = vunpack.c.h.bf16 %v6813_v4 }
 0x4b7   : > { %p6974_p12 = pnand %p6973_p10, %p6969_p11 }
 0x4b8   : > { %v5894_v16 = vmax.f32 %v5862_v62, 0.0 }
 0x4b9   : > { %v5647_v39 = vpop.f32.mrf.mxu3 }
 0x4ba   : > { %v5926_v47 = vpack.c.bf16 %v5894_v16, %v5894_v16  ;;  %v5695_v11 = vmul.f32 %v8727_v42, %v5647_v39 }
 0x4bc   : > { %5959 = vst.msk [vmem:[%s8751_s15 + $0x5c] sm:$0xf] %vm5935_vm0, %v5926_v47  ;;  %v5731_v60 = vadd.f32 %v8734_v51, %v5695_v11  ;;  %v5838_v47 = vmul.f32 %v6798_v8, %v8729_v40 }
 0x4be   : > { %v5863_v27 = vadd.f32 %v5831_v26, %v5731_v60 }
 0x4c0   : > { %v5895_v25 = vmax.f32 %v5863_v27, 0.0 }
 0x4c1   : > { %v5649_v14 = vpop.f32.mrf.mxu3 }
 0x4c2   : > { %v5927_v31 = vpack.c.bf16 %v5895_v25, %v5895_v25  ;;  %v5696_v18 = vmul.f32 %v8727_v42, %v5649_v14 }
 0x4c4   : > { %5960 = vst.msk [vmem:[%s8751_s15 + $0x60] sm:$0xf] %vm5935_vm0, %v5927_v31  ;;  %v5732_v7 = vadd.f32 %v8734_v51, %v5696_v18 }
 0x4c6   : > { %v5864_v50 = vadd.f32 %v5832_v5, %v5732_v7 }
 0x4c8   : > { %v5896_v57 = vmax.f32 %v5864_v50, 0.0 }
 0x4c9   : > { %v5652_v46 = vpop.f32.mrf.mxu3 }
 0x4ca   : > { %v5928_v10 = vpack.c.bf16 %v5896_v57, %v5896_v57  ;;  %v5697_v63 = vmul.f32 %v8727_v42, %v5652_v46 }
 0x4cc   : > { %5961 = vst.msk [vmem:[%s8751_s15 + $0x64] sm:$0xf] %vm5935_vm0, %v5928_v10  ;;  %v5733_v53 = vadd.f32 %v8734_v51, %v5697_v63 }
 0x4ce   : > { %v5865_v19 = vadd.f32 %v5833_v6, %v5733_v53 }
 0x4d0   : > { %v5897_v35 = vmax.f32 %v5865_v19, 0.0 }
 0x4d1   : > { %v5654_v33 = vpop.f32.mrf.mxu3 }
 0x4d2   : > { %v5929_v36 = vpack.c.bf16 %v5897_v35, %v5897_v35  ;;  %v5698_v49 = vmul.f32 %v8727_v42, %v5654_v33 }
 0x4d4   : > { %5962 = vst.msk [vmem:[%s8751_s15 + $0x68] sm:$0xf] %vm5935_vm0, %v5929_v36  ;;  %v5734_v22 = vadd.f32 %v8734_v51, %v5698_v49 }
 0x4d6   : > { %v5866_v9 = vadd.f32 %v5834_v12, %v5734_v22 }
 0x4d8   : > { %v5898_v61 = vmax.f32 %v5866_v9, 0.0 }
 0x4d9   : > { %v5657_v38 = vpop.f32.mrf.mxu3 }
 0x4da   : > { %v5930_v32 = vpack.c.bf16 %v5898_v61, %v5898_v61  ;;  %v5699_v3 = vmul.f32 %v8727_v42, %v5657_v38 }
 0x4dc   : > { %5963 = vst.msk [vmem:[%s8751_s15 + $0x6c] sm:$0xf] %vm5935_vm0, %v5930_v32  ;;  %v5735_v20 = vadd.f32 %v8734_v51, %v5699_v3 }
 0x4de   : > { %v5867_v0 = vadd.f32 %v5835_v30, %v5735_v20 }
 0x4e0   : > { %v5899_v43 = vmax.f32 %v5867_v0, 0.0 }
 0x4e1   : > { %v5659_v45 = vpop.f32.mrf.mxu3 }
 0x4e2   : > { %v5931_v28 = vpack.c.bf16 %v5899_v43, %v5899_v43  ;;  %v5700_v21 = vmul.f32 %v8727_v42, %v5659_v45 }
 0x4e4   : > { %5964 = vst.msk [vmem:[%s8751_s15 + $0x70] sm:$0xf] %vm5935_vm0, %v5931_v28  ;;  %v5736_v23 = vadd.f32 %v8734_v51, %v5700_v21 }
 0x4e6   : > { %v5868_v29 = vadd.f32 %v5836_v55, %v5736_v23 }
 0x4e8   : > { %v5900_v58 = vmax.f32 %v5868_v29, 0.0 }
 0x4e9   : > { %v5662_v13 = vpop.f32.mrf.mxu3 }
 0x4ea   : > { %v5932_v37 = vpack.c.bf16 %v5900_v58, %v5900_v58  ;;  %v5701_v34 = vmul.f32 %v8727_v42, %v5662_v13 }
 0x4ec   : > { %5965 = vst.msk [vmem:[%s8751_s15 + $0x74] sm:$0xf] %vm5935_vm0, %v5932_v37  ;;  %v5737_v2 = vadd.f32 %v8734_v51, %v5701_v34 }
 0x4ee   : > { %v5869_v41 = vadd.f32 %v5837_v52, %v5737_v2 }
 0x4f0   : > { %v5901_v62 = vmax.f32 %v5869_v41, 0.0 }
 0x4f1   : > { %v5664_v17 = vpop.f32.mrf.mxu3 }
 0x4f2   : > { %v5933_v16 = vpack.c.bf16 %v5901_v62, %v5901_v62  ;;  %v5702_v39 = vmul.f32 %v8727_v42, %v5664_v17 }
 0x4f4   : > { %5966 = vst.msk [vmem:[%s8751_s15 + $0x78] sm:$0xf] %vm5935_vm0, %v5933_v16  ;;  %v5738_v11 = vadd.f32 %v8734_v51, %v5702_v39 }
 0x4f6   : > { %v5870_v26 = vadd.f32 %v5838_v47, %v5738_v11 }
 0x4f8   : > { %v5902_v60 = vmax.f32 %v5870_v26, 0.0 }
 0x4fa   : > { %v5934_v27 = vpack.c.bf16 %v5902_v60, %v5902_v60 }
 0x4fc   : > { %5967 = vst.msk [vmem:[%s8751_s15 + $0x7c] sm:$0xf] %vm5935_vm0, %v5934_v27 }
 0x4fd   : > { %6977 = shalt.err (!%p6974_p12)
}
 0x4fe   : > { %s7026_s17 = smov 64   ;;  %s7027_s15 = smov 4  }
 0x4ff   : > { %6823 = dma.vmem_to_hbm [thread:$0]  (%p7157_p3), %s5982_s23, 2048, %s5984_s16, %s5969_s21, %s7026_s17, %s7026_s17, %s7027_s15  }
 0x500 PF: > { %s9091_s24 = sld [smem:[#allocation12_spill]]  ;;  %p9093_p13 = scmp.ge.s32.totalorder %s7020_s20, 2 }
 0x502   : > { %p6834_p0 = pnand %p9093_p13, %p7123_p6 }
 0x504   : > { %p6835_p5 = pneg %p6834_p0 }
 0x506   : > { %s5998_s13 = sand.u32 1, %s9091_s24  }
 0x507   : > { %s5999_s14 = scalar_lea.sflag [#allocation5], %s5998_s13 }
 0x508   : > { %7003 = dma.done.wait (%p6835_p5), %s5999_s14, 2048  }
 0x509   : > { %7005 = vsyncadd (%p6835_p5), %s5999_s14, 4294965248  ;;  %s9094_s4 = sld [smem:[#allocation13_spill]]  ;;  %p25_p7 = scmp.ge.s32.totalorder %s7141_s12, 4  }
 0x50a   : > { %s9095_s19 = sld [smem:[#allocation15_spill]]  ;;  %s9096_s17 = smov %s7012_s18 }
 0x50b   : > { %s9098_s20 = smov %s7141_s12  ;;  %27 = sbr.rel (!%p25_p7) target bundleno = 8 (0x8), region = 136 }
 0x50f   : > { %s9097_s18 = smov %s9094_s4 }
 0x510   :  { %6005 = vsyncpa [#allocation4], 1 }
 0x511   :  { %6007 = vsyncpa [#allocation4 + $0x1], 1 }
 0x512   :  { %6008 = vsyncpa [#allocation7], 1 }
 0x513   :  { %6009 = vsyncpa [#allocation5], 1 }
 0x514   :  { %6011 = vsyncpa [#allocation5 + $0x1], 1 }

</bundles_post_ra>
